<compile_context>
chip_gen: v5e
topology: v5e:2x2
jax: 0.10.0
libtpu: 0.0.40
codegen_flags: <defaults>
</compile_context>

<pallas_src>
import functools
import math

import jax
import jax.numpy as jnp
from jax.experimental import pallas as pl
from jax.experimental.pallas import tpu as pltpu

# Scoped-VMEM limit with headroom under v7x's 64 MiB physical VMEM (plenty of
# room on v5e/v6e's 128 MiB).  All block sizes below are bounded well under it.
_VMEM_LIMIT = 48 * 1024 * 1024


# --------------------------------------------------------------------------
# Tile-size helpers
# --------------------------------------------------------------------------

def _row_tile(R, N):
    """Row tile for row-wise kernels: multiple of 8 (or full extent), VMEM-bounded."""
    if R % 8 != 0:
        return R                                   # full extent satisfies (8,128) rule
    budget = 4 << 20                               # bytes per input block
    max_rows = max(8, (budget // (N * 4)) // 8 * 8)
    return min(R, max_rows, 1024)


def _channel_tile(C, bytes_per_channel):
    """Channels per grid step: multiple of 8 dividing C (or full C), VMEM-bounded."""
    if C <= 8 or C % 8 != 0:
        return C
    budget = 4 << 20
    cb = max(8, min(C, (budget // max(bytes_per_channel, 1)) // 8 * 8))
    while C % cb:
        cb -= 8
    return cb


def _head_tile(BH, Np, hd):
    """Heads per attention grid step, bounding the (Np,Np) score tiles in VMEM."""
    budget = 6 << 20
    per_head = (2 * Np * Np + 4 * hd * Np) * 4
    hb = max(1, min(BH, budget // max(per_head, 1)))
    while BH % hb:
        hb -= 1
    return hb


# --------------------------------------------------------------------------
# Pallas kernels
# --------------------------------------------------------------------------

def _matmul_bias_kernel(x_ref, w_ref, b_ref, o_ref):
    o_ref[...] = (
        jnp.dot(x_ref[...], w_ref[...], preferred_element_type=jnp.float32)
        + b_ref[...]
    )


def pallas_matmul_bias(x, w, b):
    """y = x @ w + b.  x:(M,K) w:(K,N) b:(1,N), all f32."""
    M, K = x.shape
    _, N = w.shape
    # M tile: 512-row-class tiles (multiple of 8); padded rows of the cdiv grid
    # are masked on store.  Full-M fallback only for tiny, non-8-aligned M.
    tm = min(M, 512) if M % 8 == 0 else M
    # N tile keeps the output lane-dense; only tile when 128-divisible.
    tn = 256 if N % 256 == 0 else (128 if N % 128 == 0 else N)
    # K here is always a channel count (small), so the (K, tn) weight block is
    # tiny.  # TODO(synk): add a K grid axis + f32 VMEM accumulator if reused
    # with large K*N.
    grid = (pl.cdiv(M, tm), N // tn)
    return pl.pallas_call(
        _matmul_bias_kernel,
        out_shape=jax.ShapeDtypeStruct((M, N), jnp.float32),
        grid=grid,
        in_specs=[
            pl.BlockSpec((tm, K), lambda i, j: (i, 0)),
            pl.BlockSpec((K, tn), lambda i, j: (0, j)),
            pl.BlockSpec((1, tn), lambda i, j: (0, j)),
        ],
        out_specs=pl.BlockSpec((tm, tn), lambda i, j: (i, j)),
        compiler_params=pltpu.CompilerParams(
            dimension_semantics=("parallel", "parallel"),
            vmem_limit_bytes=_VMEM_LIMIT),
    )(x, w, b)


def _row_norm_act_kernel(x_ref, g_ref, b_ref, o_ref, *, eps, neg_slope):
    # x:(tr,N)  g,b:(tr,1) broadcast inside the kernel (no full-size gamma/beta).
    x = x_ref[...]
    mean = jnp.mean(x, axis=-1, keepdims=True)
    var = jnp.mean(jnp.square(x - mean), axis=-1, keepdims=True)
    y = (x - mean) * jax.lax.rsqrt(var + eps) * g_ref[...] + b_ref[...]
    if neg_slope is not None:
        y = jnp.where(y >= 0, y, neg_slope * y)
    o_ref[...] = y


def pallas_row_norm_act(x, g_col, b_col, eps, neg_slope=None):
    """Per-row normalization (biased var) + per-row affine (+ optional LeakyReLU).
    x:(R,N), g_col/b_col:(R,1)."""
    R, N = x.shape
    tr = _row_tile(R, N)
    # TODO(synk): two-pass reduce-axis tiling for rows that do not fit VMEM
    # (e.g. GroupNorm-sized N at very large volumes).
    kern = functools.partial(_row_norm_act_kernel, eps=eps, neg_slope=neg_slope)
    return pl.pallas_call(
        kern,
        out_shape=jax.ShapeDtypeStruct((R, N), jnp.float32),
        grid=(pl.cdiv(R, tr),),
        in_specs=[
            pl.BlockSpec((tr, N), lambda i: (i, 0)),
            pl.BlockSpec((tr, 1), lambda i: (i, 0)),
            pl.BlockSpec((tr, 1), lambda i: (i, 0)),
        ],
        out_specs=pl.BlockSpec((tr, N), lambda i: (i, 0)),
        compiler_params=pltpu.CompilerParams(
            dimension_semantics=("parallel",),
            vmem_limit_bytes=_VMEM_LIMIT),
    )(x, g_col, b_col)


def _group_norm_kernel(x_ref, g_ref, b_ref, o_ref, *, eps):
    # x:(1,C,Ns) one sample; stats over (C,Ns); per-channel affine from (1,C,1).
    x = x_ref[...]
    mean = jnp.mean(x)
    var = jnp.mean(jnp.square(x - mean))
    o_ref[...] = (x - mean) * jax.lax.rsqrt(var + eps) * g_ref[...] + b_ref[...]


def pallas_group_norm(x3, gamma, beta, eps):
    """GroupNorm(num_groups=1): x3:(B,C,Ns), gamma/beta:(1,C,1)."""
    B, C, Ns = x3.shape
    kern = functools.partial(_group_norm_kernel, eps=eps)
    return pl.pallas_call(
        kern,
        out_shape=jax.ShapeDtypeStruct((B, C, Ns), jnp.float32),
        grid=(B,),
        in_specs=[
            pl.BlockSpec((1, C, Ns), lambda i: (i, 0, 0)),
            pl.BlockSpec((1, C, 1), lambda i: (0, 0, 0)),
            pl.BlockSpec((1, C, 1), lambda i: (0, 0, 0)),
        ],
        out_specs=pl.BlockSpec((1, C, Ns), lambda i: (i, 0, 0)),
        compiler_params=pltpu.CompilerParams(
            dimension_semantics=("parallel",),
            vmem_limit_bytes=_VMEM_LIMIT),
    )(x3, gamma, beta)


def _attn_kernel(qT_ref, k_ref, v_ref, o_ref, *, scale):
    qT = qT_ref[...]                                   # (hb, Np, hd)
    k = k_ref[...]                                     # (hb, hd, Np)
    v = v_ref[...]                                     # (hb, hd, Np)
    s = scale * jnp.einsum("hnd,hdm->hnm", qT, k,
                           preferred_element_type=jnp.float32)
    s = s - jnp.max(s, axis=-1, keepdims=True)
    p = jnp.exp(s)
    # Softmax denominator via EUP reciprocal (free slot) instead of a divide.
    p = p * pl.reciprocal(jnp.sum(p, axis=-1, keepdims=True), approx=True)
    # v @ attn^T without transposing the (Np,Np) tile: contract last axes.
    o_ref[...] = jnp.einsum("hdm,hnm->hdn", v, p,
                            preferred_element_type=jnp.float32)


def pallas_attention(qT, k, v, scale):
    """Batched heads per grid step.  qT:(BH,Np,hd)  k,v:(BH,hd,Np)."""
    BH, Np, hd = qT.shape
    hb = _head_tile(BH, Np, hd)
    # TODO(synk): flash-style KV tiling for Np large enough that the (Np,Np)
    # score tile no longer fits VMEM.
    kern = functools.partial(_attn_kernel, scale=scale)
    return pl.pallas_call(
        kern,
        out_shape=jax.ShapeDtypeStruct((BH, hd, Np), jnp.float32),
        grid=(BH // hb,),
        in_specs=[
            pl.BlockSpec((hb, Np, hd), lambda i: (i, 0, 0)),
            pl.BlockSpec((hb, hd, Np), lambda i: (i, 0, 0)),
            pl.BlockSpec((hb, hd, Np), lambda i: (i, 0, 0)),
        ],
        out_specs=pl.BlockSpec((hb, hd, Np), lambda i: (i, 0, 0)),
        compiler_params=pltpu.CompilerParams(
            dimension_semantics=("parallel",),
            vmem_limit_bytes=_VMEM_LIMIT),
    )(qT, k, v)


def _dw_conv_kernel(x_ref, w_ref, o_ref):
    # Lane-dense: x:(cb, r3, M)  w:(cb, r3, 1)  o:(cb, M); M is the lane axis,
    # the r3 taps sit on sublanes and are reduced with a sublane-axis sum.
    o_ref[...] = jnp.sum(x_ref[...] * w_ref[...], axis=1)


def _dwt_conv_kernel(x_ref, w_ref, b_ref, o_ref):
    # Lane-dense output: x:(cb,1,M)  w:(cb,r3,1)  b:(cb,1,1)  o:(cb,r3,M).
    o_ref[...] = x_ref[...] * w_ref[...] + b_ref[...]


def _conv3x3_kernel(x_ref, w_ref, b_ref, o_ref, *, H, W, C):
    # x_ref : (H+2, W+2, C)  padded channels-last slab at depth d + kd
    # w_ref : (9*C, Cout)    the 9 (kh,kw) taps of depth tap kd
    # b_ref : (1, Cout)
    # o_ref : (H, W, Cout)   resident accumulator across the kd grid axis
    kd = pl.program_id(2)
    xs = x_ref[...]
    cols = jnp.concatenate(
        [xs[kh:kh + H, kw:kw + W, :].reshape(H * W, C)
         for kh in range(3) for kw in range(3)],
        axis=-1)                                                   # (H*W, 9C)
    y = jnp.dot(cols, w_ref[...], preferred_element_type=jnp.float32)

    @pl.when(kd == 0)
    def _():
        o_ref[...] = jnp.broadcast_to(b_ref[...], o_ref.shape)

    o_ref[...] += y.reshape(o_ref.shape)


# --------------------------------------------------------------------------
# Layout helpers and conv lowerings
# --------------------------------------------------------------------------

def _nc_to_rows(x):
    B, C, D, H, W = x.shape
    return jnp.transpose(x, (0, 2, 3, 4, 1)).reshape(B * D * H * W, C)


def _rows_to_nc(y, B, D, H, W):
    C = y.shape[-1]
    return jnp.transpose(y.reshape(B, D, H, W, C), (0, 4, 1, 2, 3))


def conv1x1(x, w, b=None):
    """nn.Conv3d kernel_size=1 as a tiled Pallas matmul.  w:(Cout,Cin,1,1,1)."""
    B, C, D, H, W = x.shape
    Cout = w.shape[0]
    xr = _nc_to_rows(x)
    wm = w.reshape(Cout, C).T
    bv = b if b is not None else jnp.zeros((Cout,), jnp.float32)
    y = pallas_matmul_bias(xr, wm, bv.reshape(1, Cout))
    return _rows_to_nc(y, B, D, H, W)


def conv3x3(x, w, b):
    """nn.Conv3d kernel_size=3 padding=1.  No HBM im2col: the 27 taps are built
    in VMEM per (batch, depth) slab and accumulated over a 3-long kd grid axis."""
    B, C, D, H, W = x.shape
    Cout = w.shape[0]
    xp = jnp.pad(jnp.transpose(x, (0, 2, 3, 4, 1)),
                 ((0, 0), (1, 1), (1, 1), (1, 1), (0, 0)))   # (B, D+2, H+2, W+2, C)
    wk = jnp.transpose(w, (2, 3, 4, 1, 0)).reshape(3, 9 * C, Cout)
    bv = b.reshape(1, Cout)
    kern = functools.partial(_conv3x3_kernel, H=H, W=W, C=C)
    y = pl.pallas_call(
        kern,
        out_shape=jax.ShapeDtypeStruct((B, D, H, W, Cout), jnp.float32),
        grid=(B, D, 3),
        in_specs=[
            pl.BlockSpec((None, None, H + 2, W + 2, C),
                         lambda bb, d, kd: (bb, d + kd, 0, 0, 0)),
            pl.BlockSpec((None, 9 * C, Cout), lambda bb, d, kd: (kd, 0, 0)),
            pl.BlockSpec((1, Cout), lambda bb, d, kd: (0, 0)),
        ],
        out_specs=pl.BlockSpec((None, None, H, W, Cout),
                               lambda bb, d, kd: (bb, d, 0, 0, 0)),
        compiler_params=pltpu.CompilerParams(
            dimension_semantics=("parallel", "parallel", "arbitrary"),
            vmem_limit_bytes=_VMEM_LIMIT),
    )(xp, wk, bv)
    return jnp.transpose(y, (0, 4, 1, 2, 3))


def instnorm_lrelu(x, gamma, beta, neg_slope=0.01, eps=1e-5):
    """InstanceNorm3d(affine=True) + LeakyReLU(0.01), per (batch, channel)."""
    B, C, D, H, W = x.shape
    N = D * H * W
    xr = x.reshape(B * C, N)
    g = jnp.tile(gamma, (B,)).reshape(B * C, 1)
    b = jnp.tile(beta, (B,)).reshape(B * C, 1)
    y = pallas_row_norm_act(xr, g, b, eps, neg_slope)
    return y.reshape(B, C, D, H, W)


# --------------------------------------------------------------------------
# Sub-modules
# --------------------------------------------------------------------------

def basic_conv(x, p):
    # ConvDropoutNormNonlin (1x1x1, bias) -> ConvDropoutNormNonlin (3x3x3, pad 1)
    h = conv1x1(x, p["mlp_w"], p["mlp_b"])
    h = instnorm_lrelu(h, p["mlp_gamma"], p["mlp_beta"])
    h = conv3x3(h, p["conv_w"], p["conv_b"])
    return instnorm_lrelu(h, p["conv_gamma"], p["conv_beta"])


def basic_trans(x, p, r, heads):
    B, C, D, H, W = x.shape
    Dp, Hp, Wp = D // r, H // r, W // r
    Np = Dp * Hp * Wp
    M = B * Np
    r3 = r ** 3
    Tc = p["qkv_w"].shape[0] // 3
    hd = Tc // heads

    # --- depthwise conv (kernel=r, stride=r, groups=C, no bias) -----------
    # Layout (C, r3, M): taps on sublanes, flattened (b, spatial) on lanes.
    xr = x.reshape(B, C, Dp, r, Hp, r, Wp, r)
    xr = jnp.transpose(xr, (1, 3, 5, 7, 0, 2, 4, 6)).reshape(C, r3, M)
    wdw = p["dw_w"].reshape(C, r3, 1)
    cb = _channel_tile(C, (r3 + 1) * M * 4)
    dw = pl.pallas_call(
        _dw_conv_kernel,
        out_shape=jax.ShapeDtypeStruct((C, M), jnp.float32),
        grid=(C // cb,),
        in_specs=[
            pl.BlockSpec((cb, r3, M), lambda i: (i, 0, 0)),
            pl.BlockSpec((cb, r3, 1), lambda i: (i, 0, 0)),
        ],
        out_specs=pl.BlockSpec((cb, M), lambda i: (i, 0)),
        compiler_params=pltpu.CompilerParams(
            dimension_semantics=("parallel",), vmem_limit_bytes=_VMEM_LIMIT),
    )(xr, wdw)

    # --- BatchNorm3d with batch statistics (per channel over B*spatial) ---
    dwn = pallas_row_norm_act(dw, p["bn_g"].reshape(C, 1),
                              p["bn_b"].reshape(C, 1), 1e-5, None)

    # --- qkv 1x1 conv (no bias): (3Tc, C) @ (C, M), output stays lane-dense
    wq = p["qkv_w"].reshape(3 * Tc, C)
    qkv = pallas_matmul_bias(wq, dwn, jnp.zeros((1, M), jnp.float32))  # (3Tc, M)
    qkv = jnp.transpose(qkv.reshape(3 * Tc, B, Np), (1, 0, 2))
    qkv = qkv.reshape(B, heads, 3 * hd, Np)
    q = qkv[:, :, :hd, :]
    k = qkv[:, :, hd:2 * hd, :]
    v = qkv[:, :, 2 * hd:, :]

    # --- attention: softmax(scale * q^T k), then v @ attn^T ---------------
    qT = jnp.transpose(q, (0, 1, 3, 2)).reshape(B * heads, Np, hd)
    k = k.reshape(B * heads, hd, Np)
    v = v.reshape(B * heads, hd, Np)
    att = pallas_attention(qT, k, v, float(hd) ** -0.5)   # (B*heads, hd, Np)
    att = att.reshape(B, Tc, Np)

    # --- ConvTranspose3d (kernel=r, stride=r, groups=Tc, bias) ------------
    xt = jnp.transpose(att, (1, 0, 2)).reshape(Tc, 1, M)
    wt = p["ct_w"].reshape(Tc, r3, 1)
    bt = p["ct_b"].reshape(Tc, 1, 1)
    tb = _channel_tile(Tc, (r3 + 1) * M * 4)
    ct = pl.pallas_call(
        _dwt_conv_kernel,
        out_shape=jax.ShapeDtypeStruct((Tc, r3, M), jnp.float32),
        grid=(Tc // tb,),
        in_specs=[
            pl.BlockSpec((tb, 1, M), lambda i: (i, 0, 0)),
            pl.BlockSpec((tb, r3, 1), lambda i: (i, 0, 0)),
            pl.BlockSpec((tb, 1, 1), lambda i: (i, 0, 0)),
        ],
        out_specs=pl.BlockSpec((tb, r3, M), lambda i: (i, 0, 0)),
        compiler_params=pltpu.CompilerParams(
            dimension_semantics=("parallel",), vmem_limit_bytes=_VMEM_LIMIT),
    )(xt, wt, bt)
    ct = ct.reshape(Tc, r, r, r, B, Dp, Hp, Wp)
    ct = jnp.transpose(ct, (4, 0, 5, 1, 6, 2, 7, 3)).reshape(B, Tc, D, H, W)

    # --- GroupNorm(num_groups=1): per-sample stats, per-channel affine -----
    y = pallas_group_norm(ct.reshape(B, Tc, D * H * W),
                          p["gn_g"].reshape(1, Tc, 1),
                          p["gn_b"].reshape(1, Tc, 1), 1e-5)
    return y.reshape(B, Tc, D, H, W)


def basic_block_forward(x, params, r, heads, trans_channels):
    conv_f = basic_conv(x, params["conv_head"])
    if trans_channels != 0:
        trans_f = basic_trans(x, params["trans_head"], r, heads)
        cat = jnp.concatenate([conv_f, trans_f], axis=1)
        pm = params["mlp"]
        m = conv1x1(cat, pm["w"], None)            # 1x1x1 conv, no bias
        m = instnorm_lrelu(m, pm["gamma"], pm["beta"])
        return m + x
    return conv_f + x


# --------------------------------------------------------------------------
# Deterministic parameter init (PyTorch-like uniform fan-in bounds)
# --------------------------------------------------------------------------

def init_params(key, in_ch, conv_in, conv_out, trans_ch, r, heads):
    keys = jax.random.split(key, 10)

    def u(k, shape, fan_in):
        bound = 1.0 / math.sqrt(fan_in)
        return jax.random.uniform(k, shape, jnp.float32, -bound, bound)

    return {
        "conv_head": {
            "mlp_w": u(keys[0], (conv_in, in_ch, 1, 1, 1), in_ch),
            "mlp_b": u(keys[1], (conv_in,), in_ch),
            "mlp_gamma": jnp.ones((conv_in,), jnp.float32),
            "mlp_beta": jnp.zeros((conv_in,), jnp.float32),
            "conv_w": u(keys[2], (conv_out, conv_in, 3, 3, 3), conv_in * 27),
            "conv_b": u(keys[3], (conv_out,), conv_in * 27),
            "conv_gamma": jnp.ones((conv_out,), jnp.float32),
            "conv_beta": jnp.zeros((conv_out,), jnp.float32),
        },
        "trans_head": {
            "dw_w": u(keys[4], (in_ch, 1, r, r, r), r ** 3),
            "bn_g": jnp.ones((in_ch,), jnp.float32),
            "bn_b": jnp.zeros((in_ch,), jnp.float32),
            "qkv_w": u(keys[5], (3 * trans_ch, in_ch, 1, 1, 1), in_ch),
            "ct_w": u(keys[6], (trans_ch, 1, r, r, r), r ** 3),
            "ct_b": u(keys[7], (trans_ch,), r ** 3),
            "gn_g": jnp.ones((trans_ch,), jnp.float32),
            "gn_b": jnp.zeros((trans_ch,), jnp.float32),
        },
        "mlp": {
            "w": u(keys[8], (conv_out + trans_ch, conv_out + trans_ch, 1, 1, 1),
                   conv_out + trans_ch),
            "gamma": jnp.ones((conv_out + trans_ch,), jnp.float32),
            "beta": jnp.zeros((conv_out + trans_ch,), jnp.float32),
        },
    }


if __name__ == "__main__":
    # Residual requires conv_out + Trans_channels == in_channels.
    B, in_ch, D, H, W = 2, 8, 8, 8, 8
    conv_in, conv_out, trans_ch, r, heads = 8, 4, 4, 2, 2

    key = jax.random.PRNGKey(0)
    kx, kp = jax.random.split(key)
    x = jax.random.normal(kx, (B, in_ch, D, H, W), jnp.float32)
    params = init_params(kp, in_ch, conv_in, conv_out, trans_ch, r, heads)

    fwd = jax.jit(functools.partial(basic_block_forward, r=r, heads=heads,
                                    trans_channels=trans_ch))
    out = fwd(x, params)
    jax.block_until_ready(out)
    assert out.shape == (B, conv_out + trans_ch, D, H, W)
    assert out.dtype == jnp.float32
    print("KERNEL_OK")
</pallas_src>

<mosaic_0001>
module attributes {stable_mosaic.version = 11 : i64} {
  func.func @_dw_conv_kernel(%arg0: i32, %arg1: memref<8x8x128xf32, #tpu.memory_space<vmem>>, %arg2: memref<8x8x1xf32, #tpu.memory_space<vmem>>, %arg3: memref<8x128xf32, #tpu.memory_space<vmem>>) attributes {dimension_semantics = [#tpu.dimension_semantics<parallel>], iteration_bounds = array<i64: 1>, scalar_prefetch = 0 : i64, scratch_operands = 0 : i64, tpu.core_type = #tpu.core_type<tc>, window_params = [{transform_indices = @transform_0, window_bounds = array<i64: 8, 8, 128>}, {transform_indices = @transform_1, window_bounds = array<i64: 8, 8, 1>}, {transform_indices = @transform_2, window_bounds = array<i64: 8, 128>}]} {
    %c0 = arith.constant 0 : index
    %c0_0 = arith.constant 0 : index
    %c0_1 = arith.constant 0 : index
    %0 = vector.load %arg1[%c0, %c0_0, %c0_1] : memref<8x8x128xf32, #tpu.memory_space<vmem>>, vector<8x8x128xf32>
    %c0_2 = arith.constant 0 : index
    %c0_3 = arith.constant 0 : index
    %c0_4 = arith.constant 0 : index
    %1 = vector.load %arg2[%c0_2, %c0_3, %c0_4] : memref<8x8x1xf32, #tpu.memory_space<vmem>>, vector<8x8x1xf32>
    %2 = vector.broadcast %1 : vector<8x8x1xf32> to vector<8x8x128xf32>
    %3 = arith.mulf %0, %2 : vector<8x8x128xf32>
    %cst = arith.constant dense<0.000000e+00> : vector<8x128xf32>
    %4 = vector.multi_reduction <add>, %3, %cst [1] : vector<8x8x128xf32> to vector<8x128xf32>
    %c0_5 = arith.constant 0 : index
    %c0_6 = arith.constant 0 : index
    %5 = vector.load %arg3[%c0_5, %c0_6] : memref<8x128xf32, #tpu.memory_space<vmem>>, vector<8x128xf32>
    tpu.vector_store %arg3[%c0_5, %c0_6], %4 {strides = array<i32>} : memref<8x128xf32, #tpu.memory_space<vmem>>, vector<8x128xf32>,
    return
  }
  func.func @transform_0(%arg0: i32) -> (i32, i32, i32) {
    %c0_i32 = arith.constant 0 : i32
    %c0_i32_0 = arith.constant 0 : i32
    %c0_i32_1 = arith.constant 0 : i32
    return %arg0, %c0_i32, %c0_i32_0 : i32, i32, i32
  }
  func.func @transform_1(%arg0: i32) -> (i32, i32, i32) {
    %c0_i32 = arith.constant 0 : i32
    %c0_i32_0 = arith.constant 0 : i32
    %c0_i32_1 = arith.constant 0 : i32
    return %arg0, %c0_i32, %c0_i32_0 : i32, i32, i32
  }
  func.func @transform_2(%arg0: i32) -> (i32, i32) {
    %c0_i32 = arith.constant 0 : i32
    %c0_i32_0 = arith.constant 0 : i32
    return %arg0, %c0_i32 : i32, i32
  }
}

module attributes {stable_mosaic.version = 11 : i64} {
  func.func @_row_norm_act_kernel(%arg0: i32, %arg1: memref<8x128xf32, #tpu.memory_space<vmem>>, %arg2: memref<8x1xf32, #tpu.memory_space<vmem>>, %arg3: memref<8x1xf32, #tpu.memory_space<vmem>>, %arg4: memref<8x128xf32, #tpu.memory_space<vmem>>) attributes {dimension_semantics = [#tpu.dimension_semantics<parallel>], iteration_bounds = array<i64: 1>, scalar_prefetch = 0 : i64, scratch_operands = 0 : i64, tpu.core_type = #tpu.core_type<tc>, window_params = [{transform_indices = @transform_0, window_bounds = array<i64: 8, 128>}, {transform_indices = @transform_1, window_bounds = array<i64: 8, 1>}, {transform_indices = @transform_2, window_bounds = array<i64: 8, 1>}, {transform_indices = @transform_3, window_bounds = array<i64: 8, 128>}]} {
    %c0 = arith.constant 0 : index
    %c0_0 = arith.constant 0 : index
    %0 = vector.load %arg1[%c0, %c0_0] : memref<8x128xf32, #tpu.memory_space<vmem>>, vector<8x128xf32>
    %cst = arith.constant dense<0.000000e+00> : vector<8xf32>
    %1 = vector.multi_reduction <add>, %0, %cst [1] : vector<8x128xf32> to vector<8xf32>
    %2 = vector.shape_cast %1 : vector<8xf32> to vector<8x1xf32>
    %cst_1 = arith.constant 1.280000e+02 : f32
    %3 = vector.broadcast %cst_1 : f32 to vector<8x1xf32>
    %4 = arith.divf %2, %3 : vector<8x1xf32>
    %5 = vector.broadcast %4 : vector<8x1xf32> to vector<8x128xf32>
    %6 = arith.subf %0, %5 : vector<8x128xf32>
    %7 = arith.mulf %6, %6 : vector<8x128xf32>
    %cst_2 = arith.constant dense<0.000000e+00> : vector<8xf32>
    %8 = vector.multi_reduction <add>, %7, %cst_2 [1] : vector<8x128xf32> to vector<8xf32>
    %9 = vector.shape_cast %8 : vector<8xf32> to vector<8x1xf32>
    %cst_3 = arith.constant 1.280000e+02 : f32
    %10 = vector.broadcast %cst_3 : f32 to vector<8x1xf32>
    %11 = arith.divf %9, %10 : vector<8x1xf32>
    %12 = vector.broadcast %4 : vector<8x1xf32> to vector<8x128xf32>
    %13 = arith.subf %0, %12 : vector<8x128xf32>
    %cst_4 = arith.constant 9.99999974E-6 : f32
    %14 = vector.broadcast %cst_4 : f32 to vector<8x1xf32>
    %15 = arith.addf %11, %14 : vector<8x1xf32>
    %16 = math.rsqrt %15 : vector<8x1xf32>
    %17 = vector.broadcast %16 : vector<8x1xf32> to vector<8x128xf32>
    %18 = arith.mulf %13, %17 : vector<8x128xf32>
    %c0_5 = arith.constant 0 : index
    %c0_6 = arith.constant 0 : index
    %19 = vector.load %arg2[%c0_5, %c0_6] : memref<8x1xf32, #tpu.memory_space<vmem>>, vector<8x1xf32>
    %20 = vector.broadcast %19 : vector<8x1xf32> to vector<8x128xf32>
    %21 = arith.mulf %18, %20 : vector<8x128xf32>
    %c0_7 = arith.constant 0 : index
    %c0_8 = arith.constant 0 : index
    %22 = vector.load %arg3[%c0_7, %c0_8] : memref<8x1xf32, #tpu.memory_space<vmem>>, vector<8x1xf32>
    %23 = vector.broadcast %22 : vector<8x1xf32> to vector<8x128xf32>
    %24 = arith.addf %21, %23 : vector<8x128xf32>
    %c0_9 = arith.constant 0 : index
    %c0_10 = arith.constant 0 : index
    %25 = vector.load %arg4[%c0_9, %c0_10] : memref<8x128xf32, #tpu.memory_space<vmem>>, vector<8x128xf32>
    tpu.vector_store %arg4[%c0_9, %c0_10], %24 {strides = array<i32>} : memref<8x128xf32, #tpu.memory_space<vmem>>, vector<8x128xf32>,
    return
  }
  func.func @transform_0(%arg0: i32) -> (i32, i32) {
    %c0_i32 = arith.constant 0 : i32
    %c0_i32_0 = arith.constant 0 : i32
    return %arg0, %c0_i32 : i32, i32
  }
  func.func @transform_1(%arg0: i32) -> (i32, i32) {
    %c0_i32 = arith.constant 0 : i32
    %c0_i32_0 = arith.constant 0 : i32
    return %arg0, %c0_i32 : i32, i32
  }
  func.func @transform_2(%arg0: i32) -> (i32, i32) {
    %c0_i32 = arith.constant 0 : i32
    %c0_i32_0 = arith.constant 0 : i32
    return %arg0, %c0_i32 : i32, i32
  }
  func.func @transform_3(%arg0: i32) -> (i32, i32) {
    %c0_i32 = arith.constant 0 : i32
    %c0_i32_0 = arith.constant 0 : i32
    return %arg0, %c0_i32 : i32, i32
  }
}

module attributes {stable_mosaic.version = 11 : i64} {
  func.func @_matmul_bias_kernel(%arg0: i32, %arg1: i32, %arg2: memref<12x8xf32, #tpu.memory_space<vmem>>, %arg3: memref<8x128xf32, #tpu.memory_space<vmem>>, %arg4: memref<1x128xf32, #tpu.memory_space<vmem>>, %arg5: memref<12x128xf32, #tpu.memory_space<vmem>>) attributes {dimension_semantics = [#tpu.dimension_semantics<parallel>, #tpu.dimension_semantics<parallel>], iteration_bounds = array<i64: 1, 1>, scalar_prefetch = 0 : i64, scratch_operands = 0 : i64, tpu.core_type = #tpu.core_type<tc>, window_params = [{transform_indices = @transform_0, window_bounds = array<i64: 12, 8>}, {transform_indices = @transform_1, window_bounds = array<i64: 8, 128>}, {transform_indices = @transform_2, window_bounds = array<i64: 1, 128>}, {transform_indices = @transform_3, window_bounds = array<i64: 12, 128>}]} {
    %c0 = arith.constant 0 : index
    %c0_0 = arith.constant 0 : index
    %0 = vector.load %arg2[%c0, %c0_0] : memref<12x8xf32, #tpu.memory_space<vmem>>, vector<12x8xf32>
    %c0_1 = arith.constant 0 : index
    %c0_2 = arith.constant 0 : index
    %1 = vector.load %arg3[%c0_1, %c0_2] : memref<8x128xf32, #tpu.memory_space<vmem>>, vector<8x128xf32>
    %cst = arith.constant dense<0.000000e+00> : vector<12x128xf32>
    %2 = tpu.matmul %0, %1, %cst {dimension_numbers = #tpu.dot_dimension_numbers<[1], [0], [0], [1], [0, 0, 1, 1], [], []>} : vector<12x8xf32>, vector<8x128xf32>, vector<12x128xf32> -> vector<12x128xf32>
    %c0_3 = arith.constant 0 : index
    %c0_4 = arith.constant 0 : index
    %3 = vector.load %arg4[%c0_3, %c0_4] : memref<1x128xf32, #tpu.memory_space<vmem>>, vector<1x128xf32>
    %4 = vector.broadcast %3 : vector<1x128xf32> to vector<12x128xf32>
    %5 = arith.addf %2, %4 : vector<12x128xf32>
    %c0_5 = arith.constant 0 : index
    %c0_6 = arith.constant 0 : index
    %6 = vector.load %arg5[%c0_5, %c0_6] : memref<12x128xf32, #tpu.memory_space<vmem>>, vector<12x128xf32>
    tpu.vector_store %arg5[%c0_5, %c0_6], %5 {strides = array<i32>} : memref<12x128xf32, #tpu.memory_space<vmem>>, vector<12x128xf32>,
    return
  }
  func.func @transform_0(%arg0: i32, %arg1: i32) -> (i32, i32) {
    %c0_i32 = arith.constant 0 : i32
    %c0_i32_0 = arith.constant 0 : i32
    return %arg0, %c0_i32 : i32, i32
  }
  func.func @transform_1(%arg0: i32, %arg1: i32) -> (i32, i32) {
    %c0_i32 = arith.constant 0 : i32
    %c0_i32_0 = arith.constant 0 : i32
    return %c0_i32, %arg1 : i32, i32
  }
  func.func @transform_2(%arg0: i32, %arg1: i32) -> (i32, i32) {
    %c0_i32 = arith.constant 0 : i32
    %c0_i32_0 = arith.constant 0 : i32
    return %c0_i32, %arg1 : i32, i32
  }
  func.func @transform_3(%arg0: i32, %arg1: i32) -> (i32, i32) {
    %c0_i32 = arith.constant 0 : i32
    return %arg0, %arg1 : i32, i32
  }
}

module attributes {stable_mosaic.version = 11 : i64} {
  func.func @_attn_kernel(%arg0: i32, %arg1: memref<4x64x2xf32, #tpu.memory_space<vmem>>, %arg2: memref<4x2x64xf32, #tpu.memory_space<vmem>>, %arg3: memref<4x2x64xf32, #tpu.memory_space<vmem>>, %arg4: memref<4x2x64xf32, #tpu.memory_space<vmem>>) attributes {dimension_semantics = [#tpu.dimension_semantics<parallel>], iteration_bounds = array<i64: 1>, scalar_prefetch = 0 : i64, scratch_operands = 0 : i64, tpu.core_type = #tpu.core_type<tc>, window_params = [{transform_indices = @transform_0, window_bounds = array<i64: 4, 64, 2>}, {transform_indices = @transform_1, window_bounds = array<i64: 4, 2, 64>}, {transform_indices = @transform_2, window_bounds = array<i64: 4, 2, 64>}, {transform_indices = @transform_3, window_bounds = array<i64: 4, 2, 64>}]} {
    %c0 = arith.constant 0 : index
    %c0_0 = arith.constant 0 : index
    %c0_1 = arith.constant 0 : index
    %0 = vector.load %arg1[%c0, %c0_0, %c0_1] : memref<4x64x2xf32, #tpu.memory_space<vmem>>, vector<4x64x2xf32>
    %c0_2 = arith.constant 0 : index
    %c0_3 = arith.constant 0 : index
    %c0_4 = arith.constant 0 : index
    %1 = vector.load %arg2[%c0_2, %c0_3, %c0_4] : memref<4x2x64xf32, #tpu.memory_space<vmem>>, vector<4x2x64xf32>
    %c0_5 = arith.constant 0 : index
    %c0_6 = arith.constant 0 : index
    %c0_7 = arith.constant 0 : index
    %2 = vector.load %arg3[%c0_5, %c0_6, %c0_7] : memref<4x2x64xf32, #tpu.memory_space<vmem>>, vector<4x2x64xf32>
    "tpu.trace_start"() <{level = 10 : i32, message = "hnd,hdm->hnm"}> : () -> ()
    %cst = arith.constant dense<0.000000e+00> : vector<4x64x64xf32>
    %3 = tpu.matmul %0, %1, %cst {dimension_numbers = #tpu.dot_dimension_numbers<[2], [1], [1], [2], [0, 0, 0, 1, 1, 2], [0], [0]>} : vector<4x64x2xf32>, vector<4x2x64xf32>, vector<4x64x64xf32> -> vector<4x64x64xf32>
    "tpu.trace_stop"() : () -> ()
    %cst_8 = arith.constant 0.707106769 : f32
    %4 = vector.broadcast %cst_8 : f32 to vector<4x64x64xf32>
    %5 = arith.mulf %4, %3 : vector<4x64x64xf32>
    %cst_9 = arith.constant dense<0xFF800000> : vector<4x64xf32>
    %6 = vector.multi_reduction <maximumf>, %5, %cst_9 [2] : vector<4x64x64xf32> to vector<4x64xf32>
    %7 = vector.shape_cast %6 : vector<4x64xf32> to vector<4x64x1xf32>
    %8 = vector.broadcast %7 : vector<4x64x1xf32> to vector<4x64x64xf32>
    %9 = arith.subf %5, %8 : vector<4x64x64xf32>
    %10 = math.exp %9 : vector<4x64x64xf32>
    %cst_10 = arith.constant dense<0.000000e+00> : vector<4x64xf32>
    %11 = vector.multi_reduction <add>, %10, %cst_10 [2] : vector<4x64x64xf32> to vector<4x64xf32>
    %12 = vector.shape_cast %11 : vector<4x64xf32> to vector<4x64x1xf32>
    %13 = tpu.reciprocal %12 {approx = true} : vector<4x64x1xf32> -> vector<4x64x1xf32>
    %14 = vector.broadcast %13 : vector<4x64x1xf32> to vector<4x64x64xf32>
    %15 = arith.mulf %10, %14 : vector<4x64x64xf32>
    "tpu.trace_start"() <{level = 10 : i32, message = "hdm,hnm->hdn"}> : () -> ()
    %cst_11 = arith.constant dense<0.000000e+00> : vector<4x2x64xf32>
    %16 = tpu.matmul %2, %15, %cst_11 {dimension_numbers = #tpu.dot_dimension_numbers<[2], [2], [1], [1], [0, 0, 0, 1, 1, 1], [0], [0]>} : vector<4x2x64xf32>, vector<4x64x64xf32>, vector<4x2x64xf32> -> vector<4x2x64xf32>
    "tpu.trace_stop"() : () -> ()
    %c0_12 = arith.constant 0 : index
    %c0_13 = arith.constant 0 : index
    %c0_14 = arith.constant 0 : index
    %17 = vector.load %arg4[%c0_12, %c0_13, %c0_14] : memref<4x2x64xf32, #tpu.memory_space<vmem>>, vector<4x2x64xf32>
    tpu.vector_store %arg4[%c0_12, %c0_13, %c0_14], %16 {strides = array<i32>} : memref<4x2x64xf32, #tpu.memory_space<vmem>>, vector<4x2x64xf32>,
    return
  }
  func.func @transform_0(%arg0: i32) -> (i32, i32, i32) {
    %c0_i32 = arith.constant 0 : i32
    %c0_i32_0 = arith.constant 0 : i32
    %c0_i32_1 = arith.constant 0 : i32
    return %arg0, %c0_i32, %c0_i32_0 : i32, i32, i32
  }
  func.func @transform_1(%arg0: i32) -> (i32, i32, i32) {
    %c0_i32 = arith.constant 0 : i32
    %c0_i32_0 = arith.constant 0 : i32
    %c0_i32_1 = arith.constant 0 : i32
    return %arg0, %c0_i32, %c0_i32_0 : i32, i32, i32
  }
  func.func @transform_2(%arg0: i32) -> (i32, i32, i32) {
    %c0_i32 = arith.constant 0 : i32
    %c0_i32_0 = arith.constant 0 : i32
    %c0_i32_1 = arith.constant 0 : i32
    return %arg0, %c0_i32, %c0_i32_0 : i32, i32, i32
  }
  func.func @transform_3(%arg0: i32) -> (i32, i32, i32) {
    %c0_i32 = arith.constant 0 : i32
    %c0_i32_0 = arith.constant 0 : i32
    %c0_i32_1 = arith.constant 0 : i32
    return %arg0, %c0_i32, %c0_i32_0 : i32, i32, i32
  }
}

module attributes {stable_mosaic.version = 11 : i64} {
  func.func @_dwt_conv_kernel(%arg0: i32, %arg1: memref<4x1x128xf32, #tpu.memory_space<vmem>>, %arg2: memref<4x8x1xf32, #tpu.memory_space<vmem>>, %arg3: memref<4x1x1xf32, #tpu.memory_space<vmem>>, %arg4: memref<4x8x128xf32, #tpu.memory_space<vmem>>) attributes {dimension_semantics = [#tpu.dimension_semantics<parallel>], iteration_bounds = array<i64: 1>, scalar_prefetch = 0 : i64, scratch_operands = 0 : i64, tpu.core_type = #tpu.core_type<tc>, window_params = [{transform_indices = @transform_0, window_bounds = array<i64: 4, 1, 128>}, {transform_indices = @transform_1, window_bounds = array<i64: 4, 8, 1>}, {transform_indices = @transform_2, window_bounds = array<i64: 4, 1, 1>}, {transform_indices = @transform_3, window_bounds = array<i64: 4, 8, 128>}]} {
    %c0 = arith.constant 0 : index
    %c0_0 = arith.constant 0 : index
    %c0_1 = arith.constant 0 : index
    %0 = vector.load %arg1[%c0, %c0_0, %c0_1] : memref<4x1x128xf32, #tpu.memory_space<vmem>>, vector<4x1x128xf32>
    %c0_2 = arith.constant 0 : index
    %c0_3 = arith.constant 0 : index
    %c0_4 = arith.constant 0 : index
    %1 = vector.load %arg2[%c0_2, %c0_3, %c0_4] : memref<4x8x1xf32, #tpu.memory_space<vmem>>, vector<4x8x1xf32>
    %2 = vector.broadcast %0 : vector<4x1x128xf32> to vector<4x8x128xf32>
    %3 = vector.broadcast %1 : vector<4x8x1xf32> to vector<4x8x128xf32>
    %4 = arith.mulf %2, %3 : vector<4x8x128xf32>
    %c0_5 = arith.constant 0 : index
    %c0_6 = arith.constant 0 : index
    %c0_7 = arith.constant 0 : index
    %5 = vector.load %arg3[%c0_5, %c0_6, %c0_7] : memref<4x1x1xf32, #tpu.memory_space<vmem>>, vector<4x1x1xf32>
    %6 = vector.broadcast %5 : vector<4x1x1xf32> to vector<4x8x128xf32>
    %7 = arith.addf %4, %6 : vector<4x8x128xf32>
    %c0_8 = arith.constant 0 : index
    %c0_9 = arith.constant 0 : index
    %c0_10 = arith.constant 0 : index
    %8 = vector.load %arg4[%c0_8, %c0_9, %c0_10] : memref<4x8x128xf32, #tpu.memory_space<vmem>>, vector<4x8x128xf32>
    tpu.vector_store %arg4[%c0_8, %c0_9, %c0_10], %7 {strides = array<i32>} : memref<4x8x128xf32, #tpu.memory_space<vmem>>, vector<4x8x128xf32>,
    return
  }
  func.func @transform_0(%arg0: i32) -> (i32, i32, i32) {
    %c0_i32 = arith.constant 0 : i32
    %c0_i32_0 = arith.constant 0 : i32
    %c0_i32_1 = arith.constant 0 : i32
    return %arg0, %c0_i32, %c0_i32_0 : i32, i32, i32
  }
  func.func @transform_1(%arg0: i32) -> (i32, i32, i32) {
    %c0_i32 = arith.constant 0 : i32
    %c0_i32_0 = arith.constant 0 : i32
    %c0_i32_1 = arith.constant 0 : i32
    return %arg0, %c0_i32, %c0_i32_0 : i32, i32, i32
  }
  func.func @transform_2(%arg0: i32) -> (i32, i32, i32) {
    %c0_i32 = arith.constant 0 : i32
    %c0_i32_0 = arith.constant 0 : i32
    %c0_i32_1 = arith.constant 0 : i32
    return %arg0, %c0_i32, %c0_i32_0 : i32, i32, i32
  }
  func.func @transform_3(%arg0: i32) -> (i32, i32, i32) {
    %c0_i32 = arith.constant 0 : i32
    %c0_i32_0 = arith.constant 0 : i32
    %c0_i32_1 = arith.constant 0 : i32
    return %arg0, %c0_i32, %c0_i32_0 : i32, i32, i32
  }
}

module attributes {stable_mosaic.version = 11 : i64} {
  func.func @_group_norm_kernel(%arg0: i32, %arg1: memref<1x4x512xf32, #tpu.memory_space<vmem>>, %arg2: memref<1x4x1xf32, #tpu.memory_space<vmem>>, %arg3: memref<1x4x1xf32, #tpu.memory_space<vmem>>, %arg4: memref<1x4x512xf32, #tpu.memory_space<vmem>>) attributes {dimension_semantics = [#tpu.dimension_semantics<parallel>], iteration_bounds = array<i64: 2>, scalar_prefetch = 0 : i64, scratch_operands = 0 : i64, tpu.core_type = #tpu.core_type<tc>, window_params = [{transform_indices = @transform_0, window_bounds = array<i64: 1, 4, 512>}, {pipeline_mode = #tpu.pipeline_mode<synchronous>, transform_indices = @transform_1, window_bounds = array<i64: 1, 4, 1>}, {pipeline_mode = #tpu.pipeline_mode<synchronous>, transform_indices = @transform_2, window_bounds = array<i64: 1, 4, 1>}, {transform_indices = @transform_3, window_bounds = array<i64: 1, 4, 512>}]} {
    %c0 = arith.constant 0 : index
    %c0_0 = arith.constant 0 : index
    %c0_1 = arith.constant 0 : index
    %0 = vector.load %arg1[%c0, %c0_0, %c0_1] : memref<1x4x512xf32, #tpu.memory_space<vmem>>, vector<1x4x512xf32>
    %1 = vector.shape_cast %0 : vector<1x4x512xf32> to vector<1x1x4x512xf32>
    %cst = arith.constant dense<0.000000e+00> : vector<1xf32>
    %2 = vector.multi_reduction <add>, %1, %cst [1, 2, 3] : vector<1x1x4x512xf32> to vector<1xf32>
    %3 = vector.shape_cast %2 : vector<1xf32> to vector<1x1x1x1xf32>
    %4 = vector.extract %3[0, 0, 0, 0] : f32 from vector<1x1x1x1xf32>
    %cst_2 = arith.constant 2.048000e+03 : f32
    %5 = arith.divf %4, %cst_2 : f32
    %6 = vector.broadcast %5 : f32 to vector<1x4x512xf32>
    %7 = arith.subf %0, %6 : vector<1x4x512xf32>
    %8 = arith.mulf %7, %7 : vector<1x4x512xf32>
    %9 = vector.shape_cast %8 : vector<1x4x512xf32> to vector<1x1x4x512xf32>
    %cst_3 = arith.constant dense<0.000000e+00> : vector<1xf32>
    %10 = vector.multi_reduction <add>, %9, %cst_3 [1, 2, 3] : vector<1x1x4x512xf32> to vector<1xf32>
    %11 = vector.shape_cast %10 : vector<1xf32> to vector<1x1x1x1xf32>
    %12 = vector.extract %11[0, 0, 0, 0] : f32 from vector<1x1x1x1xf32>
    %cst_4 = arith.constant 2.048000e+03 : f32
    %13 = arith.divf %12, %cst_4 : f32
    %14 = vector.broadcast %5 : f32 to vector<1x4x512xf32>
    %15 = arith.subf %0, %14 : vector<1x4x512xf32>
    %cst_5 = arith.constant 9.99999974E-6 : f32
    %16 = arith.addf %13, %cst_5 : f32
    %17 = math.rsqrt %16 : f32
    %18 = vector.broadcast %17 : f32 to vector<1x4x512xf32>
    %19 = arith.mulf %15, %18 : vector<1x4x512xf32>
    %c0_6 = arith.constant 0 : index
    %c0_7 = arith.constant 0 : index
    %c0_8 = arith.constant 0 : index
    %20 = vector.load %arg2[%c0_6, %c0_7, %c0_8] : memref<1x4x1xf32, #tpu.memory_space<vmem>>, vector<1x4x1xf32>
    %21 = vector.broadcast %20 : vector<1x4x1xf32> to vector<1x4x512xf32>
    %22 = arith.mulf %19, %21 : vector<1x4x512xf32>
    %c0_9 = arith.constant 0 : index
    %c0_10 = arith.constant 0 : index
    %c0_11 = arith.constant 0 : index
    %23 = vector.load %arg3[%c0_9, %c0_10, %c0_11] : memref<1x4x1xf32, #tpu.memory_space<vmem>>, vector<1x4x1xf32>
    %24 = vector.broadcast %23 : vector<1x4x1xf32> to vector<1x4x512xf32>
    %25 = arith.addf %22, %24 : vector<1x4x512xf32>
    %c0_12 = arith.constant 0 : index
    %c0_13 = arith.constant 0 : index
    %c0_14 = arith.constant 0 : index
    %26 = vector.load %arg4[%c0_12, %c0_13, %c0_14] : memref<1x4x512xf32, #tpu.memory_space<vmem>>, vector<1x4x512xf32>
    tpu.vector_store %arg4[%c0_12, %c0_13, %c0_14], %25 {strides = array<i32>} : memref<1x4x512xf32, #tpu.memory_space<vmem>>, vector<1x4x512xf32>,
    return
  }
  func.func @transform_0(%arg0: i32) -> (i32, i32, i32) {
    %c0_i32 = arith.constant 0 : i32
    %c0_i32_0 = arith.constant 0 : i32
    %c0_i32_1 = arith.constant 0 : i32
    return %arg0, %c0_i32, %c0_i32_0 : i32, i32, i32
  }
  func.func @transform_1(%arg0: i32) -> (i32, i32, i32) {
    %c0_i32 = arith.constant 0 : i32
    %c0_i32_0 = arith.constant 0 : i32
    %c0_i32_1 = arith.constant 0 : i32
    %c0_i32_2 = arith.constant 0 : i32
    return %c0_i32, %c0_i32_0, %c0_i32_1 : i32, i32, i32
  }
  func.func @transform_2(%arg0: i32) -> (i32, i32, i32) {
    %c0_i32 = arith.constant 0 : i32
    %c0_i32_0 = arith.constant 0 : i32
    %c0_i32_1 = arith.constant 0 : i32
    %c0_i32_2 = arith.constant 0 : i32
    return %c0_i32, %c0_i32_0, %c0_i32_1 : i32, i32, i32
  }
  func.func @transform_3(%arg0: i32) -> (i32, i32, i32) {
    %c0_i32 = arith.constant 0 : i32
    %c0_i32_0 = arith.constant 0 : i32
    %c0_i32_1 = arith.constant 0 : i32
    return %arg0, %c0_i32, %c0_i32_0 : i32, i32, i32
  }
}

module attributes {stable_mosaic.version = 11 : i64} {
  func.func @_matmul_bias_kernel(%arg0: i32, %arg1: i32, %arg2: memref<512x8xf32, #tpu.memory_space<vmem>>, %arg3: memref<8x8xf32, #tpu.memory_space<vmem>>, %arg4: memref<1x8xf32, #tpu.memory_space<vmem>>, %arg5: memref<512x8xf32, #tpu.memory_space<vmem>>) attributes {dimension_semantics = [#tpu.dimension_semantics<parallel>, #tpu.dimension_semantics<parallel>], iteration_bounds = array<i64: 2, 1>, scalar_prefetch = 0 : i64, scratch_operands = 0 : i64, tpu.core_type = #tpu.core_type<tc>, window_params = [{transform_indices = @transform_0, window_bounds = array<i64: 512, 8>}, {transform_indices = @transform_1, window_bounds = array<i64: 8, 8>}, {transform_indices = @transform_2, window_bounds = array<i64: 1, 8>}, {transform_indices = @transform_3, window_bounds = array<i64: 512, 8>}]} {
    %c0 = arith.constant 0 : index
    %c0_0 = arith.constant 0 : index
    %0 = vector.load %arg2[%c0, %c0_0] : memref<512x8xf32, #tpu.memory_space<vmem>>, vector<512x8xf32>
    %c0_1 = arith.constant 0 : index
    %c0_2 = arith.constant 0 : index
    %1 = vector.load %arg3[%c0_1, %c0_2] : memref<8x8xf32, #tpu.memory_space<vmem>>, vector<8x8xf32>
    %cst = arith.constant dense<0.000000e+00> : vector<512x8xf32>
    %2 = tpu.matmul %0, %1, %cst {dimension_numbers = #tpu.dot_dimension_numbers<[1], [0], [0], [1], [0, 0, 1, 1], [], []>} : vector<512x8xf32>, vector<8x8xf32>, vector<512x8xf32> -> vector<512x8xf32>
    %c0_3 = arith.constant 0 : index
    %c0_4 = arith.constant 0 : index
    %3 = vector.load %arg4[%c0_3, %c0_4] : memref<1x8xf32, #tpu.memory_space<vmem>>, vector<1x8xf32>
    %4 = vector.broadcast %3 : vector<1x8xf32> to vector<512x8xf32>
    %5 = arith.addf %2, %4 : vector<512x8xf32>
    %c0_5 = arith.constant 0 : index
    %c0_6 = arith.constant 0 : index
    %6 = vector.load %arg5[%c0_5, %c0_6] : memref<512x8xf32, #tpu.memory_space<vmem>>, vector<512x8xf32>
    tpu.vector_store %arg5[%c0_5, %c0_6], %5 {strides = array<i32>} : memref<512x8xf32, #tpu.memory_space<vmem>>, vector<512x8xf32>,
    return
  }
  func.func @transform_0(%arg0: i32, %arg1: i32) -> (i32, i32) {
    %c0_i32 = arith.constant 0 : i32
    %c0_i32_0 = arith.constant 0 : i32
    return %arg0, %c0_i32 : i32, i32
  }
  func.func @transform_1(%arg0: i32, %arg1: i32) -> (i32, i32) {
    %c0_i32 = arith.constant 0 : i32
    %c0_i32_0 = arith.constant 0 : i32
    return %c0_i32, %arg1 : i32, i32
  }
  func.func @transform_2(%arg0: i32, %arg1: i32) -> (i32, i32) {
    %c0_i32 = arith.constant 0 : i32
    %c0_i32_0 = arith.constant 0 : i32
    return %c0_i32, %arg1 : i32, i32
  }
  func.func @transform_3(%arg0: i32, %arg1: i32) -> (i32, i32) {
    %c0_i32 = arith.constant 0 : i32
    return %arg0, %arg1 : i32, i32
  }
}

module attributes {stable_mosaic.version = 11 : i64} {
  func.func @_row_norm_act_kernel(%arg0: i32, %arg1: memref<16x512xf32, #tpu.memory_space<vmem>>, %arg2: memref<16x1xf32, #tpu.memory_space<vmem>>, %arg3: memref<16x1xf32, #tpu.memory_space<vmem>>, %arg4: memref<16x512xf32, #tpu.memory_space<vmem>>) attributes {dimension_semantics = [#tpu.dimension_semantics<parallel>], iteration_bounds = array<i64: 1>, scalar_prefetch = 0 : i64, scratch_operands = 0 : i64, tpu.core_type = #tpu.core_type<tc>, window_params = [{transform_indices = @transform_0, window_bounds = array<i64: 16, 512>}, {transform_indices = @transform_1, window_bounds = array<i64: 16, 1>}, {transform_indices = @transform_2, window_bounds = array<i64: 16, 1>}, {transform_indices = @transform_3, window_bounds = array<i64: 16, 512>}]} {
    %c0 = arith.constant 0 : index
    %c0_0 = arith.constant 0 : index
    %0 = vector.load %arg1[%c0, %c0_0] : memref<16x512xf32, #tpu.memory_space<vmem>>, vector<16x512xf32>
    %cst = arith.constant dense<0.000000e+00> : vector<16xf32>
    %1 = vector.multi_reduction <add>, %0, %cst [1] : vector<16x512xf32> to vector<16xf32>
    %2 = vector.shape_cast %1 : vector<16xf32> to vector<16x1xf32>
    %cst_1 = arith.constant 5.120000e+02 : f32
    %3 = vector.broadcast %cst_1 : f32 to vector<16x1xf32>
    %4 = arith.divf %2, %3 : vector<16x1xf32>
    %5 = vector.broadcast %4 : vector<16x1xf32> to vector<16x512xf32>
    %6 = arith.subf %0, %5 : vector<16x512xf32>
    %7 = arith.mulf %6, %6 : vector<16x512xf32>
    %cst_2 = arith.constant dense<0.000000e+00> : vector<16xf32>
    %8 = vector.multi_reduction <add>, %7, %cst_2 [1] : vector<16x512xf32> to vector<16xf32>
    %9 = vector.shape_cast %8 : vector<16xf32> to vector<16x1xf32>
    %cst_3 = arith.constant 5.120000e+02 : f32
    %10 = vector.broadcast %cst_3 : f32 to vector<16x1xf32>
    %11 = arith.divf %9, %10 : vector<16x1xf32>
    %12 = vector.broadcast %4 : vector<16x1xf32> to vector<16x512xf32>
    %13 = arith.subf %0, %12 : vector<16x512xf32>
    %cst_4 = arith.constant 9.99999974E-6 : f32
    %14 = vector.broadcast %cst_4 : f32 to vector<16x1xf32>
    %15 = arith.addf %11, %14 : vector<16x1xf32>
    %16 = math.rsqrt %15 : vector<16x1xf32>
    %17 = vector.broadcast %16 : vector<16x1xf32> to vector<16x512xf32>
    %18 = arith.mulf %13, %17 : vector<16x512xf32>
    %c0_5 = arith.constant 0 : index
    %c0_6 = arith.constant 0 : index
    %19 = vector.load %arg2[%c0_5, %c0_6] : memref<16x1xf32, #tpu.memory_space<vmem>>, vector<16x1xf32>
    %20 = vector.broadcast %19 : vector<16x1xf32> to vector<16x512xf32>
    %21 = arith.mulf %18, %20 : vector<16x512xf32>
    %c0_7 = arith.constant 0 : index
    %c0_8 = arith.constant 0 : index
    %22 = vector.load %arg3[%c0_7, %c0_8] : memref<16x1xf32, #tpu.memory_space<vmem>>, vector<16x1xf32>
    %23 = vector.broadcast %22 : vector<16x1xf32> to vector<16x512xf32>
    %24 = arith.addf %21, %23 : vector<16x512xf32>
    %cst_9 = arith.constant 0.000000e+00 : f32
    %25 = vector.broadcast %cst_9 : f32 to vector<16x512xf32>
    %26 = arith.cmpf oge, %24, %25 : vector<16x512xf32>
    %cst_10 = arith.constant 0.00999999977 : f32
    %27 = vector.broadcast %cst_10 : f32 to vector<16x512xf32>
    %28 = arith.mulf %27, %24 : vector<16x512xf32>
    %29 = arith.select %26, %24, %28 : vector<16x512xi1>, vector<16x512xf32>
    %c0_11 = arith.constant 0 : index
    %c0_12 = arith.constant 0 : index
    %30 = vector.load %arg4[%c0_11, %c0_12] : memref<16x512xf32, #tpu.memory_space<vmem>>, vector<16x512xf32>
    tpu.vector_store %arg4[%c0_11, %c0_12], %29 {strides = array<i32>} : memref<16x512xf32, #tpu.memory_space<vmem>>, vector<16x512xf32>,
    return
  }
  func.func @transform_0(%arg0: i32) -> (i32, i32) {
    %c0_i32 = arith.constant 0 : i32
    %c0_i32_0 = arith.constant 0 : i32
    return %arg0, %c0_i32 : i32, i32
  }
  func.func @transform_1(%arg0: i32) -> (i32, i32) {
    %c0_i32 = arith.constant 0 : i32
    %c0_i32_0 = arith.constant 0 : i32
    return %arg0, %c0_i32 : i32, i32
  }
  func.func @transform_2(%arg0: i32) -> (i32, i32) {
    %c0_i32 = arith.constant 0 : i32
    %c0_i32_0 = arith.constant 0 : i32
    return %arg0, %c0_i32 : i32, i32
  }
  func.func @transform_3(%arg0: i32) -> (i32, i32) {
    %c0_i32 = arith.constant 0 : i32
    %c0_i32_0 = arith.constant 0 : i32
    return %arg0, %c0_i32 : i32, i32
  }
}

module attributes {stable_mosaic.version = 11 : i64} {
  func.func @_conv3x3_kernel(%arg0: i32, %arg1: i32, %arg2: i32, %arg3: memref<1x1x10x10x8xf32, #tpu.memory_space<vmem>>, %arg4: memref<1x72x4xf32, #tpu.memory_space<vmem>>, %arg5: memref<1x4xf32, #tpu.memory_space<vmem>>, %arg6: memref<1x1x8x8x4xf32, #tpu.memory_space<vmem>>) attributes {dimension_semantics = [#tpu.dimension_semantics<parallel>, #tpu.dimension_semantics<parallel>, #tpu.dimension_semantics<arbitrary>], iteration_bounds = array<i64: 2, 8, 3>, scalar_prefetch = 0 : i64, scratch_operands = 0 : i64, tpu.core_type = #tpu.core_type<tc>, window_params = [{transform_indices = @transform_0, window_bounds = array<i64: 1, 1, 10, 10, 8>}, {transform_indices = @transform_1, window_bounds = array<i64: 1, 72, 4>}, {pipeline_mode = #tpu.pipeline_mode<synchronous>, transform_indices = @transform_2, window_bounds = array<i64: 1, 4>}, {transform_indices = @transform_3, window_bounds = array<i64: 1, 1, 8, 8, 4>}]} {
    %c0 = arith.constant 0 : index
    %c0_0 = arith.constant 0 : index
    %c0_1 = arith.constant 0 : index
    %c0_2 = arith.constant 0 : index
    %c0_3 = arith.constant 0 : index
    %0 = vector.load %arg3[%c0, %c0_0, %c0_1, %c0_2, %c0_3] : memref<1x1x10x10x8xf32, #tpu.memory_space<vmem>>, vector<1x1x10x10x8xf32>
    %1 = vector.shape_cast %0 : vector<1x1x10x10x8xf32> to vector<10x10x8xf32>
    %2 = vector.extract_strided_slice %1 {offsets = [0, 0, 0], sizes = [8, 8, 8], strides = [1, 1, 1]} : vector<10x10x8xf32> to vector<8x8x8xf32>
    %3 = vector.shape_cast %2 : vector<8x8x8xf32> to vector<64x8xf32>
    %4 = vector.extract_strided_slice %1 {offsets = [0, 1, 0], sizes = [8, 8, 8], strides = [1, 1, 1]} : vector<10x10x8xf32> to vector<8x8x8xf32>
    %5 = vector.shape_cast %4 : vector<8x8x8xf32> to vector<64x8xf32>
    %6 = vector.extract_strided_slice %1 {offsets = [0, 2, 0], sizes = [8, 8, 8], strides = [1, 1, 1]} : vector<10x10x8xf32> to vector<8x8x8xf32>
    %7 = vector.shape_cast %6 : vector<8x8x8xf32> to vector<64x8xf32>
    %8 = vector.extract_strided_slice %1 {offsets = [1, 0, 0], sizes = [8, 8, 8], strides = [1, 1, 1]} : vector<10x10x8xf32> to vector<8x8x8xf32>
    %9 = vector.shape_cast %8 : vector<8x8x8xf32> to vector<64x8xf32>
    %10 = vector.extract_strided_slice %1 {offsets = [1, 1, 0], sizes = [8, 8, 8], strides = [1, 1, 1]} : vector<10x10x8xf32> to vector<8x8x8xf32>
    %11 = vector.shape_cast %10 : vector<8x8x8xf32> to vector<64x8xf32>
    %12 = vector.extract_strided_slice %1 {offsets = [1, 2, 0], sizes = [8, 8, 8], strides = [1, 1, 1]} : vector<10x10x8xf32> to vector<8x8x8xf32>
    %13 = vector.shape_cast %12 : vector<8x8x8xf32> to vector<64x8xf32>
    %14 = vector.extract_strided_slice %1 {offsets = [2, 0, 0], sizes = [8, 8, 8], strides = [1, 1, 1]} : vector<10x10x8xf32> to vector<8x8x8xf32>
    %15 = vector.shape_cast %14 : vector<8x8x8xf32> to vector<64x8xf32>
    %16 = vector.extract_strided_slice %1 {offsets = [2, 1, 0], sizes = [8, 8, 8], strides = [1, 1, 1]} : vector<10x10x8xf32> to vector<8x8x8xf32>
    %17 = vector.shape_cast %16 : vector<8x8x8xf32> to vector<64x8xf32>
    %18 = vector.extract_strided_slice %1 {offsets = [2, 2, 0], sizes = [8, 8, 8], strides = [1, 1, 1]} : vector<10x10x8xf32> to vector<8x8x8xf32>
    %19 = vector.shape_cast %18 : vector<8x8x8xf32> to vector<64x8xf32>
    %20 = tpu.concatenate %3, %5, %7, %9, %11, %13, %15, %17, %19 in 1 : vector<64x8xf32>, vector<64x8xf32>, vector<64x8xf32>, vector<64x8xf32>, vector<64x8xf32>, vector<64x8xf32>, vector<64x8xf32>, vector<64x8xf32>, vector<64x8xf32> -> vector<64x72xf32>
    %c0_4 = arith.constant 0 : index
    %c0_5 = arith.constant 0 : index
    %c0_6 = arith.constant 0 : index
    %21 = vector.load %arg4[%c0_4, %c0_5, %c0_6] : memref<1x72x4xf32, #tpu.memory_space<vmem>>, vector<1x72x4xf32>
    %22 = vector.shape_cast %21 : vector<1x72x4xf32> to vector<72x4xf32>
    %cst = arith.constant dense<0.000000e+00> : vector<64x4xf32>
    %23 = tpu.matmul %20, %22, %cst {dimension_numbers = #tpu.dot_dimension_numbers<[1], [0], [0], [1], [0, 0, 1, 1], [], []>} : vector<64x72xf32>, vector<72x4xf32>, vector<64x4xf32> -> vector<64x4xf32>
    %c0_i32 = arith.constant 0 : i32
    %24 = arith.cmpi eq, %arg2, %c0_i32 : i32
    %25 = arith.extui %24 : i1 to i32
    %c0_i32_7 = arith.constant 0 : i32
    %26 = arith.cmpi ne, %25, %c0_i32_7 : i32
    scf.if %26 {
      %c0_18 = arith.constant 0 : index
      %c0_19 = arith.constant 0 : index
      %34 = vector.load %arg5[%c0_18, %c0_19] : memref<1x4xf32, #tpu.memory_space<vmem>>, vector<1x4xf32>
      %35 = vector.shape_cast %34 : vector<1x4xf32> to vector<1x1x4xf32>
      %36 = vector.broadcast %35 : vector<1x1x4xf32> to vector<8x8x4xf32>
      %c0_20 = arith.constant 0 : index
      %c0_21 = arith.constant 0 : index
      %c0_22 = arith.constant 0 : index
      %c0_23 = arith.constant 0 : index
      %c0_24 = arith.constant 0 : index
      %37 = vector.load %arg6[%c0_20, %c0_21, %c0_22, %c0_23, %c0_24] : memref<1x1x8x8x4xf32, #tpu.memory_space<vmem>>, vector<1x1x8x8x4xf32>
      %38 = vector.shape_cast %37 : vector<1x1x8x8x4xf32> to vector<8x8x4xf32>
      %39 = vector.shape_cast %36 : vector<8x8x4xf32> to vector<1x1x8x8x4xf32>
      tpu.vector_store %arg6[%c0_20, %c0_21, %c0_22, %c0_23, %c0_24], %39 {strides = array<i32>} : memref<1x1x8x8x4xf32, #tpu.memory_space<vmem>>, vector<1x1x8x8x4xf32>,
    } else {
    }
    %c0_8 = arith.constant 0 : index
    %c0_9 = arith.constant 0 : index
    %c0_10 = arith.constant 0 : index
    %c0_11 = arith.constant 0 : index
    %c0_12 = arith.constant 0 : index
    %27 = vector.load %arg6[%c0_8, %c0_9, %c0_10, %c0_11, %c0_12] : memref<1x1x8x8x4xf32, #tpu.memory_space<vmem>>, vector<1x1x8x8x4xf32>
    %28 = vector.shape_cast %27 : vector<1x1x8x8x4xf32> to vector<8x8x4xf32>
    %29 = vector.shape_cast %23 : vector<64x4xf32> to vector<8x8x4xf32>
    %30 = arith.addf %28, %29 : vector<8x8x4xf32>
    %c0_13 = arith.constant 0 : index
    %c0_14 = arith.constant 0 : index
    %c0_15 = arith.constant 0 : index
    %c0_16 = arith.constant 0 : index
    %c0_17 = arith.constant 0 : index
    %31 = vector.load %arg6[%c0_13, %c0_14, %c0_15, %c0_16, %c0_17] : memref<1x1x8x8x4xf32, #tpu.memory_space<vmem>>, vector<1x1x8x8x4xf32>
    %32 = vector.shape_cast %31 : vector<1x1x8x8x4xf32> to vector<8x8x4xf32>
    %33 = vector.shape_cast %30 : vector<8x8x4xf32> to vector<1x1x8x8x4xf32>
    tpu.vector_store %arg6[%c0_13, %c0_14, %c0_15, %c0_16, %c0_17], %33 {strides = array<i32>} : memref<1x1x8x8x4xf32, #tpu.memory_space<vmem>>, vector<1x1x8x8x4xf32>,
    return
  }
  func.func @transform_0(%arg0: i32, %arg1: i32, %arg2: i32) -> (i32, i32, i32, i32, i32) {
    %0 = arith.addi %arg1, %arg2 : i32
    %c0_i32 = arith.constant 0 : i32
    %c0_i32_0 = arith.constant 0 : i32
    %c0_i32_1 = arith.constant 0 : i32
    %c0_i32_2 = arith.constant 0 : i32
    return %arg0, %0, %c0_i32, %c0_i32_0, %c0_i32_1 : i32, i32, i32, i32, i32
  }
  func.func @transform_1(%arg0: i32, %arg1: i32, %arg2: i32) -> (i32, i32, i32) {
    %c0_i32 = arith.constant 0 : i32
    %c0_i32_0 = arith.constant 0 : i32
    %c0_i32_1 = arith.constant 0 : i32
    return %arg2, %c0_i32, %c0_i32_0 : i32, i32, i32
  }
  func.func @transform_2(%arg0: i32, %arg1: i32, %arg2: i32) -> (i32, i32) {
    %c0_i32 = arith.constant 0 : i32
    %c0_i32_0 = arith.constant 0 : i32
    %c0_i32_1 = arith.constant 0 : i32
    return %c0_i32, %c0_i32_0 : i32, i32
  }
  func.func @transform_3(%arg0: i32, %arg1: i32, %arg2: i32) -> (i32, i32, i32, i32, i32) {
    %c0_i32 = arith.constant 0 : i32
    %c0_i32_0 = arith.constant 0 : i32
    %c0_i32_1 = arith.constant 0 : i32
    %c0_i32_2 = arith.constant 0 : i32
    return %arg0, %arg1, %c0_i32, %c0_i32_0, %c0_i32_1 : i32, i32, i32, i32, i32
  }
}

module attributes {stable_mosaic.version = 11 : i64} {
  func.func @_row_norm_act_kernel(%arg0: i32, %arg1: memref<8x512xf32, #tpu.memory_space<vmem>>, %arg2: memref<8x1xf32, #tpu.memory_space<vmem>>, %arg3: memref<8x1xf32, #tpu.memory_space<vmem>>, %arg4: memref<8x512xf32, #tpu.memory_space<vmem>>) attributes {dimension_semantics = [#tpu.dimension_semantics<parallel>], iteration_bounds = array<i64: 1>, scalar_prefetch = 0 : i64, scratch_operands = 0 : i64, tpu.core_type = #tpu.core_type<tc>, window_params = [{transform_indices = @transform_0, window_bounds = array<i64: 8, 512>}, {transform_indices = @transform_1, window_bounds = array<i64: 8, 1>}, {transform_indices = @transform_2, window_bounds = array<i64: 8, 1>}, {transform_indices = @transform_3, window_bounds = array<i64: 8, 512>}]} {
    %c0 = arith.constant 0 : index
    %c0_0 = arith.constant 0 : index
    %0 = vector.load %arg1[%c0, %c0_0] : memref<8x512xf32, #tpu.memory_space<vmem>>, vector<8x512xf32>
    %cst = arith.constant dense<0.000000e+00> : vector<8xf32>
    %1 = vector.multi_reduction <add>, %0, %cst [1] : vector<8x512xf32> to vector<8xf32>
    %2 = vector.shape_cast %1 : vector<8xf32> to vector<8x1xf32>
    %cst_1 = arith.constant 5.120000e+02 : f32
    %3 = vector.broadcast %cst_1 : f32 to vector<8x1xf32>
    %4 = arith.divf %2, %3 : vector<8x1xf32>
    %5 = vector.broadcast %4 : vector<8x1xf32> to vector<8x512xf32>
    %6 = arith.subf %0, %5 : vector<8x512xf32>
    %7 = arith.mulf %6, %6 : vector<8x512xf32>
    %cst_2 = arith.constant dense<0.000000e+00> : vector<8xf32>
    %8 = vector.multi_reduction <add>, %7, %cst_2 [1] : vector<8x512xf32> to vector<8xf32>
    %9 = vector.shape_cast %8 : vector<8xf32> to vector<8x1xf32>
    %cst_3 = arith.constant 5.120000e+02 : f32
    %10 = vector.broadcast %cst_3 : f32 to vector<8x1xf32>
    %11 = arith.divf %9, %10 : vector<8x1xf32>
    %12 = vector.broadcast %4 : vector<8x1xf32> to vector<8x512xf32>
    %13 = arith.subf %0, %12 : vector<8x512xf32>
    %cst_4 = arith.constant 9.99999974E-6 : f32
    %14 = vector.broadcast %cst_4 : f32 to vector<8x1xf32>
    %15 = arith.addf %11, %14 : vector<8x1xf32>
    %16 = math.rsqrt %15 : vector<8x1xf32>
    %17 = vector.broadcast %16 : vector<8x1xf32> to vector<8x512xf32>
    %18 = arith.mulf %13, %17 : vector<8x512xf32>
    %c0_5 = arith.constant 0 : index
    %c0_6 = arith.constant 0 : index
    %19 = vector.load %arg2[%c0_5, %c0_6] : memref<8x1xf32, #tpu.memory_space<vmem>>, vector<8x1xf32>
    %20 = vector.broadcast %19 : vector<8x1xf32> to vector<8x512xf32>
    %21 = arith.mulf %18, %20 : vector<8x512xf32>
    %c0_7 = arith.constant 0 : index
    %c0_8 = arith.constant 0 : index
    %22 = vector.load %arg3[%c0_7, %c0_8] : memref<8x1xf32, #tpu.memory_space<vmem>>, vector<8x1xf32>
    %23 = vector.broadcast %22 : vector<8x1xf32> to vector<8x512xf32>
    %24 = arith.addf %21, %23 : vector<8x512xf32>
    %cst_9 = arith.constant 0.000000e+00 : f32
    %25 = vector.broadcast %cst_9 : f32 to vector<8x512xf32>
    %26 = arith.cmpf oge, %24, %25 : vector<8x512xf32>
    %cst_10 = arith.constant 0.00999999977 : f32
    %27 = vector.broadcast %cst_10 : f32 to vector<8x512xf32>
    %28 = arith.mulf %27, %24 : vector<8x512xf32>
    %29 = arith.select %26, %24, %28 : vector<8x512xi1>, vector<8x512xf32>
    %c0_11 = arith.constant 0 : index
    %c0_12 = arith.constant 0 : index
    %30 = vector.load %arg4[%c0_11, %c0_12] : memref<8x512xf32, #tpu.memory_space<vmem>>, vector<8x512xf32>
    tpu.vector_store %arg4[%c0_11, %c0_12], %29 {strides = array<i32>} : memref<8x512xf32, #tpu.memory_space<vmem>>, vector<8x512xf32>,
    return
  }
  func.func @transform_0(%arg0: i32) -> (i32, i32) {
    %c0_i32 = arith.constant 0 : i32
    %c0_i32_0 = arith.constant 0 : i32
    return %arg0, %c0_i32 : i32, i32
  }
  func.func @transform_1(%arg0: i32) -> (i32, i32) {
    %c0_i32 = arith.constant 0 : i32
    %c0_i32_0 = arith.constant 0 : i32
    return %arg0, %c0_i32 : i32, i32
  }
  func.func @transform_2(%arg0: i32) -> (i32, i32) {
    %c0_i32 = arith.constant 0 : i32
    %c0_i32_0 = arith.constant 0 : i32
    return %arg0, %c0_i32 : i32, i32
  }
  func.func @transform_3(%arg0: i32) -> (i32, i32) {
    %c0_i32 = arith.constant 0 : i32
    %c0_i32_0 = arith.constant 0 : i32
    return %arg0, %c0_i32 : i32, i32
  }
}

</mosaic_0001>

<bundles_post_ra>
// kernel: basic_block_forward.16
= control target key start
LH: loop header
LB: loop body
LE: loop exit
PB: predicated region body
PF: predicated region fallthrough
CT: control target
= control target key end

     0   :  { %v155_v0 = vmov 0   ;;  %vm131_vm0 = vcmask 1041409   ;;  %vm133_vm1 = vcmask 1042434   ;;  %vm135_vm2 = vcmask 1043459   ;;  %s222_s1 = inlined_call_operand.vmem [shape: f32[8,8,1], index: 1, kind: input, shape index: {}]   ;;  %s223_s0 = inlined_call_operand.vmem [shape: f32[8,8,128], index: 0, kind: input, shape index: {}]   ;;  %s224_s2 = inlined_call_operand.vmem [shape: f32[8,128], index: 2, kind: output, shape index: {}]  }
   0x1   :  { %153 = vset.pattern.permute.xlu1 %v155_v0  ;;  %152 = vset.pattern.permute.xlu0 %v155_v0  ;;  %v21_v1 = vld [vmem:[%s222_s1 + $0x10] sm:$0xff]  ;;  %v19_v2 = vld [vmem:[%s222_s1] sm:$0xff]  ;;  %v22_v4 = vld [vmem:[%s222_s1 + $0x18] sm:$0xff]  ;;  %vm137_vm3 = vcmask 1044484   ;;  %vm139_vm4 = vcmask 1045509   ;;  %vm141_vm5 = vcmask 1046534  }
   0x2   :  { %39 = vperm.xlu1 %153, %v21_v1   ;;  %29 = vperm.xlu0 %152, %v19_v2   ;;  %v23_v3 = vld [vmem:[%s222_s1 + $0x20] sm:$0xff]  ;;  %v20_v5 = vld [vmem:[%s222_s1 + $0x8] sm:$0xff]  ;;  %v26_v7 = vld [vmem:[%s222_s1 + $0x38] sm:$0xff]  ;;  %vm143_vm6 = vcmask 1047559  }
   0x3   :  { %154 = vset.pattern.permute.xlu2 %v155_v0  ;;  %v24_v6 = vld [vmem:[%s222_s1 + $0x28] sm:$0xff]  ;;  %v25_v8 = vld [vmem:[%s222_s1 + $0x30] sm:$0xff]  ;;  %v15_v10 = vld [vmem:[%s223_s0 + $0x20] sm:$0xff] }
   0x4   :  { %49 = vperm.xlu2 %154, %v23_v3   ;;  %v13_v11 = vld [vmem:[%s223_s0 + $0x10] sm:$0xff]  ;;  %v11_v12 = vld [vmem:[%s223_s0] sm:$0xff]  ;;  %v16_v19 = vld [vmem:[%s223_s0 + $0x28] sm:$0xff] }
   0x5   :  { %v14_v26 = vld [vmem:[%s223_s0 + $0x18] sm:$0xff]  ;;  %v12_v27 = vld [vmem:[%s223_s0 + $0x8] sm:$0xff]  ;;  %v17_v45 = vld [vmem:[%s223_s0 + $0x30] sm:$0xff] }
   0x6   :  { %v18_v44 = vld [vmem:[%s223_s0 + $0x38] sm:$0xff] }
   0xa   :  { %44 = vperm.xlu1 %153, %v22_v4   ;;  %34 = vperm.xlu0 %152, %v20_v5  }
   0xc   :  { %54 = vperm.xlu2 %154, %v24_v6  }
  0x12   :  { %64 = vperm.xlu1 %153, %v26_v7   ;;  %59 = vperm.xlu0 %152, %v25_v8  }
  0x5e   :  { %v50_v9 = vpop.permute.xlu2 %49 }
  0x5f   :  { %v71_v13 = vmul.f32 %v50_v9, %v15_v10 }
  0x61   :  { %v99_v22 = vrot.slane %v71_v13, 4 }
  0x63   :  { %v100_v28 = vadd.f32 %v99_v22, %v71_v13 }
  0x65   :  { %v101_v38 = vrot.slane %v100_v28, 2 }
  0x66   :  { %v55_v18 = vpop.permute.xlu2 %54 }
  0x67   :  { %v72_v23 = vmul.f32 %v55_v18, %v16_v19  ;;  %v102_v48 = vadd.f32 %v101_v38, %v100_v28 }
  0x69   :  { %v105_v30 = vrot.slane %v72_v23, 4  ;;  %v103_v62 = vrot.slane %v102_v48, 1 }
  0x6b   :  { %v106_v40 = vadd.f32 %v105_v30, %v72_v23 }
  0x6d   :  { %v107_v50 = vrot.slane %v106_v40, 2 }
  0x6f   :  { %v108_v63 = vadd.f32 %v107_v50, %v106_v40 }
  0x71   :  { %v109_v9 = vrot.slane %v108_v63, 1 }
  0x73   :  { %v110_v18 = vadd.f32 %v109_v9, %v108_v63 }
  0x74   :  { %v40_v14 = vpop.permute.xlu1 %39  ;;  %v30_v15 = vpop.permute.xlu0 %29 }
  0x75   :  { %v69_v16 = vmul.f32 %v40_v14, %v13_v11  ;;  %v67_v17 = vmul.f32 %v30_v15, %v11_v12  ;;  %v104_v11 = vadd.f32 %v103_v62, %v102_v48 }
  0x77   :  { %v87_v20 = vrot.slane %v69_v16, 4  ;;  %v75_v21 = vrot.slane %v67_v17, 4 }
  0x79   :  { %v76_v24 = vadd.f32 %v75_v21, %v67_v17  ;;  %v88_v25 = vadd.f32 %v87_v20, %v69_v16 }
  0x7b   :  { %v77_v29 = vrot.slane %v76_v24, 2  ;;  %v89_v35 = vrot.slane %v88_v25, 2 }
  0x7c   :  { %v45_v31 = vpop.permute.xlu1 %44  ;;  %v35_v32 = vpop.permute.xlu0 %34 }
  0x7d   :  { %v70_v33 = vmul.f32 %v45_v31, %v14_v26  ;;  %v68_v34 = vmul.f32 %v35_v32, %v12_v27  ;;  %v78_v39 = vadd.f32 %v77_v29, %v76_v24  ;;  %v90_v43 = vadd.f32 %v89_v35, %v88_v25 }
  0x7f   :  { %v93_v36 = vrot.slane %v70_v33, 4  ;;  %v81_v37 = vrot.slane %v68_v34, 4  ;;  %v79_v49 = vrot.slane %v78_v39, 1  ;;  %v91_v57 = vrot.slane %v90_v43, 1 }
  0x81   :  { %v94_v41 = vadd.f32 %v93_v36, %v70_v33  ;;  %v82_v42 = vadd.f32 %v81_v37, %v68_v34  ;;  %v80_v0 = vadd.f32 %v79_v49, %v78_v39  ;;  %v92_v4 = vadd.f32 %v91_v57, %v90_v43 }
  0x83   :  { %v95_v46 = vrot.slane %v94_v41, 2  ;;  %v83_v47 = vrot.slane %v82_v42, 2 }
  0x84   :  { %v65_v51 = vpop.permute.xlu1 %64  ;;  %v60_v52 = vpop.permute.xlu0 %59 }
  0x85   :  { %v96_v53 = vadd.f32 %v95_v46, %v94_v41  ;;  %v84_v54 = vadd.f32 %v83_v47, %v82_v42  ;;  %v74_v55 = vmul.f32 %v65_v51, %v18_v44  ;;  %v73_v56 = vmul.f32 %v60_v52, %v17_v45 }
  0x87   :  { %v97_v58 = vrot.slane %v96_v53, 1  ;;  %v85_v59 = vrot.slane %v84_v54, 1  ;;  %v117_v60 = vrot.slane %v74_v55, 4  ;;  %v111_v61 = vrot.slane %v73_v56, 4 }
  0x89   :  { %v86_v1 = vadd.f32 %v85_v59, %v84_v54  ;;  %v118_v2 = vadd.f32 %v117_v60, %v74_v55  ;;  %v112_v3 = vadd.f32 %v111_v61, %v73_v56  ;;  %v98_v5 = vadd.f32 %v97_v58, %v96_v53 }
  0x8b   :  { %v132_v6 = vsel %vm131_vm0, %v86_v1, %v80_v0  ;;  %v119_v7 = vrot.slane %v118_v2, 2  ;;  %v113_v8 = vrot.slane %v112_v3, 2 }
  0x8c   :  { %v134_v10 = vsel %vm133_vm1, %v92_v4, %v132_v6 }
  0x8d   :  { %v136_v12 = vsel %vm135_vm2, %v98_v5, %v134_v10  ;;  %v120_v13 = vadd.f32 %v119_v7, %v118_v2  ;;  %v114_v14 = vadd.f32 %v113_v8, %v112_v3 }
  0x8e   :  { %v138_v17 = vsel %vm137_vm3, %v104_v11, %v136_v12 }
  0x8f   :  { %v121_v15 = vrot.slane %v120_v13, 1  ;;  %v115_v16 = vrot.slane %v114_v14, 1  ;;  %v140_v21 = vsel %vm139_vm4, %v110_v18, %v138_v17 }
  0x91   :  { %v122_v19 = vadd.f32 %v121_v15, %v120_v13  ;;  %v116_v20 = vadd.f32 %v115_v16, %v114_v14 }
  0x93   :  { %v142_v22 = vsel %vm141_vm5, %v116_v20, %v140_v21 }
  0x94   :  { %v144_v23 = vsel %vm143_vm6, %v122_v19, %v142_v22 }
  0x95   :  { %146 = vst [vmem:[%s224_s2] sm:$0xff] %v144_v23 }

// kernel: basic_block_forward.17
= control target key start
LH: loop header
LB: loop body
LE: loop exit
PB: predicated region body
PF: predicated region fallthrough
CT: control target
= control target key end

     0   :  { %v69_v1 = vmov 128.0   ;;  %v70_v3 = vmov 0   ;;  %s103_s0 = inlined_call_operand.vmem [shape: f32[8,128], index: 0, kind: input, shape index: {}]   ;;  %s104_s1 = inlined_call_operand.vmem [shape: f32[8,1], index: 1, kind: input, shape index: {}]   ;;  %s105_s2 = inlined_call_operand.vmem [shape: f32[8,1], index: 2, kind: input, shape index: {}]   ;;  %s106_s3 = inlined_call_operand.vmem [shape: f32[8,128], index: 3, kind: output, shape index: {}]  }
   0x1   :  { %v14_v0 = vld [vmem:[%s103_s0] sm:$0xff]  ;;  %65 = vrcp.f32 %v69_v1  ;;  %63 = vset.pattern.permute.xlu1 %v70_v3  ;;  %64 = vset.pattern.permute.xlu0 %v70_v3 }
   0x2   :  { %15 = vadd.xlane.f32.xlu0 %v14_v0  ;;  %v42_v2 = vld [vmem:[%s104_s1] sm:$0xff] }
   0x3   :  { %45 = vperm.xlu1 %63, %v42_v2   ;;  %v49_v6 = vld [vmem:[%s105_s2] sm:$0xff] }
   0x7   :  { %v66_v4 = vpop.eup %65 }
   0x8   :  { %v18_v5 = vmul.f32 128.0, %v66_v4  ;;  %vm22_vm0 = vweird.f32 %v66_v4 }
   0xa   :  { %v19_v7 = vsub.f32 1.0, %v18_v5 }
   0xb   :  { %52 = vperm.xlu1 %63, %v49_v6  }
   0xc   :  { %v20_v8 = vmul.f32 %v66_v4, %v19_v7 }
   0xe   :  { %v21_v9 = vadd.f32 %v66_v4, %v20_v8 }
  0x10   :  { %v23_v10 = vsel %vm22_vm0, %v66_v4, %v21_v9 }
  0x75   :  { %v16_v11 = vpop.xlane.xlu0 %15  ;;  %v46_v22 = vpop.permute.xlu1 %45 }
  0x76   :  { %v24_v12 = vmul.f32 %v23_v10, %v16_v11 }
  0x78   :  { %v25_v13 = vsub.f32 %v14_v0, %v24_v12 }
  0x7a   :  { %v26_v14 = vmul.f32 %v25_v13, %v25_v13 }
  0x7c   :  { %27 = vadd.xlane.f32.xlu0 %v26_v14 }
  0x7d   :  { %v53_v28 = vpop.permute.xlu1 %52 }
  0xef   :  { %v28_v15 = vpop.xlane.xlu0 %27 }
  0xf0   :  { %v29_v16 = vmul.f32 %v28_v15, %v23_v10 }
  0xf2   :  { %v30_v17 = vadd.f32 1e-05, %v29_v16 }
  0xf4   :  { %67 = vrsqrt.f32 %v30_v17  ;;  %vm37_vm2 = vweird.f32 %v30_v17 }
  0xfa   :  { %v68_v18 = vpop.eup %67 }
  0xfb   :  { %v32_v19 = vmul.f32 %v68_v18, %v30_v17  ;;  %vm38_vm1 = vweird.f32 %v68_v18 }
  0xfc   :  { %vm39_vm3 = vmor %vm37_vm2, %vm38_vm1 }
  0xfd   :  { %v33_v20 = vmul.f32 %v68_v18, %v32_v19 }
  0xff   :  { %v34_v21 = vmul.f32 0.5, %v33_v20 }
 0x101   :  { %v35_v23 = vsub.f32 1.5, %v34_v21 }
 0x103   :  { %v36_v24 = vmul.f32 %v68_v18, %v35_v23 }
 0x105   :  { %v40_v25 = vsel %vm39_vm3, %v68_v18, %v36_v24 }
 0x106   :  { %v41_v26 = vmul.f32 %v40_v25, %v25_v13 }
 0x108   :  { %v48_v27 = vmul.f32 %v46_v22, %v41_v26 }
 0x10a   :  { %v55_v29 = vadd.f32 %v53_v28, %v48_v27 }
 0x10c   :  { %56 = vst [vmem:[%s106_s3] sm:$0xff] %v55_v29 }

// kernel: basic_block_forward.18
= control target key start
LH: loop header
LB: loop body
LE: loop exit
PB: predicated region body
PF: predicated region fallthrough
CT: control target
= control target key end

     0   :  { %vm21_vm0 = vcmask 64512   ;;  %s99_s1 = inlined_call_operand.vmem [shape: f32[8,128], index: 1, kind: input, shape index: {}]   ;;  %s100_s0 = inlined_call_operand.vmem [shape: f32[12,8], index: 0, kind: input, shape index: {}]   ;;  %s101_s2 = inlined_call_operand.vmem [shape: f32[1,128], index: 2, kind: input, shape index: {}]   ;;  %s102_s3 = inlined_call_operand.vmem [shape: f32[12,128], index: 3, kind: output, shape index: {}]  }
   0x1   :  { %v16_v0 = vld [vmem:[%s99_s1] sm:$0xff]  ;;  %v15_v2 = vld [vmem:[%s100_s0 + $0x8] sm:$0xf] }
   0x2   :  { %v14_v1 = vld [vmem:[%s100_s0] sm:$0xff]  ;;  %43 = vmatpush.msra.mxu0 %v16_v0  ;;  %59 = vmatpush.msra.mxu1 %v16_v0 }
   0x3   :  { %57 = vmatmul.msk.f32.vlgmr.msra.gmra.mxu0 %vm21_vm0, %v14_v1  ;;  %58 = vmatmul.msk.f32.vlgmr.msra.gmra.mxu1 %vm21_vm0, %v15_v2  ;;  %v60_v3 = vld [vmem:[%s101_s2] ss:$0 sm:$0xff] }
  0x80   :  { %v45_v4 = vpop.f32.mrf.mxu0  ;;  %v48_v5 = vpop.f32.mrf.mxu1 }
  0x81   :  { %v46_v6 = vadd.f32 %v60_v3, %v45_v4  ;;  %v49_v7 = vadd.f32 %v60_v3, %v48_v5 }
  0x83   :  { %51 = vst [vmem:[%s102_s3] sm:$0xff] %v46_v6 }
  0x84   :  { %52 = vst [vmem:[%s102_s3 + $0x8] sm:$0xf] %v49_v7 }

// kernel: basic_block_forward.20
= control target key start
LH: loop header
LB: loop body
LE: loop exit
PB: predicated region body
PF: predicated region fallthrough
CT: control target
= control target key end

     0   :  { %v110_v0 = vmov 0   ;;  %s179_s1 = inlined_call_operand.vmem [shape: f32[4,8,1], index: 1, kind: input, shape index: {}]   ;;  %s180_s2 = inlined_call_operand.vmem [shape: f32[4,1,1], index: 2, kind: input, shape index: {}]   ;;  %s181_s0 = inlined_call_operand.vmem [shape: f32[4,1,128], index: 0, kind: input, shape index: {}]   ;;  %s182_s3 = inlined_call_operand.vmem [shape: f32[4,8,128], index: 3, kind: output, shape index: {}]  }
   0x1   :  { %100 = vset.pattern.permute.xlu1 %v110_v0  ;;  %99 = vset.pattern.permute.xlu0 %v110_v0  ;;  %v20_v1 = vld [vmem:[%s179_s1 + $0x10] sm:$0xff]  ;;  %v18_v2 = vld [vmem:[%s179_s1] sm:$0xff]  ;;  %v21_v4 = vld [vmem:[%s179_s1 + $0x18] sm:$0xff] }
   0x2   :  { %46 = vperm.xlu1 %100, %v20_v1   ;;  %36 = vperm.xlu0 %99, %v18_v2   ;;  %v104_v3 = vld [vmem:[%s180_s2] ss:$0 sm:$0xff]  ;;  %v19_v5 = vld [vmem:[%s179_s1 + $0x8] sm:$0xff]  ;;  %v105_v6 = vld [vmem:[%s180_s2 + $0x1] ss:$0 sm:$0xff] }
   0x3   :  { %101 = vset.pattern.permute.xlu2 %v110_v0  ;;  %v102_v7 = vld [vmem:[%s180_s2 + $0x3] ss:$0 sm:$0xff]  ;;  %v103_v8 = vld [vmem:[%s180_s2 + $0x2] ss:$0 sm:$0xff]  ;;  %v107_v9 = vld [vmem:[%s181_s0] ss:$0 sm:$0xff] }
   0x4   :  { %71 = vperm.xlu2 %101, %v104_v3   ;;  %v109_v15 = vld [vmem:[%s181_s0 + $0x1] ss:$0 sm:$0xff]  ;;  %v106_v20 = vld [vmem:[%s181_s0 + $0x2] ss:$0 sm:$0xff]  ;;  %v108_v21 = vld [vmem:[%s181_s0 + $0x3] ss:$0 sm:$0xff] }
   0xa   :  { %51 = vperm.xlu1 %100, %v21_v4   ;;  %41 = vperm.xlu0 %99, %v19_v5  }
   0xc   :  { %75 = vperm.xlu2 %101, %v105_v6  }
  0x12   :  { %83 = vperm.xlu1 %100, %v102_v7   ;;  %79 = vperm.xlu0 %99, %v103_v8  }
  0x5e   :  { %v72_v10 = vpop.permute.xlu2 %71 }
  0x66   :  { %v76_v19 = vpop.permute.xlu2 %75 }
  0x74   :  { %v47_v11 = vpop.permute.xlu1 %46  ;;  %v37_v12 = vpop.permute.xlu0 %36 }
  0x75   :  { %v54_v13 = vmul.f32 %v107_v9, %v37_v12  ;;  %v56_v23 = vmul.f32 %v106_v20, %v47_v11 }
  0x77   :  { %v86_v14 = vadd.f32 %v72_v10, %v54_v13 }
  0x79   :  { %90 = vst [vmem:[%s182_s3] sm:$0xff] %v86_v14 }
  0x7c   :  { %v52_v16 = vpop.permute.xlu1 %51  ;;  %v42_v17 = vpop.permute.xlu0 %41 }
  0x7d   :  { %v55_v18 = vmul.f32 %v109_v15, %v42_v17  ;;  %v57_v24 = vmul.f32 %v108_v21, %v52_v16 }
  0x7f   :  { %v87_v22 = vadd.f32 %v76_v19, %v55_v18 }
  0x81   :  { %91 = vst [vmem:[%s182_s3 + $0x8] sm:$0xff] %v87_v22 }
  0x84   :  { %v84_v25 = vpop.permute.xlu1 %83  ;;  %v80_v26 = vpop.permute.xlu0 %79 }
  0x85   :  { %v89_v27 = vadd.f32 %v84_v25, %v57_v24  ;;  %v88_v28 = vadd.f32 %v80_v26, %v56_v23 }
  0x87   :  { %93 = vst [vmem:[%s182_s3 + $0x18] sm:$0xff] %v89_v27 }
  0x88   :  { %92 = vst [vmem:[%s182_s3 + $0x10] sm:$0xff] %v88_v28 }

// kernel: basic_block_forward.19
= control target key start
LH: loop header
LB: loop body
LE: loop exit
PB: predicated region body
PF: predicated region fallthrough
CT: control target
= control target key end

     0   :  { %vm79_vm0 = vcmask 1041408   ;;  %vm54_vm1 = vcmask 15360   ;;  %vm360_vm2 = vcmask 523264   ;;  %vm901_vm3 = vcmask 517120   ;;  %s1702_s1 = inlined_call_operand.vmem [shape: f32[4,2,64], index: 1, kind: input, shape index: {}]   ;;  %s1703_s0 = inlined_call_operand.vmem [shape: f32[4,64,2], index: 0, kind: input, shape index: {}]   ;;  %s1704_s2 = inlined_call_operand.vmem [shape: f32[4,2,64], index: 2, kind: input, shape index: {}]   ;;  %s1705_s3 = inlined_call_operand.vmem [shape: f32[4,2,64], index: 3, kind: output, shape index: {}]  }
   0x1   :  { %v46_v0 = vld [vmem:[%s1702_s1] sm:$0x3]  ;;  %v47_v1 = vld [vmem:[%s1702_s1 + $0x2] sm:$0x3]  ;;  %v48_v2 = vld [vmem:[%s1702_s1 + $0x4] sm:$0x3] }
   0x2   :  { %910 = vmatpush.msk.msra.mxu0 %vm79_vm0, %v46_v0  ;;  %919 = vmatpush.msk.msra.mxu1 %vm79_vm0, %v47_v1  ;;  %v14_v3 = vld [vmem:[%s1703_s0] sm:$0xff]  ;;  %v15_v8 = vld [vmem:[%s1703_s0 + $0x8] sm:$0xff]  ;;  %v16_v12 = vld [vmem:[%s1703_s0 + $0x10] sm:$0xff] }
   0x3   :  { %v22_v4 = vld [vmem:[%s1703_s0 + $0x40] sm:$0xff]  ;;  %928 = vmatpush.msk.msra.mxu2 %vm79_vm0, %v48_v2  ;;  %911 = vmatmul.msk.f32.vlgmr.msra.gmra.mxu0 %vm54_vm1, %v14_v3  ;;  %v31_v9 = vld [vmem:[%s1703_s0 + $0x88] sm:$0xff]  ;;  %v32_v13 = vld [vmem:[%s1703_s0 + $0x90] sm:$0xff] }
   0x4   :  { %v30_v5 = vld [vmem:[%s1703_s0 + $0x80] sm:$0xff]  ;;  %920 = vmatmul.msk.f32.vlgmr.msra.gmra.mxu1 %vm54_vm1, %v22_v4  ;;  %v23_v10 = vld [vmem:[%s1703_s0 + $0x48] sm:$0xff]  ;;  %v24_v14 = vld [vmem:[%s1703_s0 + $0x50] sm:$0xff] }
   0x5   :  { %v49_v6 = vld [vmem:[%s1702_s1 + $0x6] sm:$0x3]  ;;  %929 = vmatmul.msk.f32.vlgmr.msra.gmra.mxu2 %vm54_vm1, %v30_v5  ;;  %v39_v11 = vld [vmem:[%s1703_s0 + $0xc8] sm:$0xff]  ;;  %v40_v15 = vld [vmem:[%s1703_s0 + $0xd0] sm:$0xff] }
   0x6   :  { %v38_v7 = vld [vmem:[%s1703_s0 + $0xc0] sm:$0xff]  ;;  %937 = vmatpush.msk.msra.mxu3 %vm79_vm0, %v49_v6  ;;  %v17_v16 = vld [vmem:[%s1703_s0 + $0x18] sm:$0xff]  ;;  %v19_v24 = vld [vmem:[%s1703_s0 + $0x28] sm:$0xff] }
   0x7   :  { %938 = vmatmul.msk.f32.vlgmr.msra.gmra.mxu3 %vm54_vm1, %v38_v7  ;;  %v25_v17 = vld [vmem:[%s1703_s0 + $0x58] sm:$0xff]  ;;  %v18_v20 = vld [vmem:[%s1703_s0 + $0x20] sm:$0xff]  ;;  %v35_v25 = vld [vmem:[%s1703_s0 + $0xa8] sm:$0xff] }
   0x8   :  { %v33_v18 = vld [vmem:[%s1703_s0 + $0x98] sm:$0xff]  ;;  %v34_v21 = vld [vmem:[%s1703_s0 + $0xa0] sm:$0xff]  ;;  %v27_v26 = vld [vmem:[%s1703_s0 + $0x68] sm:$0xff] }
   0x9   :  { %v41_v19 = vld [vmem:[%s1703_s0 + $0xd8] sm:$0xff]  ;;  %v26_v22 = vld [vmem:[%s1703_s0 + $0x60] sm:$0xff]  ;;  %v43_v27 = vld [vmem:[%s1703_s0 + $0xe8] sm:$0xff] }
   0xa   :  { %v42_v23 = vld [vmem:[%s1703_s0 + $0xe0] sm:$0xff]  ;;  %v20_v28 = vld [vmem:[%s1703_s0 + $0x30] sm:$0xff]  ;;  %v21_v32 = vld [vmem:[%s1703_s0 + $0x38] sm:$0xff] }
   0xb   :  { %912 = vmatmul.msk.f32.gmra.mxu0 %vm54_vm1, %v15_v8  ;;  %v36_v29 = vld [vmem:[%s1703_s0 + $0xb0] sm:$0xff]  ;;  %v37_v33 = vld [vmem:[%s1703_s0 + $0xb8] sm:$0xff] }
   0xc   :  { %921 = vmatmul.msk.f32.gmra.mxu1 %vm54_vm1, %v23_v10  ;;  %v28_v30 = vld [vmem:[%s1703_s0 + $0x70] sm:$0xff]  ;;  %v29_v34 = vld [vmem:[%s1703_s0 + $0x78] sm:$0xff] }
   0xd   :  { %930 = vmatmul.msk.f32.gmra.mxu2 %vm54_vm1, %v31_v9  ;;  %v44_v31 = vld [vmem:[%s1703_s0 + $0xf0] sm:$0xff]  ;;  %v45_v35 = vld [vmem:[%s1703_s0 + $0xf8] sm:$0xff] }
   0xf   :  { %939 = vmatmul.msk.f32.gmra.mxu3 %vm54_vm1, %v39_v11 }
  0x13   :  { %913 = vmatmul.msk.f32.gmra.mxu0 %vm54_vm1, %v16_v12 }
  0x14   :  { %922 = vmatmul.msk.f32.gmra.mxu1 %vm54_vm1, %v24_v14 }
  0x15   :  { %931 = vmatmul.msk.f32.gmra.mxu2 %vm54_vm1, %v32_v13 }
  0x17   :  { %940 = vmatmul.msk.f32.gmra.mxu3 %vm54_vm1, %v40_v15 }
  0x1b   :  { %914 = vmatmul.msk.f32.gmra.mxu0 %vm54_vm1, %v17_v16 }
  0x1c   :  { %923 = vmatmul.msk.f32.gmra.mxu1 %vm54_vm1, %v25_v17 }
  0x1d   :  { %932 = vmatmul.msk.f32.gmra.mxu2 %vm54_vm1, %v33_v18 }
  0x1f   :  { %941 = vmatmul.msk.f32.gmra.mxu3 %vm54_vm1, %v41_v19 }
  0x23   :  { %915 = vmatmul.msk.f32.gmra.mxu0 %vm54_vm1, %v18_v20 }
  0x24   :  { %924 = vmatmul.msk.f32.gmra.mxu1 %vm54_vm1, %v26_v22 }
  0x25   :  { %933 = vmatmul.msk.f32.gmra.mxu2 %vm54_vm1, %v34_v21 }
  0x27   :  { %942 = vmatmul.msk.f32.gmra.mxu3 %vm54_vm1, %v42_v23 }
  0x2b   :  { %916 = vmatmul.msk.f32.gmra.mxu0 %vm54_vm1, %v19_v24 }
  0x2c   :  { %925 = vmatmul.msk.f32.gmra.mxu1 %vm54_vm1, %v27_v26 }
  0x2d   :  { %934 = vmatmul.msk.f32.gmra.mxu2 %vm54_vm1, %v35_v25 }
  0x2f   :  { %943 = vmatmul.msk.f32.gmra.mxu3 %vm54_vm1, %v43_v27 }
  0x33   :  { %917 = vmatmul.msk.f32.gmra.mxu0 %vm54_vm1, %v20_v28 }
  0x34   :  { %926 = vmatmul.msk.f32.gmra.mxu1 %vm54_vm1, %v28_v30 }
  0x35   :  { %935 = vmatmul.msk.f32.gmra.mxu2 %vm54_vm1, %v36_v29 }
  0x37   :  { %944 = vmatmul.msk.f32.gmra.mxu3 %vm54_vm1, %v44_v31 }
  0x3b   :  { %918 = vmatmul.msk.f32.gmra.mxu0 %vm54_vm1, %v21_v32 }
  0x3c   :  { %927 = vmatmul.msk.f32.gmra.mxu1 %vm54_vm1, %v29_v34 }
  0x3d   :  { %936 = vmatmul.msk.f32.gmra.mxu2 %vm54_vm1, %v37_v33 }
  0x3f   :  { %945 = vmatmul.msk.f32.gmra.mxu3 %vm54_vm1, %v45_v35 }
  0x80   :  { %v100_v36 = vpop.f32.mrf.mxu0 }
  0x81   :  { %v1274_v37 = vmul.f32 0.70710677, %v100_v36  ;;  %v168_v38 = vpop.f32.mrf.mxu1 }
  0x82   :  { %v1276_v39 = vmul.f32 0.70710677, %v168_v38 }
  0x83   :  { %v361_v40 = vsel %vm360_vm2, %v1274_v37, -inf }
  0x84   :  { %v385_v41 = vsel %vm360_vm2, %v1276_v39, -inf  ;;  %362 = vmax.xlane.f32.xlu0 %v361_v40 }
  0x85   :  { %386 = vmax.xlane.f32.xlu1 %v385_v41 }
  0x88   :  { %v236_v42 = vpop.f32.mrf.mxu2  ;;  %v103_v44 = vpop.f32.mrf.mxu0 }
  0x89   :  { %v1282_v43 = vmul.f32 0.70710677, %v236_v42  ;;  %v1284_v45 = vmul.f32 0.70710677, %v103_v44  ;;  %v171_v47 = vpop.f32.mrf.mxu1 }
  0x8a   :  { %v304_v46 = vpop.f32.mrf.mxu3  ;;  %v1294_v52 = vmul.f32 0.70710677, %v171_v47 }
  0x8b   :  { %v1286_v48 = vmul.f32 0.70710677, %v304_v46  ;;  %v409_v49 = vsel %vm360_vm2, %v1282_v43, -inf  ;;  %v364_v50 = vsel %vm360_vm2, %v1284_v45, -inf }
  0x8c   :  { %410 = vmax.xlane.f32.xlu2 %v409_v49  ;;  %v388_v56 = vsel %vm360_vm2, %v1294_v52, -inf }
  0x8d   :  { %v433_v51 = vsel %vm360_vm2, %v1286_v48, -inf  ;;  %365 = vmax.xlane.f32.xlu1 %v364_v50 }
  0x8e   :  { %434 = vmax.xlane.f32.xlu0 %v433_v51 }
  0x90   :  { %v239_v53 = vpop.f32.mrf.mxu2  ;;  %v106_v54 = vpop.f32.mrf.mxu0 }
  0x91   :  { %v1296_v55 = vmul.f32 0.70710677, %v239_v53  ;;  %v1300_v57 = vmul.f32 0.70710677, %v106_v54  ;;  %v174_v59 = vpop.f32.mrf.mxu1 }
  0x92   :  { %v307_v58 = vpop.f32.mrf.mxu3  ;;  %v1308_v63 = vmul.f32 0.70710677, %v174_v59 }
  0x93   :  { %v412_v60 = vsel %vm360_vm2, %v1296_v55, -inf  ;;  %v367_v61 = vsel %vm360_vm2, %v1300_v57, -inf  ;;  %v1306_v62 = vmul.f32 0.70710677, %v307_v58 }
  0x94   :  { %389 = vmax.xlane.f32.xlu2 %v388_v56  ;;  %v391_v5 = vsel %vm360_vm2, %v1308_v63, -inf }
  0x95   :  { %413 = vmax.xlane.f32.xlu1 %v412_v60  ;;  %v436_v2 = vsel %vm360_vm2, %v1306_v62, -inf }
  0x96   :  { %368 = vmax.xlane.f32.xlu0 %v367_v61 }
  0x98   :  { %v242_v0 = vpop.f32.mrf.mxu2  ;;  %v109_v3 = vpop.f32.mrf.mxu0 }
  0x99   :  { %v1310_v1 = vmul.f32 0.70710677, %v242_v0  ;;  %v177_v7 = vpop.f32.mrf.mxu1  ;;  %v1318_v8 = vmul.f32 0.70710677, %v109_v3 }
  0x9a   :  { %v310_v4 = vpop.f32.mrf.mxu3  ;;  %v1320_v9 = vmul.f32 0.70710677, %v177_v7 }
  0x9b   :  { %v415_v6 = vsel %vm360_vm2, %v1310_v1, -inf  ;;  %v1322_v10 = vmul.f32 0.70710677, %v310_v4  ;;  %v370_v12 = vsel %vm360_vm2, %v1318_v8, -inf }
  0x9c   :  { %437 = vmax.xlane.f32.xlu2 %v436_v2  ;;  %v394_v15 = vsel %vm360_vm2, %v1320_v9, -inf }
  0x9d   :  { %392 = vmax.xlane.f32.xlu1 %v391_v5  ;;  %v439_v14 = vsel %vm360_vm2, %v1322_v10, -inf }
  0x9e   :  { %416 = vmax.xlane.f32.xlu0 %v415_v6 }
  0xa0   :  { %v245_v11 = vpop.f32.mrf.mxu2  ;;  %v112_v13 = vpop.f32.mrf.mxu0 }
  0xa1   :  { %v1330_v17 = vmul.f32 0.70710677, %v245_v11  ;;  %v1332_v18 = vmul.f32 0.70710677, %v112_v13  ;;  %v180_v22 = vpop.f32.mrf.mxu1 }
  0xa2   :  { %v313_v16 = vpop.f32.mrf.mxu3  ;;  %v1342_v26 = vmul.f32 0.70710677, %v180_v22 }
  0xa3   :  { %v1334_v19 = vmul.f32 0.70710677, %v313_v16  ;;  %v418_v21 = vsel %vm360_vm2, %v1330_v17, -inf  ;;  %v373_v24 = vsel %vm360_vm2, %v1332_v18, -inf }
  0xa4   :  { %371 = vmax.xlane.f32.xlu2 %v370_v12  ;;  %v397_v31 = vsel %vm360_vm2, %v1342_v26, -inf }
  0xa5   :  { %440 = vmax.xlane.f32.xlu1 %v439_v14  ;;  %v442_v23 = vsel %vm360_vm2, %v1334_v19, -inf }
  0xa6   :  { %395 = vmax.xlane.f32.xlu0 %v394_v15 }
  0xa8   :  { %v248_v20 = vpop.f32.mrf.mxu2  ;;  %v115_v25 = vpop.f32.mrf.mxu0 }
  0xa9   :  { %v1344_v27 = vmul.f32 0.70710677, %v115_v25  ;;  %v1346_v28 = vmul.f32 0.70710677, %v248_v20  ;;  %v183_v32 = vpop.f32.mrf.mxu1 }
  0xaa   :  { %v316_v29 = vpop.f32.mrf.mxu3  ;;  %v1356_v36 = vmul.f32 0.70710677, %v183_v32 }
  0xab   :  { %v421_v33 = vsel %vm360_vm2, %v1346_v28, -inf  ;;  %v376_v34 = vsel %vm360_vm2, %v1344_v27, -inf  ;;  %v1354_v35 = vmul.f32 0.70710677, %v316_v29 }
  0xac   :  { %419 = vmax.xlane.f32.xlu2 %v418_v21  ;;  %v400_v46 = vsel %vm360_vm2, %v1356_v36, -inf }
  0xad   :  { %374 = vmax.xlane.f32.xlu1 %v373_v24  ;;  %v445_v42 = vsel %vm360_vm2, %v1354_v35, -inf }
  0xae   :  { %443 = vmax.xlane.f32.xlu0 %v442_v23 }
  0xb0   :  { %v251_v30 = vpop.f32.mrf.mxu2  ;;  %v118_v40 = vpop.f32.mrf.mxu0 }
  0xb1   :  { %v1358_v38 = vmul.f32 0.70710677, %v251_v30  ;;  %v186_v49 = vpop.f32.mrf.mxu1  ;;  %v1366_v50 = vmul.f32 0.70710677, %v118_v40 }
  0xb2   :  { %v319_v41 = vpop.f32.mrf.mxu3  ;;  %v1368_v51 = vmul.f32 0.70710677, %v186_v49 }
  0xb3   :  { %v424_v47 = vsel %vm360_vm2, %v1358_v38, -inf  ;;  %v1370_v53 = vmul.f32 0.70710677, %v319_v41  ;;  %v379_v54 = vsel %vm360_vm2, %v1366_v50, -inf }
  0xb4   :  { %398 = vmax.xlane.f32.xlu2 %v397_v31  ;;  %v403_v60 = vsel %vm360_vm2, %v1368_v51, -inf }
  0xb5   :  { %422 = vmax.xlane.f32.xlu1 %v421_v33  ;;  %v448_v59 = vsel %vm360_vm2, %v1370_v53, -inf }
  0xb6   :  { %377 = vmax.xlane.f32.xlu0 %v376_v34 }
  0xb8   :  { %v254_v44 = vpop.f32.mrf.mxu2  ;;  %v121_v56 = vpop.f32.mrf.mxu0 }
  0xb9   :  { %v1378_v0 = vmul.f32 0.70710677, %v121_v56  ;;  %v1380_v2 = vmul.f32 0.70710677, %v254_v44  ;;  %v189_v5 = vpop.f32.mrf.mxu1 }
  0xba   :  { %v322_v58 = vpop.f32.mrf.mxu3  ;;  %v1390_v12 = vmul.f32 0.70710677, %v189_v5 }
  0xbb   :  { %v382_v4 = vsel %vm360_vm2, %v1378_v0, -inf  ;;  %v427_v6 = vsel %vm360_vm2, %v1380_v2, -inf  ;;  %v1392_v13 = vmul.f32 0.70710677, %v322_v58 }
  0xbc   :  { %446 = vmax.xlane.f32.xlu2 %v445_v42  ;;  %v406_v15 = vsel %vm360_vm2, %v1390_v12, -inf }
  0xbd   :  { %401 = vmax.xlane.f32.xlu1 %v400_v46  ;;  %v451_v16 = vsel %vm360_vm2, %v1392_v13, -inf }
  0xbe   :  { %425 = vmax.xlane.f32.xlu0 %v424_v47 }
  0xc0   :  { %v257_v61 = vpop.f32.mrf.mxu2 }
  0xc1   :  { %v1382_v3 = vmul.f32 0.70710677, %v257_v61 }
  0xc2   :  { %v325_v11 = vpop.f32.mrf.mxu3 }
  0xc3   :  { %v430_v7 = vsel %vm360_vm2, %v1382_v3, -inf  ;;  %v1394_v14 = vmul.f32 0.70710677, %v325_v11 }
  0xc4   :  { %380 = vmax.xlane.f32.xlu2 %v379_v54 }
  0xc5   :  { %449 = vmax.xlane.f32.xlu1 %v448_v59  ;;  %v454_v20 = vsel %vm360_vm2, %v1394_v14, -inf }
  0xc6   :  { %404 = vmax.xlane.f32.xlu0 %v403_v60 }
  0xcc   :  { %383 = vmax.xlane.f32.xlu2 %v382_v4 }
  0xcd   :  { %428 = vmax.xlane.f32.xlu1 %v427_v6 }
  0xce   :  { %431 = vmax.xlane.f32.xlu0 %v430_v7 }
  0xd4   :  { %407 = vmax.xlane.f32.xlu2 %v406_v15 }
  0xd5   :  { %452 = vmax.xlane.f32.xlu1 %v451_v16 }
  0xd6   :  { %455 = vmax.xlane.f32.xlu0 %v454_v20 }
  0xf7   :  { %v1402_v21 = vpop.xlane.xlu0 %362 }
  0xf8   :  { %v1404_v22 = vpop.xlane.xlu1 %386 }
  0xff   :  { %v1406_v23 = vpop.xlane.xlu2 %410 }
 0x100   :  { %v1410_v25 = vpop.xlane.xlu1 %365 }
 0x101   :  { %v1408_v24 = vpop.xlane.xlu0 %434 }
 0x107   :  { %v1412_v29 = vpop.xlane.xlu2 %389 }
 0x108   :  { %v1414_v30 = vpop.xlane.xlu1 %413 }
 0x109   :  { %v1416_v31 = vpop.xlane.xlu0 %368 }
 0x10f   :  { %v1418_v32 = vpop.xlane.xlu2 %437 }
 0x110   :  { %v1420_v33 = vpop.xlane.xlu1 %392 }
 0x111   :  { %v1422_v34 = vpop.xlane.xlu0 %416 }
 0x117   :  { %v1424_v40 = vpop.xlane.xlu2 %371 }
 0x118   :  { %v1426_v41 = vpop.xlane.xlu1 %440 }
 0x119   :  { %v1428_v42 = vpop.xlane.xlu0 %395 }
 0x11f   :  { %v420_v44 = vpop.xlane.xlu2 %419 }
 0x120   :  { %v476_v46 = vsub.f32 %v1330_v17, %v420_v44  ;;  %v375_v49 = vpop.xlane.xlu1 %374 }
 0x121   :  { %v444_v47 = vpop.xlane.xlu0 %443  ;;  %v461_v58 = vsub.f32 %v1332_v18, %v375_v49 }
 0x122   :  { %v527_v54 = vmul.f32 1.442695, %v476_v46  ;;  %v484_v56 = vsub.f32 %v1334_v19, %v444_v47 }
 0x123   :  { %v497_v60 = vmul.f32 1.442695, %v461_v58 }
 0x124   :  { %982 = vpow2.f32 %v527_v54  ;;  %v543_v59 = vmul.f32 1.442695, %v484_v56 }
 0x126   :  { %984 = vpow2.f32 %v543_v59 }
 0x127   :  { %986 = vpow2.f32 %v497_v60  ;;  %v399_v61 = vpop.xlane.xlu2 %398 }
 0x128   :  { %v469_v4 = vsub.f32 %v1342_v26, %v399_v61  ;;  %v423_v5 = vpop.xlane.xlu1 %422 }
 0x129   :  { %v378_v6 = vpop.xlane.xlu0 %377  ;;  %v477_v11 = vsub.f32 %v1346_v28, %v423_v5 }
 0x12a   :  { %v1434_v7 = vpop.eup %982  ;;  %v513_v17 = vmul.f32 1.442695, %v469_v4  ;;  %v462_v15 = vsub.f32 %v1344_v27, %v378_v6 }
 0x12b   :  { %v610_v18 = vsel %vm360_vm2, %v1434_v7, 0.0  ;;  %v529_v16 = vmul.f32 1.442695, %v477_v11 }
 0x12c   :  { %v1440_v19 = vpop.eup %984  ;;  %988 = vpow2.f32 %v513_v17  ;;  %v499_v20 = vmul.f32 1.442695, %v462_v15  ;;  %611 = vadd.xlane.f32.xlu1 %v610_v18 }
 0x12d   :  { %v1442_v44 = vpop.eup %986  ;;  %v634_v26 = vsel %vm360_vm2, %v1440_v19, 0.0  ;;  %990 = vpow2.f32 %v529_v16 }
 0x12e   :  { %v565_v28 = vsel %vm360_vm2, %v1442_v44, 0.0  ;;  %635 = vadd.xlane.f32.xlu2 %v634_v26  ;;  %992 = vpow2.f32 %v499_v20 }
 0x12f   :  { %566 = vadd.xlane.f32.xlu0 %v565_v28  ;;  %v447_v27 = vpop.xlane.xlu2 %446 }
 0x130   :  { %v485_v46 = vsub.f32 %v1354_v35, %v447_v27  ;;  %v402_v47 = vpop.xlane.xlu1 %401 }
 0x131   :  { %v426_v49 = vpop.xlane.xlu0 %425  ;;  %v470_v58 = vsub.f32 %v1356_v36, %v402_v47 }
 0x132   :  { %v1449_v54 = vpop.eup %988  ;;  %v545_v56 = vmul.f32 1.442695, %v485_v46  ;;  %v478_v59 = vsub.f32 %v1358_v38, %v426_v49 }
 0x133   :  { %v589_v60 = vsel %vm360_vm2, %v1449_v54, 0.0  ;;  %v1455_v61 = vpop.eup %990  ;;  %v515_v4 = vmul.f32 1.442695, %v470_v58 }
 0x134   :  { %994 = vpow2.f32 %v545_v56  ;;  %v531_v5 = vmul.f32 1.442695, %v478_v59  ;;  %590 = vadd.xlane.f32.xlu1 %v589_v60  ;;  %v1457_v6 = vpop.eup %992  ;;  %v613_v35 = vsel %vm360_vm2, %v1455_v61, 0.0 }
 0x135   :  { %996 = vpow2.f32 %v515_v4  ;;  %v568_v36 = vsel %vm360_vm2, %v1457_v6, 0.0 }
 0x136   :  { %998 = vpow2.f32 %v531_v5  ;;  %569 = vadd.xlane.f32.xlu2 %v568_v36 }
 0x137   :  { %614 = vadd.xlane.f32.xlu0 %v613_v35  ;;  %v381_v38 = vpop.xlane.xlu2 %380 }
 0x138   :  { %v463_v17 = vsub.f32 %v1366_v50, %v381_v38  ;;  %v450_v11 = vpop.xlane.xlu1 %449 }
 0x139   :  { %v405_v15 = vpop.xlane.xlu0 %404  ;;  %v486_v20 = vsub.f32 %v1370_v53, %v450_v11 }
 0x13a   :  { %v1464_v18 = vpop.eup %994  ;;  %v501_v16 = vmul.f32 1.442695, %v463_v17  ;;  %v471_v26 = vsub.f32 %v1368_v51, %v405_v15 }
 0x13b   :  { %v637_v28 = vsel %vm360_vm2, %v1464_v18, 0.0  ;;  %v1470_v27 = vpop.eup %996  ;;  %v547_v46 = vmul.f32 1.442695, %v486_v20 }
 0x13c   :  { %1000 = vpow2.f32 %v501_v16  ;;  %v517_v47 = vmul.f32 1.442695, %v471_v26  ;;  %638 = vadd.xlane.f32.xlu1 %v637_v28  ;;  %v1472_v49 = vpop.eup %998  ;;  %v592_v50 = vsel %vm360_vm2, %v1470_v27, 0.0 }
 0x13d   :  { %1002 = vpow2.f32 %v547_v46  ;;  %v616_v53 = vsel %vm360_vm2, %v1472_v49, 0.0 }
 0x13e   :  { %1004 = vpow2.f32 %v517_v47  ;;  %617 = vadd.xlane.f32.xlu2 %v616_v53 }
 0x13f   :  { %593 = vadd.xlane.f32.xlu0 %v592_v50  ;;  %v384_v51 = vpop.xlane.xlu2 %383  ;;  %v460_v50 = vsub.f32 %v1318_v8, %v1424_v40 }
 0x140   :  { %v464_v56 = vsub.f32 %v1378_v0, %v384_v51  ;;  %v429_v58 = vpop.xlane.xlu1 %428 }
 0x141   :  { %v432_v59 = vpop.xlane.xlu0 %431  ;;  %v479_v5 = vsub.f32 %v1380_v2, %v429_v58 }
 0x142   :  { %v1479_v60 = vpop.eup %1000  ;;  %v503_v4 = vmul.f32 1.442695, %v464_v56  ;;  %v480_v51 = vsub.f32 %v1382_v3, %v432_v59  ;;  %v482_v59 = vsub.f32 %v1306_v62, %v1418_v32 }
 0x143   :  { %v571_v35 = vsel %vm360_vm2, %v1479_v60, 0.0  ;;  %v1484_v36 = vpop.eup %1002  ;;  %v533_v38 = vmul.f32 1.442695, %v479_v5 }
 0x144   :  { %572 = vadd.xlane.f32.xlu1 %v571_v35  ;;  %v1486_v17 = vpop.eup %1004  ;;  %1006 = vpow2.f32 %v503_v4  ;;  %v640_v0 = vsel %vm360_vm2, %v1484_v36, 0.0  ;;  %v495_v4 = vmul.f32 1.442695, %v460_v50  ;;  %v535_v8 = vmul.f32 1.442695, %v480_v51 }
 0x145   :  { %1008 = vpow2.f32 %v533_v38  ;;  %v595_v11 = vsel %vm360_vm2, %v1486_v17, 0.0  ;;  %v474_v35 = vsub.f32 %v1296_v55, %v1414_v30  ;;  %v539_v32 = vmul.f32 1.442695, %v482_v59 }
 0x146   :  { %596 = vadd.xlane.f32.xlu2 %v595_v11  ;;  %v473_v30 = vsub.f32 %v1282_v43, %v1406_v23  ;;  %v459_v50 = vsub.f32 %v1300_v57, %v1416_v31  ;;  %v458_v51 = vsub.f32 %v1284_v45, %v1410_v25  ;;  %v481_v25 = vsub.f32 %v1286_v48, %v1408_v24 }
 0x147   :  { %641 = vadd.xlane.f32.xlu0 %v640_v0  ;;  %v408_v2 = vpop.xlane.xlu2 %407  ;;  %v523_v11 = vmul.f32 1.442695, %v474_v35 }
 0x148   :  { %v472_v15 = vsub.f32 %v1390_v12, %v408_v2  ;;  %v453_v16 = vpop.xlane.xlu1 %452  ;;  %v483_v12 = vsub.f32 %v1322_v10, %v1426_v41  ;;  %v475_v41 = vsub.f32 %v1310_v1, %v1422_v34  ;;  %v521_v43 = vmul.f32 1.442695, %v473_v30 }
 0x149   :  { %v456_v20 = vpop.xlane.xlu0 %455  ;;  %v487_v28 = vsub.f32 %v1392_v13, %v453_v16  ;;  %v467_v16 = vsub.f32 %v1308_v63, %v1420_v33  ;;  %v466_v33 = vsub.f32 %v1294_v52, %v1412_v29  ;;  %v493_v29 = vmul.f32 1.442695, %v459_v50 }
 0x14a   :  { %v519_v26 = vmul.f32 1.442695, %v472_v15  ;;  %v488_v46 = vsub.f32 %v1394_v14, %v456_v20  ;;  %v1495_v47 = vpop.eup %1006  ;;  %v541_v40 = vmul.f32 1.442695, %v483_v12  ;;  %v525_v1 = vmul.f32 1.442695, %v475_v41 }
 0x14b   :  { %v1499_v53 = vpop.eup %1008  ;;  %v549_v56 = vmul.f32 1.442695, %v487_v28  ;;  %v574_v14 = vsel %vm360_vm2, %v1495_v47, 0.0  ;;  %v468_v15 = vsub.f32 %v1320_v9, %v1428_v42  ;;  %v509_v9 = vmul.f32 1.442695, %v467_v16 }
 0x14c   :  { %1010 = vpow2.f32 %v519_v26  ;;  %v551_v58 = vmul.f32 1.442695, %v488_v46  ;;  %v619_v13 = vsel %vm360_vm2, %v1499_v53, 0.0  ;;  %v507_v52 = vmul.f32 1.442695, %v466_v33 }
 0x14d   :  { %1012 = vpow2.f32 %v549_v56  ;;  %620 = vadd.xlane.f32.xlu1 %v619_v13  ;;  %v511_v23 = vmul.f32 1.442695, %v468_v15  ;;  %v491_v31 = vmul.f32 1.442695, %v458_v51  ;;  %v537_v59 = vmul.f32 1.442695, %v481_v25 }
 0x14e   :  { %1014 = vpow2.f32 %v551_v58 }
 0x14f   :  { %575 = vadd.xlane.f32.xlu0 %v574_v14  ;;  %1016 = vpow2.f32 %v495_v4  ;;  %v465_v14 = vsub.f32 %v1276_v39, %v1404_v22  ;;  %v457_v22 = vsub.f32 %v1274_v37, %v1402_v21 }
 0x150   :  { %1018 = vpow2.f32 %v535_v8 }
 0x151   :  { %1020 = vpow2.f32 %v541_v40  ;;  %v505_v48 = vmul.f32 1.442695, %v465_v14 }
 0x152   :  { %v1508_v3 = vpop.eup %1010  ;;  %1022 = vpow2.f32 %v539_v32 }
 0x153   :  { %v1512_v10 = vpop.eup %1012  ;;  %v598_v0 = vsel %vm360_vm2, %v1508_v3, 0.0  ;;  %1024 = vpow2.f32 %v525_v1 }
 0x154   :  { %v1516_v5 = vpop.eup %1014  ;;  %v643_v38 = vsel %vm360_vm2, %v1512_v10, 0.0  ;;  %1026 = vpow2.f32 %v523_v11 }
 0x155   :  { %644 = vadd.xlane.f32.xlu2 %v643_v38  ;;  %v646_v62 = vsel %vm360_vm2, %v1516_v5, 0.0  ;;  %599 = vadd.xlane.f32.xlu1 %v598_v0  ;;  %v1526_v34 = vpop.eup %1016  ;;  %1028 = vpow2.f32 %v521_v43 }
 0x156   :  { %v1528_v2 = vpop.eup %1018  ;;  %v562_v26 = vsel %vm360_vm2, %v1526_v34, 0.0  ;;  %1030 = vpow2.f32 %v511_v23 }
 0x157   :  { %647 = vadd.xlane.f32.xlu0 %v646_v62  ;;  %v1530_v55 = vpop.eup %1020  ;;  %v622_v20 = vsel %vm360_vm2, %v1528_v2, 0.0  ;;  %1032 = vpow2.f32 %v509_v9  ;;  %v489_v62 = vmul.f32 1.442695, %v457_v22 }
 0x158   :  { %v631_v28 = vsel %vm360_vm2, %v1530_v55, 0.0  ;;  %v1544_v46 = vpop.eup %1022  ;;  %1034 = vpow2.f32 %v507_v52 }
 0x159   :  { %v1546_v42 = vpop.eup %1024  ;;  %v628_v58 = vsel %vm360_vm2, %v1544_v46, 0.0  ;;  %1036 = vpow2.f32 %v493_v29 }
 0x15a   :  { %v1548_v63 = vpop.eup %1026  ;;  %v607_v56 = vsel %vm360_vm2, %v1546_v42, 0.0  ;;  %1038 = vpow2.f32 %v491_v31 }
 0x15b   :  { %v604_v12 = vsel %vm360_vm2, %v1548_v63, 0.0  ;;  %v1562_v57 = vpop.eup %1028  ;;  %1040 = vpow2.f32 %v537_v59 }
 0x15c   :  { %v1564_v13 = vpop.eup %1030  ;;  %v601_v8 = vsel %vm360_vm2, %v1562_v57, 0.0  ;;  %1042 = vpow2.f32 %v505_v48 }
 0x15d   :  { %623 = vadd.xlane.f32.xlu2 %v622_v20  ;;  %563 = vadd.xlane.f32.xlu1 %v562_v26  ;;  %v1566_v45 = vpop.eup %1032  ;;  %v586_v4 = vsel %vm360_vm2, %v1564_v13, 0.0  ;;  %1044 = vpow2.f32 %v489_v62 }
 0x15e   :  { %v583_v40 = vsel %vm360_vm2, %v1566_v45, 0.0  ;;  %v1578_v41 = vpop.eup %1034 }
 0x15f   :  { %632 = vadd.xlane.f32.xlu0 %v631_v28  ;;  %v1580_v24 = vpop.eup %1036  ;;  %v580_v38 = vsel %vm360_vm2, %v1578_v41, 0.0 }
 0x160   :  { %v1582_v39 = vpop.eup %1038  ;;  %v559_v35 = vsel %vm360_vm2, %v1580_v24, 0.0 }
 0x161   :  { %v556_v0 = vsel %vm360_vm2, %v1582_v39, 0.0  ;;  %v1592_v32 = vpop.eup %1040 }
 0x162   :  { %v1594_v1 = vpop.eup %1042  ;;  %v625_v37 = vsel %vm360_vm2, %v1592_v32, 0.0 }
 0x163   :  { %v577_v21 = vsel %vm360_vm2, %v1594_v1, 0.0  ;;  %v1600_v11 = vpop.eup %1044 }
 0x164   :  { %v553_v30 = vsel %vm360_vm2, %v1600_v11, 0.0 }
 0x165   :  { %608 = vadd.xlane.f32.xlu2 %v607_v56  ;;  %629 = vadd.xlane.f32.xlu1 %v628_v58 }
 0x167   :  { %605 = vadd.xlane.f32.xlu0 %v604_v12 }
 0x16d   :  { %587 = vadd.xlane.f32.xlu2 %v586_v4  ;;  %602 = vadd.xlane.f32.xlu1 %v601_v8 }
 0x16f   :  { %584 = vadd.xlane.f32.xlu0 %v583_v40 }
 0x175   :  { %560 = vadd.xlane.f32.xlu2 %v559_v35  ;;  %581 = vadd.xlane.f32.xlu1 %v580_v38 }
 0x177   :  { %557 = vadd.xlane.f32.xlu0 %v556_v0 }
 0x17d   :  { %626 = vadd.xlane.f32.xlu2 %v625_v37 }
 0x17f   :  { %578 = vadd.xlane.f32.xlu0 %v577_v21 }
 0x185   :  { %554 = vadd.xlane.f32.xlu2 %v553_v30 }
 0x19f   :  { %v1604_v15 = vpop.xlane.xlu1 %611 }
 0x1a1   :  { %v636_v20 = vpop.xlane.xlu2 %635 }
 0x1a2   :  { %v567_v16 = vpop.xlane.xlu0 %566 }
 0x1a7   :  { %v591_v26 = vpop.xlane.xlu1 %590 }
 0x1a9   :  { %v570_v43 = vpop.xlane.xlu2 %569 }
 0x1aa   :  { %v1606_v28 = vpop.xlane.xlu0 %614 }
 0x1af   :  { %v639_v23 = vpop.xlane.xlu1 %638 }
 0x1b1   :  { %v618_v33 = vpop.xlane.xlu2 %617 }
 0x1b2   :  { %v594_v9 = vpop.xlane.xlu0 %593 }
 0x1b7   :  { %v573_v50 = vpop.xlane.xlu1 %572 }
 0x1b9   :  { %v597_v56 = vpop.xlane.xlu2 %596 }
 0x1ba   :  { %v642_v51 = vpop.xlane.xlu0 %641 }
 0x1c0   :  { %v621_v58 = vpop.xlane.xlu1 %620 }
 0x1c2   :  { %v576_v12 = vpop.xlane.xlu0 %575 }
 0x1c3   :  { %1046 = vrcp.f32 %v576_v12 }
 0x1c4   :  { %1048 = vrcp.f32 %v573_v50 }
 0x1c5   :  { %1050 = vrcp.f32 %v567_v16 }
 0x1c6   :  { %1052 = vrcp.f32 %v570_v43 }
 0x1c8   :  { %v600_v29 = vpop.xlane.xlu1 %599  ;;  %v645_v31 = vpop.xlane.xlu2 %644 }
 0x1c9   :  { %v1047_v52 = vpop.eup %1046  ;;  %1054 = vrcp.f32 %v600_v29 }
 0x1ca   :  { %v648_v25 = vpop.xlane.xlu0 %647  ;;  %v688_v14 = vmul.f32 %v1047_v52, %v1495_v47  ;;  %v1049_v4 = vpop.eup %1048 }
 0x1cb   :  { %1056 = vrcp.f32 %v648_v25  ;;  %v1051_v8 = vpop.eup %1050  ;;  %v687_v40 = vmul.f32 %v1049_v4, %v1479_v60 }
 0x1cc   :  { %1058 = vrcp.f32 %v597_v56  ;;  %946 = vmatpush.xpose.msk.msrb.mxu0 %vm360_vm2, %v688_v14  ;;  %v1053_v59 = vpop.eup %1052  ;;  %v685_v16 = vmul.f32 %v1051_v8, %v1442_v44 }
 0x1cd   :  { %1060 = vrcp.f32 %v645_v31  ;;  %v686_v37 = vmul.f32 %v1053_v59, %v1457_v6 }
 0x1ce   :  { %1062 = vrcp.f32 %v594_v9 }
 0x1cf   :  { %v1055_v48 = vpop.eup %1054  ;;  %1064 = vrcp.f32 %v642_v51 }
 0x1d0   :  { %947 = vmatpush.xpose.msk.msrb.mxu0 %vm360_vm2, %v687_v40  ;;  %v564_v35 = vpop.xlane.xlu1 %563  ;;  %v624_v38 = vpop.xlane.xlu2 %623  ;;  %v696_v47 = vmul.f32 %v1055_v48, %v1508_v3 }
 0x1d1   :  { %v1057_v22 = vpop.eup %1056  ;;  %1066 = vrcp.f32 %v564_v35 }
 0x1d2   :  { %v1059_v0 = vpop.eup %1058  ;;  %v633_v62 = vpop.xlane.xlu0 %632  ;;  %v712_v21 = vmul.f32 %v1057_v22, %v1516_v5  ;;  %1068 = vrcp.f32 %v591_v26  ;;  %955 = vmatpush.xpose.msk.msrb.mxu1 %vm360_vm2, %v696_v47 }
 0x1d3   :  { %v1061_v30 = vpop.eup %1060  ;;  %1070 = vrcp.f32 %v624_v38  ;;  %v695_v60 = vmul.f32 %v1059_v0, %v1486_v17 }
 0x1d4   :  { %948 = vmatpush.xpose.msk.msrb.mxu0 %vm360_vm2, %v686_v37  ;;  %973 = vmatpush.xpose.msk.msrb.mxu3 %vm360_vm2, %v712_v21  ;;  %1072 = vrcp.f32 %v639_v23  ;;  %v1063_v3 = vpop.eup %1062  ;;  %v711_v6 = vmul.f32 %v1061_v30, %v1512_v10 }
 0x1d5   :  { %1074 = vrcp.f32 %v621_v58  ;;  %v1065_v43 = vpop.eup %1064  ;;  %v694_v50 = vmul.f32 %v1063_v3, %v1470_v27 }
 0x1d6   :  { %956 = vmatpush.xpose.msk.msrb.mxu1 %vm360_vm2, %v695_v60  ;;  %1076 = vrcp.f32 %v636_v20  ;;  %v710_v10 = vmul.f32 %v1065_v43, %v1484_v36 }
 0x1d7   :  { %v1067_v5 = vpop.eup %1066  ;;  %1078 = vrcp.f32 %v618_v33 }
 0x1d8   :  { %949 = vmatpush.xpose.msk.msrb.mxu0 %vm360_vm2, %v685_v16  ;;  %974 = vmatpush.xpose.msk.msrb.mxu3 %vm360_vm2, %v711_v6  ;;  %v1069_v26 = vpop.eup %1068  ;;  %v630_v9 = vpop.xlane.xlu1 %629  ;;  %v684_v17 = vmul.f32 %v1067_v5, %v1526_v34  ;;  %1080 = vrcp.f32 %v633_v62  ;;  %v52_v16 = vld [vmem:[%s1704_s2 + $0x4] sm:$0x3]  ;;  %v50_v6 = vld [vmem:[%s1704_s2] sm:$0x3] }
 0x1d9   :  { %v609_v23 = vpop.xlane.xlu2 %608  ;;  %v1071_v51 = vpop.eup %1070  ;;  %v693_v27 = vmul.f32 %v1069_v26, %v1449_v54  ;;  %1082 = vrcp.f32 %v1606_v28 }
 0x1da   :  { %v606_v44 = vpop.xlane.xlu0 %605  ;;  %v1073_v56 = vpop.eup %1072  ;;  %957 = vmatpush.xpose.msk.msrb.mxu1 %vm360_vm2, %v694_v50  ;;  %v704_v58 = vmul.f32 %v1071_v51, %v1528_v2  ;;  %1084 = vrcp.f32 %v630_v9 }
 0x1db   :  { %v1075_v12 = vpop.eup %1074  ;;  %v709_v34 = vmul.f32 %v1073_v56, %v1464_v18  ;;  %1086 = vrcp.f32 %v1604_v15 }
 0x1dc   :  { %950 = vmatpush.xpose.msk.msrb.mxu0 %vm360_vm2, %v684_v17  ;;  %975 = vmatpush.xpose.msk.msrb.mxu3 %vm360_vm2, %v710_v10  ;;  %v1077_v36 = vpop.eup %1076  ;;  %v703_v20 = vmul.f32 %v1075_v12, %v1499_v53 }
 0x1dd   :  { %964 = vmatpush.xpose.msk.msrb.mxu2 %vm360_vm2, %v704_v58  ;;  %v1079_v2 = vpop.eup %1078  ;;  %v708_v28 = vmul.f32 %v1077_v36, %v1440_v19 }
 0x1de   :  { %958 = vmatpush.xpose.msk.msrb.mxu1 %vm360_vm2, %v693_v27  ;;  %v1081_v29 = vpop.eup %1080  ;;  %v702_v18 = vmul.f32 %v1079_v2, %v1472_v49 }
 0x1df   :  { %v1083_v31 = vpop.eup %1082  ;;  %v707_v53 = vmul.f32 %v1081_v29, %v1530_v55 }
 0x1e0   :  { %976 = vmatpush.xpose.msk.msrb.mxu3 %vm360_vm2, %v709_v34  ;;  %v603_v33 = vpop.xlane.xlu1 %602  ;;  %v1085_v25 = vpop.eup %1084  ;;  %v701_v14 = vmul.f32 %v1083_v31, %v1455_v61 }
 0x1e1   :  { %965 = vmatpush.xpose.msk.msrb.mxu2 %vm360_vm2, %v703_v20  ;;  %v588_v52 = vpop.xlane.xlu2 %587  ;;  %v1087_v15 = vpop.eup %1086  ;;  %v706_v40 = vmul.f32 %v1085_v25, %v1544_v46 }
 0x1e2   :  { %v585_v54 = vpop.xlane.xlu0 %584  ;;  %1088 = vrcp.f32 %v588_v52  ;;  %v700_v55 = vmul.f32 %v1087_v15, %v1434_v7 }
 0x1e3   :  { %1090 = vrcp.f32 %v609_v23 }
 0x1e4   :  { %977 = vmatpush.xpose.msk.msrb.mxu3 %vm360_vm2, %v708_v28  ;;  %1092 = vrcp.f32 %v585_v54 }
 0x1e5   :  { %966 = vmatpush.xpose.msk.msrb.mxu2 %vm360_vm2, %v702_v18 }
 0x1e8   :  { %978 = vmatpush.xpose.msk.msrb.mxu3 %vm360_vm2, %v707_v53  ;;  %v582_v19 = vpop.xlane.xlu1 %581  ;;  %v1089_v4 = vpop.eup %1088 }
 0x1e9   :  { %967 = vmatpush.xpose.msk.msrb.mxu2 %vm360_vm2, %v701_v14  ;;  %v561_v49 = vpop.xlane.xlu2 %560  ;;  %1094 = vrcp.f32 %v582_v19  ;;  %v1091_v59 = vpop.eup %1090  ;;  %v692_v48 = vmul.f32 %v1089_v4, %v1564_v13 }
 0x1ea   :  { %v558_v8 = vpop.xlane.xlu0 %557  ;;  %1096 = vrcp.f32 %v606_v44  ;;  %v1093_v22 = vpop.eup %1092  ;;  %v699_v46 = vmul.f32 %v1091_v59, %v1546_v42 }
 0x1eb   :  { %1098 = vrcp.f32 %v561_v49  ;;  %959 = vmatpush.xpose.msk.msrb.mxu1 %vm360_vm2, %v692_v48  ;;  %v691_v61 = vmul.f32 %v1093_v22, %v1566_v45 }
 0x1ec   :  { %979 = vmatpush.xpose.msk.msrb.mxu3 %vm360_vm2, %v706_v40  ;;  %1100 = vrcp.f32 %v558_v8 }
 0x1ed   :  { %968 = vmatpush.xpose.msk.msrb.mxu2 %vm360_vm2, %v700_v55  ;;  %1102 = vrcp.f32 %v603_v33 }
 0x1ef   :  { %v1095_v35 = vpop.eup %1094  ;;  %960 = vmatpush.xpose.msk.msrb.mxu1 %vm360_vm2, %v691_v61 }
 0x1f0   :  { %v1097_v38 = vpop.eup %1096  ;;  %v690_v13 = vmul.f32 %v1095_v35, %v1578_v41 }
 0x1f1   :  { %969 = vmatpush.xpose.msk.msrb.mxu2 %vm360_vm2, %v699_v46  ;;  %v627_v7 = vpop.xlane.xlu2 %626  ;;  %v1099_v47 = vpop.eup %1098  ;;  %v698_v45 = vmul.f32 %v1097_v38, %v1548_v63 }
 0x1f2   :  { %v579_v0 = vpop.xlane.xlu0 %578  ;;  %1104 = vrcp.f32 %v627_v7  ;;  %v683_v62 = vmul.f32 %v1099_v47, %v1580_v24  ;;  %v1101_v37 = vpop.eup %1100 }
 0x1f3   :  { %1106 = vrcp.f32 %v579_v0  ;;  %v1103_v21 = vpop.eup %1102  ;;  %961 = vmatpush.xpose.msk.msrb.mxu1 %vm360_vm2, %v690_v13  ;;  %v682_v42 = vmul.f32 %v1101_v37, %v1582_v39  ;;  %v51_v39 = vld [vmem:[%s1704_s2 + $0x2] sm:$0x3] }
 0x1f4   :  { %951 = vmatpush.xpose.msk.msrb.mxu0 %vm360_vm2, %v683_v62  ;;  %v697_v41 = vmul.f32 %v1103_v21, %v1562_v57  ;;  %v53_v57 = vld [vmem:[%s1704_s2 + $0x6] sm:$0x3] }
 0x1f5   :  { %970 = vmatpush.xpose.msk.msrb.mxu2 %vm360_vm2, %v698_v45 }
 0x1f8   :  { %v1105_v30 = vpop.eup %1104  ;;  %952 = vmatpush.xpose.msk.msrb.mxu0 %vm360_vm2, %v682_v42 }
 0x1f9   :  { %v1107_v60 = vpop.eup %1106  ;;  %v555_v3 = vpop.xlane.xlu2 %554  ;;  %v705_v24 = vmul.f32 %v1105_v30, %v1592_v32  ;;  %971 = vmatpush.xpose.msk.msrb.mxu2 %vm360_vm2, %v697_v41 }
 0x1fa   :  { %1108 = vrcp.f32 %v555_v3  ;;  %v689_v63 = vmul.f32 %v1107_v60, %v1594_v1 }
 0x1fb   :  { %980 = vmatpush.xpose.msk.msrb.mxu3 %vm360_vm2, %v705_v24 }
 0x1fc   :  { %962 = vmatpush.xpose.msk.msrb.mxu1 %vm360_vm2, %v689_v63  ;;  %972 = vmatmul.msk.f32.vlgmr.msrb.gmra.mxu2 %vm360_vm2, %v52_v16 }
 0x1fe   :  { %981 = vmatmul.msk.f32.vlgmr.msrb.gmra.mxu3 %vm360_vm2, %v53_v57 }
 0x1ff   :  { %963 = vmatmul.msk.f32.vlgmr.msrb.gmra.mxu1 %vm360_vm2, %v51_v39 }
 0x200   :  { %v1109_v32 = vpop.eup %1108 }
 0x201   :  { %v681_v1 = vmul.f32 %v1109_v32, %v1600_v11 }
 0x203   :  { %953 = vmatpush.xpose.msk.msrb.mxu0 %vm360_vm2, %v681_v1 }
 0x206   :  { %954 = vmatmul.msk.f32.vlgmr.msrb.gmra.mxu0 %vm360_vm2, %v50_v6 }
 0x27c   :  { %v804_v43 = vpop.f32.mrf.mxu1 }
 0x27d   :  { %903 = vst.msk [vmem:[%s1705_s3 + $0x2] sm:$0x3] %vm901_vm3, %v804_v43 }
 0x27f   :  { %v851_v5 = vpop.f32.mrf.mxu2 }
 0x280   :  { %904 = vst.msk [vmem:[%s1705_s3 + $0x4] sm:$0x3] %vm901_vm3, %v851_v5 }
 0x281   :  { %v898_v11 = vpop.f32.mrf.mxu3 }
 0x282   :  { %905 = vst.msk [vmem:[%s1705_s3 + $0x6] sm:$0x3] %vm901_vm3, %v898_v11 }
 0x283   :  { %v757_v26 = vpop.f32.mrf.mxu0 }
 0x284   :  { %902 = vst.msk [vmem:[%s1705_s3] sm:$0x3] %vm901_vm3, %v757_v26 }

// kernel: basic_block_forward.21
= control target key start
LH: loop header
LB: loop body
LE: loop exit
PB: predicated region body
PF: predicated region fallthrough
CT: control target
= control target key end

     0   :  { %s421_s12 = smov 0   ;;  %s463_s0 = inlined_call_operand.vmem [shape: f32[2,4,512], index: 0, kind: input, shape index: {}]   ;;  %s464_s1 = inlined_call_operand.vmem [shape: f32[1,4,1], index: 1, kind: input, shape index: {}]   ;;  %s465_s2 = inlined_call_operand.vmem [shape: f32[1,4,1], index: 2, kind: input, shape index: {}]   ;;  %s466_s3 = inlined_call_operand.vmem [shape: f32[2,4,512], index: 3, kind: output, shape index: {}]  }
   0x1 LB: > { %s352_s13 = sadd.s32 4294967295, %s396_s12   ;;  %p356_p0 = scmp.ge.s32.totalorder %s396_s12, 1  ;;  %s396_s12 = sphi %s421_s12, %s13_s12  }
   0x2   : > { %p137_p1 = scmp.lt.s32.totalorder %s396_s12, 3 }
   0x4   : > { %p138_p2 = pnand %p356_p0, %p137_p1 }
   0x5   : > { %p161_p3 = scmp.lt.s32.totalorder (!%p138_p2), %s352_s13, 1 }
   0x6   : > { %141 = sbr.rel (%p138_p2) target bundleno = 492 (0x1ec), region = 32 }
   0xb   : > { %s468_s13 = smov (!%p161_p3, %s352_s13), 1  ;;  %vm186_vm0 = vcmask 1043456   ;;  %v398_v13 = vmov 2048.0   ;;  %v399_v43 = vmov 0   ;;  %v271_v44 = vld [vmem:[%s464_s1] sm:$0xf] }
   0xc   : > { %s363_s14 = sshll.u32 %s468_s13, 4  ;;  %386 = vrcp.f32 %v398_v13  ;;  %384 = vset.pattern.permute.xlu1 %v399_v43  ;;  %385 = vset.pattern.permute.xlu0 %v399_v43  ;;  %v283_v45 = vld [vmem:[%s465_s2] sm:$0xf]  ;;  %v400_v62 = vmov 839922192  }
   0xd   : > { %s165_s17 = scalar_lea.vmem %s463_s0, %s363_s14  ;;  %274 = vperm.xlu1 %384, %v271_v44   ;;  %v277_v63 = vunpack.c.l.s4 %v400_v62  ;;  %s170_s4 = scalar_lea.vmem %s466_s3, %s363_s14 }
   0xe   : > { %v171_v0 = vld [vmem:[%s165_s17] sm:$0xff]  ;;  %v172_v1 = vld [vmem:[%s165_s17 + $0x8] sm:$0xff] }
   0xf   : > { %175 = vst [vmem:[#allocation1] ss:$2 sm:$0xff] %v171_v0 }
  0x10   : > { %177 = vst [vmem:[#allocation1 + $0x10] ss:$2 sm:$0xff] %v172_v1 }
  0x12   : > { %v387_v14 = vpop.eup %386 }
  0x13   : > { %v204_v15 = vmul.f32 2048.0, %v387_v14  ;;  %vm208_vm1 = vweird.f32 %v387_v14 }
  0x15   : > { %v205_v16 = vsub.f32 1.0, %v204_v15  ;;  %286 = vperm.xlu1 %384, %v283_v45  }
  0x16   : > { %v178_v2 = vld.sshfl [vmem:[#allocation1] sm:$0xff pattern:$0x75316420]  ;;  %v179_v3 = vld.sshfl [vmem:[#allocation1 + $0x8] sm:$0xff pattern:$0x75316420] }
  0x17   : > { %v180_v4 = vld.sshfl [vmem:[#allocation1 + $0x10] sm:$0xff pattern:$0x75316420]  ;;  %v181_v5 = vld.sshfl [vmem:[#allocation1 + $0x18] sm:$0xff pattern:$0x75316420]  ;;  %v206_v20 = vmul.f32 %v387_v14, %v205_v16 }
  0x18   : > { %v187_v6 = vsel %vm186_vm0, %v178_v2, 0.0  ;;  %v188_v7 = vsel %vm186_vm0, %v179_v3, 0.0  ;;  %v190_v8 = vsel %vm186_vm0, %v180_v4, 0.0  ;;  %v192_v10 = vsel %vm186_vm0, %v181_v5, 0.0 }
  0x19   : > { %v189_v9 = vadd.f32 %v188_v7, %v187_v6  ;;  %v207_v23 = vadd.f32 %v387_v14, %v206_v20 }
  0x1b   : > { %v191_v11 = vadd.f32 %v190_v8, %v189_v9  ;;  %v209_v26 = vsel %vm208_vm1, %v387_v14, %v207_v23 }
  0x1d   : > { %v193_v12 = vadd.f32 %v192_v10, %v191_v11 }
  0x1f   : > { %194 = vadd.xlane.f32.xlu0 %v193_v12 }
  0x7f   : > { %v275_v61 = vpop.permute.xlu1 %274 }
  0x92   : > { %v195_v17 = vpop.xlane.xlu0 %194 }
  0x93   : > { %v196_v18 = vrot.slane %v195_v17, 4 }
  0x95   : > { %v197_v19 = vadd.f32 %v196_v18, %v195_v17 }
  0x97   : > { %v198_v21 = vrot.slane %v197_v19, 2 }
  0x99   : > { %v199_v22 = vadd.f32 %v198_v21, %v197_v19 }
  0x9b   : > { %v200_v24 = vrot.slane %v199_v22, 1 }
  0x9d   : > { %v201_v25 = vadd.f32 %v200_v24, %v199_v22 }
  0x9f   : > { %365 = vpush %v201_v25 }
  0xa0   : > { %367 = vpush %v209_v26 }
  0xd0   : > { %s366_s18 = spop %365 }
  0xd1   : > { %s441_s19 = spop %367 }
  0xd2   : > { %s211_s20 = smul.f32 %s441_s19, %s366_s18 }
  0xd4   : > { %v212_v27 = vstv %s211_s20 }
  0xd5   : > { %v213_v28 = vsub.f32 %v171_v0, %v212_v27  ;;  %v214_v29 = vsub.f32 %v172_v1, %v212_v27  ;;  %v278_v0 = vunpack.c.0.s8 %v277_v63  ;;  %v287_v1 = vpop.permute.xlu1 %286 }
  0xd7   : > { %v215_v30 = vmul.f32 %v213_v28, %v213_v28  ;;  %v216_v31 = vmul.f32 %v214_v29, %v214_v29  ;;  %v279_v3 = vperm.slane %v275_v61, %v278_v0  ;;  %v291_v6 = vperm.slane %v287_v1, %v278_v0 }
  0xd9   : > { %219 = vst [vmem:[#allocation1] ss:$2 sm:$0xff] %v215_v30 }
  0xda   : > { %221 = vst [vmem:[#allocation1 + $0x10] ss:$2 sm:$0xff] %v216_v31 }
  0xe0   : > { %v222_v32 = vld.sshfl [vmem:[#allocation1] sm:$0xff pattern:$0x75316420]  ;;  %v223_v33 = vld.sshfl [vmem:[#allocation1 + $0x8] sm:$0xff pattern:$0x75316420] }
  0xe1   : > { %v224_v34 = vld.sshfl [vmem:[#allocation1 + $0x10] sm:$0xff pattern:$0x75316420]  ;;  %v230_v35 = vsel %vm186_vm0, %v222_v32, 0.0  ;;  %v231_v36 = vsel %vm186_vm0, %v223_v33, 0.0 }
  0xe2   : > { %v225_v37 = vld.sshfl [vmem:[#allocation1 + $0x18] sm:$0xff pattern:$0x75316420]  ;;  %v232_v38 = vadd.f32 %v231_v36, %v230_v35  ;;  %v233_v39 = vsel %vm186_vm0, %v224_v34, 0.0 }
  0xe3   : > { %v235_v41 = vsel %vm186_vm0, %v225_v37, 0.0 }
  0xe4   : > { %v234_v40 = vadd.f32 %v233_v39, %v232_v38 }
  0xe6   : > { %v236_v42 = vadd.f32 %v235_v41, %v234_v40 }
  0xe8   : > { %237 = vadd.xlane.f32.xlu0 %v236_v42 }
 0x15b   : > { %v238_v46 = vpop.xlane.xlu0 %237 }
 0x15c   : > { %v239_v47 = vrot.slane %v238_v46, 4 }
 0x15e   : > { %v240_v48 = vadd.f32 %v239_v47, %v238_v46 }
 0x160   : > { %v241_v49 = vrot.slane %v240_v48, 2 }
 0x162   : > { %v242_v50 = vadd.f32 %v241_v49, %v240_v48 }
 0x164   : > { %v243_v51 = vrot.slane %v242_v50, 1 }
 0x166   : > { %v244_v52 = vadd.f32 %v243_v51, %v242_v50 }
 0x168   : > { %369 = vpush %v244_v52 }
 0x199   : > { %s370_s25 = spop %369 }
 0x19a   : > { %s254_s26 = smul.f32 %s370_s25, %s441_s19 }
 0x19c   : > { %s255_s27 = sadd.f32 1e-05, %s254_s26 }
 0x19e   : > { %v256_v53 = vstv %s255_s27 }
 0x19f   : > { %388 = vrsqrt.f32 %v256_v53  ;;  %vm263_vm3 = vweird.f32 %v256_v53 }
 0x1a5   : > { %v389_v54 = vpop.eup %388 }
 0x1a6   : > { %v258_v55 = vmul.f32 %v389_v54, %v256_v53  ;;  %vm264_vm2 = vweird.f32 %v389_v54 }
 0x1a7   : > { %vm265_vm4 = vmor %vm263_vm3, %vm264_vm2 }
 0x1a8   : > { %v259_v56 = vmul.f32 %v389_v54, %v258_v55 }
 0x1aa   : > { %v260_v57 = vmul.f32 0.5, %v259_v56 }
 0x1ac   : > { %v261_v58 = vsub.f32 1.5, %v260_v57 }
 0x1ae   : > { %v262_v59 = vmul.f32 %v389_v54, %v261_v58 }
 0x1b0   : > { %v266_v60 = vsel %vm265_vm4, %v389_v54, %v262_v59 }
 0x1b1   : > { %371 = vpush %v266_v60 }
 0x1e2   : > { %s372_s28 = spop %371 }
 0x1e3   : > { %v268_v2 = vstv %s372_s28 }
 0x1e4   : > { %v269_v4 = vmul.f32 %v268_v2, %v213_v28  ;;  %v270_v5 = vmul.f32 %v268_v2, %v214_v29 }
 0x1e6   : > { %v281_v7 = vmul.f32 %v279_v3, %v269_v4  ;;  %v282_v8 = vmul.f32 %v279_v3, %v270_v5 }
 0x1e8   : > { %v293_v9 = vadd.f32 %v291_v6, %v281_v7  ;;  %v294_v10 = vadd.f32 %v291_v6, %v282_v8 }
 0x1ea   : > { %295 = vst [vmem:[%s170_s4] sm:$0xff] %v293_v9 }
 0x1eb   : > { %296 = vst [vmem:[%s170_s4 + $0x8] sm:$0xff] %v294_v10 }
 0x1ec PF: > { %s13_s12 = sadd.s32 1, %s396_s12  }
 0x1ed   : > { %p10_p4 = scmp.ge.s32.totalorder %s13_s12, 4  }
 0x1ef   :  { %12 = sbr.rel (!%p10_p4) target bundleno = 1 (0x1), region = 64 }

// kernel: basic_block_forward.12
= control target key start
LH: loop header
LB: loop body
LE: loop exit
PB: predicated region body
PF: predicated region fallthrough
CT: control target
= control target key end

     0   :  { %s1011_s12 = smov 0   ;;  %s1013_s13 = smov 0   ;;  %s1383_s0 = inlined_call_operand.vmem [shape: f32[1024,8], index: 0, kind: input, shape index: {}]   ;;  %s1384_s1 = inlined_call_operand.vmem [shape: f32[8,8], index: 1, kind: input, shape index: {}]   ;;  %s1385_s2 = inlined_call_operand.vmem [shape: f32[1,8], index: 2, kind: input, shape index: {}]   ;;  %s1386_s3 = inlined_call_operand.vmem [shape: f32[1024,8], index: 3, kind: output, shape index: {}]  }
   0x1   :  { %s1015_s14 = smov 0  }
   0x2 LB: > { %s25_s15 = sadd.s32 1, %s985_s13  ;;  %p868_p0 = scmp.ge.s32.totalorder %s989_s14, 1  ;;  %s989_s14 = sphi %s1015_s14, %s13_s14   ;;  %s985_s13 = sphi %s1013_s13, %s1388_s13   ;;  %s981_s12 = sphi %s1011_s12, %s1387_s12  }
   0x3   : > { %p27_p1 = scmp.ge.s32.totalorder %s25_s15, 2  ;;  %p169_p2 = scmp.lt.s32.totalorder %s989_s14, 3 }
   0x5   : > { %s1390_s15 = smov (%p27_p1, %s25_s15), 0  ;;  %p170_p3 = pnand %p868_p0, %p169_p2 }
   0x6   : > { %s869_s18 = sshll.u32 (!%p170_p3), %s981_s12, 6 }
   0x7   : > { %173 = sbr.rel (%p170_p3) target bundleno = 272 (0x110), region = 32  ;;  %p204_p4 = scmp.lt.s32.totalorder (!%p170_p3), %s869_s18, 127 }
   0xc   : > { %v289_v0 = vld [vmem:[%s1384_s1] sm:$0xff]  ;;  %s1392_s18 = smov (!%p204_p4, %s869_s18), 127  ;;  %vm294_vm0 = vcmask 64512  }
   0xd   : > { %940 = vmatpush.msra.mxu2 %v289_v0  ;;  %941 = vmatpush.msra.mxu3 %v289_v0  ;;  %s870_s19 = sshll.u32 %s1392_s18, 3 }
   0xe   : > { %502 = vmatpush.msra.mxu0 %v289_v0  ;;  %939 = vmatpush.msra.mxu1 %v289_v0  ;;  %s1040_s22 = scalar_lea.vmem %s1383_s0, %s870_s19  ;;  %s1180_s27 = scalar_lea.vmem %s1386_s3, %s870_s19 }
   0xf   : > { %v257_v1 = vld [vmem:[%s1040_s22 + $0x100] sm:$0xff]  ;;  %v258_v5 = vld [vmem:[%s1040_s22 + $0x108] sm:$0xff]  ;;  %v259_v9 = vld [vmem:[%s1040_s22 + $0x110] sm:$0xff] }
  0x10   : > { %v273_v2 = vld [vmem:[%s1040_s22 + $0x180] sm:$0xff]  ;;  %905 = vmatmul.msk.f32.vlgmr.msra.gmra.mxu2 %vm294_vm0, %v257_v1  ;;  %v274_v6 = vld [vmem:[%s1040_s22 + $0x188] sm:$0xff]  ;;  %v275_v10 = vld [vmem:[%s1040_s22 + $0x190] sm:$0xff] }
  0x11   : > { %v225_v3 = vld [vmem:[%s1040_s22] sm:$0xff]  ;;  %921 = vmatmul.msk.f32.vlgmr.msra.gmra.mxu3 %vm294_vm0, %v273_v2  ;;  %v226_v7 = vld [vmem:[%s1040_s22 + $0x8] sm:$0xff]  ;;  %v227_v11 = vld [vmem:[%s1040_s22 + $0x10] sm:$0xff] }
  0x12   : > { %v241_v4 = vld [vmem:[%s1040_s22 + $0x80] sm:$0xff]  ;;  %873 = vmatmul.msk.f32.vlgmr.msra.gmra.mxu0 %vm294_vm0, %v225_v3  ;;  %v242_v8 = vld [vmem:[%s1040_s22 + $0x88] sm:$0xff]  ;;  %v243_v12 = vld [vmem:[%s1040_s22 + $0x90] sm:$0xff] }
  0x13   : > { %889 = vmatmul.msk.f32.vlgmr.msra.gmra.mxu1 %vm294_vm0, %v241_v4  ;;  %v260_v13 = vld [vmem:[%s1040_s22 + $0x118] sm:$0xff]  ;;  %v261_v17 = vld [vmem:[%s1040_s22 + $0x120] sm:$0xff]  ;;  %v262_v21 = vld [vmem:[%s1040_s22 + $0x128] sm:$0xff] }
  0x14   : > { %v276_v14 = vld [vmem:[%s1040_s22 + $0x198] sm:$0xff]  ;;  %v277_v18 = vld [vmem:[%s1040_s22 + $0x1a0] sm:$0xff]  ;;  %v278_v22 = vld [vmem:[%s1040_s22 + $0x1a8] sm:$0xff] }
  0x15   : > { %v228_v15 = vld [vmem:[%s1040_s22 + $0x18] sm:$0xff]  ;;  %v229_v19 = vld [vmem:[%s1040_s22 + $0x20] sm:$0xff]  ;;  %v230_v23 = vld [vmem:[%s1040_s22 + $0x28] sm:$0xff] }
  0x16   : > { %v244_v16 = vld [vmem:[%s1040_s22 + $0x98] sm:$0xff]  ;;  %v245_v20 = vld [vmem:[%s1040_s22 + $0xa0] sm:$0xff]  ;;  %v246_v24 = vld [vmem:[%s1040_s22 + $0xa8] sm:$0xff] }
  0x17   : > { %v263_v25 = vld [vmem:[%s1040_s22 + $0x130] sm:$0xff]  ;;  %v264_v29 = vld [vmem:[%s1040_s22 + $0x138] sm:$0xff]  ;;  %v265_v33 = vld [vmem:[%s1040_s22 + $0x140] sm:$0xff] }
  0x18   : > { %906 = vmatmul.msk.f32.gmra.mxu2 %vm294_vm0, %v258_v5  ;;  %v279_v26 = vld [vmem:[%s1040_s22 + $0x1b0] sm:$0xff]  ;;  %v280_v30 = vld [vmem:[%s1040_s22 + $0x1b8] sm:$0xff]  ;;  %v281_v34 = vld [vmem:[%s1040_s22 + $0x1c0] sm:$0xff] }
  0x19   : > { %922 = vmatmul.msk.f32.gmra.mxu3 %vm294_vm0, %v274_v6  ;;  %v231_v27 = vld [vmem:[%s1040_s22 + $0x30] sm:$0xff]  ;;  %v232_v31 = vld [vmem:[%s1040_s22 + $0x38] sm:$0xff]  ;;  %v233_v35 = vld [vmem:[%s1040_s22 + $0x40] sm:$0xff] }
  0x1a   : > { %874 = vmatmul.msk.f32.gmra.mxu0 %vm294_vm0, %v226_v7  ;;  %v247_v28 = vld [vmem:[%s1040_s22 + $0xb0] sm:$0xff]  ;;  %v248_v32 = vld [vmem:[%s1040_s22 + $0xb8] sm:$0xff]  ;;  %v249_v36 = vld [vmem:[%s1040_s22 + $0xc0] sm:$0xff] }
  0x1b   : > { %890 = vmatmul.msk.f32.gmra.mxu1 %vm294_vm0, %v242_v8  ;;  %v266_v37 = vld [vmem:[%s1040_s22 + $0x148] sm:$0xff]  ;;  %v267_v41 = vld [vmem:[%s1040_s22 + $0x150] sm:$0xff]  ;;  %v268_v45 = vld [vmem:[%s1040_s22 + $0x158] sm:$0xff] }
  0x1c   : > { %v282_v38 = vld [vmem:[%s1040_s22 + $0x1c8] sm:$0xff]  ;;  %v283_v42 = vld [vmem:[%s1040_s22 + $0x1d0] sm:$0xff]  ;;  %v284_v46 = vld [vmem:[%s1040_s22 + $0x1d8] sm:$0xff] }
  0x1d   : > { %v234_v39 = vld [vmem:[%s1040_s22 + $0x48] sm:$0xff]  ;;  %v235_v43 = vld [vmem:[%s1040_s22 + $0x50] sm:$0xff]  ;;  %v236_v47 = vld [vmem:[%s1040_s22 + $0x58] sm:$0xff] }
  0x1e   : > { %v250_v40 = vld [vmem:[%s1040_s22 + $0xc8] sm:$0xff]  ;;  %v251_v44 = vld [vmem:[%s1040_s22 + $0xd0] sm:$0xff]  ;;  %v252_v48 = vld [vmem:[%s1040_s22 + $0xd8] sm:$0xff] }
  0x1f   : > { %v269_v49 = vld [vmem:[%s1040_s22 + $0x160] sm:$0xff]  ;;  %v270_v53 = vld [vmem:[%s1040_s22 + $0x168] sm:$0xff]  ;;  %v271_v57 = vld [vmem:[%s1040_s22 + $0x170] sm:$0xff] }
  0x20   : > { %907 = vmatmul.msk.f32.gmra.mxu2 %vm294_vm0, %v259_v9  ;;  %v285_v50 = vld [vmem:[%s1040_s22 + $0x1e0] sm:$0xff]  ;;  %v286_v54 = vld [vmem:[%s1040_s22 + $0x1e8] sm:$0xff]  ;;  %v287_v58 = vld [vmem:[%s1040_s22 + $0x1f0] sm:$0xff] }
  0x21   : > { %923 = vmatmul.msk.f32.gmra.mxu3 %vm294_vm0, %v275_v10  ;;  %v237_v51 = vld [vmem:[%s1040_s22 + $0x60] sm:$0xff]  ;;  %v238_v55 = vld [vmem:[%s1040_s22 + $0x68] sm:$0xff]  ;;  %v239_v59 = vld [vmem:[%s1040_s22 + $0x70] sm:$0xff] }
  0x22   : > { %875 = vmatmul.msk.f32.gmra.mxu0 %vm294_vm0, %v227_v11  ;;  %v253_v52 = vld [vmem:[%s1040_s22 + $0xe0] sm:$0xff]  ;;  %v254_v56 = vld [vmem:[%s1040_s22 + $0xe8] sm:$0xff]  ;;  %v255_v60 = vld [vmem:[%s1040_s22 + $0xf0] sm:$0xff] }
  0x23   : > { %891 = vmatmul.msk.f32.gmra.mxu1 %vm294_vm0, %v243_v12  ;;  %v272_v61 = vld [vmem:[%s1040_s22 + $0x178] sm:$0xff]  ;;  %v1173_v1 = vld [vmem:[%s1385_s2] ss:$0 sm:$0xff] }
  0x24   : > { %v288_v62 = vld [vmem:[%s1040_s22 + $0x1f8] sm:$0xff] }
  0x25   : > { %v240_v63 = vld [vmem:[%s1040_s22 + $0x78] sm:$0xff] }
  0x26   : > { %v256_v0 = vld [vmem:[%s1040_s22 + $0xf8] sm:$0xff] }
  0x28   : > { %908 = vmatmul.msk.f32.gmra.mxu2 %vm294_vm0, %v260_v13 }
  0x29   : > { %924 = vmatmul.msk.f32.gmra.mxu3 %vm294_vm0, %v276_v14 }
  0x2a   : > { %876 = vmatmul.msk.f32.gmra.mxu0 %vm294_vm0, %v228_v15 }
  0x2b   : > { %892 = vmatmul.msk.f32.gmra.mxu1 %vm294_vm0, %v244_v16 }
  0x30   : > { %909 = vmatmul.msk.f32.gmra.mxu2 %vm294_vm0, %v261_v17 }
  0x31   : > { %925 = vmatmul.msk.f32.gmra.mxu3 %vm294_vm0, %v277_v18 }
  0x32   : > { %877 = vmatmul.msk.f32.gmra.mxu0 %vm294_vm0, %v229_v19 }
  0x33   : > { %893 = vmatmul.msk.f32.gmra.mxu1 %vm294_vm0, %v245_v20 }
  0x38   : > { %910 = vmatmul.msk.f32.gmra.mxu2 %vm294_vm0, %v262_v21 }
  0x39   : > { %926 = vmatmul.msk.f32.gmra.mxu3 %vm294_vm0, %v278_v22 }
  0x3a   : > { %878 = vmatmul.msk.f32.gmra.mxu0 %vm294_vm0, %v230_v23 }
  0x3b   : > { %894 = vmatmul.msk.f32.gmra.mxu1 %vm294_vm0, %v246_v24 }
  0x40   : > { %911 = vmatmul.msk.f32.gmra.mxu2 %vm294_vm0, %v263_v25 }
  0x41   : > { %927 = vmatmul.msk.f32.gmra.mxu3 %vm294_vm0, %v279_v26 }
  0x42   : > { %879 = vmatmul.msk.f32.gmra.mxu0 %vm294_vm0, %v231_v27 }
  0x43   : > { %895 = vmatmul.msk.f32.gmra.mxu1 %vm294_vm0, %v247_v28 }
  0x48   : > { %912 = vmatmul.msk.f32.gmra.mxu2 %vm294_vm0, %v264_v29 }
  0x49   : > { %928 = vmatmul.msk.f32.gmra.mxu3 %vm294_vm0, %v280_v30 }
  0x4a   : > { %880 = vmatmul.msk.f32.gmra.mxu0 %vm294_vm0, %v232_v31 }
  0x4b   : > { %896 = vmatmul.msk.f32.gmra.mxu1 %vm294_vm0, %v248_v32 }
  0x50   : > { %913 = vmatmul.msk.f32.gmra.mxu2 %vm294_vm0, %v265_v33 }
  0x51   : > { %929 = vmatmul.msk.f32.gmra.mxu3 %vm294_vm0, %v281_v34 }
  0x52   : > { %881 = vmatmul.msk.f32.gmra.mxu0 %vm294_vm0, %v233_v35 }
  0x53   : > { %897 = vmatmul.msk.f32.gmra.mxu1 %vm294_vm0, %v249_v36 }
  0x58   : > { %914 = vmatmul.msk.f32.gmra.mxu2 %vm294_vm0, %v266_v37 }
  0x59   : > { %930 = vmatmul.msk.f32.gmra.mxu3 %vm294_vm0, %v282_v38 }
  0x5a   : > { %882 = vmatmul.msk.f32.gmra.mxu0 %vm294_vm0, %v234_v39 }
  0x5b   : > { %898 = vmatmul.msk.f32.gmra.mxu1 %vm294_vm0, %v250_v40 }
  0x60   : > { %915 = vmatmul.msk.f32.gmra.mxu2 %vm294_vm0, %v267_v41 }
  0x61   : > { %931 = vmatmul.msk.f32.gmra.mxu3 %vm294_vm0, %v283_v42 }
  0x62   : > { %883 = vmatmul.msk.f32.gmra.mxu0 %vm294_vm0, %v235_v43 }
  0x63   : > { %899 = vmatmul.msk.f32.gmra.mxu1 %vm294_vm0, %v251_v44 }
  0x68   : > { %916 = vmatmul.msk.f32.gmra.mxu2 %vm294_vm0, %v268_v45 }
  0x69   : > { %932 = vmatmul.msk.f32.gmra.mxu3 %vm294_vm0, %v284_v46 }
  0x6a   : > { %884 = vmatmul.msk.f32.gmra.mxu0 %vm294_vm0, %v236_v47 }
  0x6b   : > { %900 = vmatmul.msk.f32.gmra.mxu1 %vm294_vm0, %v252_v48 }
  0x70   : > { %917 = vmatmul.msk.f32.gmra.mxu2 %vm294_vm0, %v269_v49 }
  0x71   : > { %933 = vmatmul.msk.f32.gmra.mxu3 %vm294_vm0, %v285_v50 }
  0x72   : > { %885 = vmatmul.msk.f32.gmra.mxu0 %vm294_vm0, %v237_v51 }
  0x73   : > { %901 = vmatmul.msk.f32.gmra.mxu1 %vm294_vm0, %v253_v52 }
  0x78   : > { %918 = vmatmul.msk.f32.gmra.mxu2 %vm294_vm0, %v270_v53 }
  0x79   : > { %934 = vmatmul.msk.f32.gmra.mxu3 %vm294_vm0, %v286_v54 }
  0x7a   : > { %886 = vmatmul.msk.f32.gmra.mxu0 %vm294_vm0, %v238_v55 }
  0x7b   : > { %902 = vmatmul.msk.f32.gmra.mxu1 %vm294_vm0, %v254_v56 }
  0x80   : > { %919 = vmatmul.msk.f32.gmra.mxu2 %vm294_vm0, %v271_v57 }
  0x81   : > { %935 = vmatmul.msk.f32.gmra.mxu3 %vm294_vm0, %v287_v58 }
  0x82   : > { %887 = vmatmul.msk.f32.gmra.mxu0 %vm294_vm0, %v239_v59 }
  0x83   : > { %903 = vmatmul.msk.f32.gmra.mxu1 %vm294_vm0, %v255_v60 }
  0x88   : > { %920 = vmatmul.msk.f32.gmra.mxu2 %vm294_vm0, %v272_v61 }
  0x89   : > { %936 = vmatmul.msk.f32.gmra.mxu3 %vm294_vm0, %v288_v62 }
  0x8a   : > { %888 = vmatmul.msk.f32.gmra.mxu0 %vm294_vm0, %v240_v63 }
  0x8b   : > { %904 = vmatmul.msk.f32.gmra.mxu1 %vm294_vm0, %v256_v0 }
  0x8f   : > { %v504_v2 = vpop.f32.mrf.mxu0 }
  0x90   : > { %v552_v3 = vpop.f32.mrf.mxu1  ;;  %v505_v4 = vadd.f32 %v1173_v1, %v504_v2 }
  0x91   : > { %v553_v5 = vadd.f32 %v1173_v1, %v552_v3 }
  0x92   : > { %696 = vst.msk [vmem:[%s1180_s27] sm:$0xff] %vm294_vm0, %v505_v4 }
  0x93   : > { %712 = vst.msk [vmem:[%s1180_s27 + $0x80] sm:$0xff] %vm294_vm0, %v553_v5  ;;  %v600_v6 = vpop.f32.mrf.mxu2 }
  0x94   : > { %v648_v7 = vpop.f32.mrf.mxu3  ;;  %v601_v8 = vadd.f32 %v1173_v1, %v600_v6 }
  0x95   : > { %v649_v9 = vadd.f32 %v1173_v1, %v648_v7 }
  0x96   : > { %728 = vst.msk [vmem:[%s1180_s27 + $0x100] sm:$0xff] %vm294_vm0, %v601_v8 }
  0x97   : > { %v507_v10 = vpop.f32.mrf.mxu0  ;;  %744 = vst.msk [vmem:[%s1180_s27 + $0x180] sm:$0xff] %vm294_vm0, %v649_v9 }
  0x98   : > { %v555_v11 = vpop.f32.mrf.mxu1  ;;  %v508_v12 = vadd.f32 %v1173_v1, %v507_v10 }
  0x99   : > { %v556_v13 = vadd.f32 %v1173_v1, %v555_v11 }
  0x9a   : > { %697 = vst.msk [vmem:[%s1180_s27 + $0x8] sm:$0xff] %vm294_vm0, %v508_v12 }
  0x9b   : > { %713 = vst.msk [vmem:[%s1180_s27 + $0x88] sm:$0xff] %vm294_vm0, %v556_v13  ;;  %v603_v14 = vpop.f32.mrf.mxu2 }
  0x9c   : > { %v651_v15 = vpop.f32.mrf.mxu3  ;;  %v604_v16 = vadd.f32 %v1173_v1, %v603_v14 }
  0x9d   : > { %v652_v17 = vadd.f32 %v1173_v1, %v651_v15 }
  0x9e   : > { %729 = vst.msk [vmem:[%s1180_s27 + $0x108] sm:$0xff] %vm294_vm0, %v604_v16 }
  0x9f   : > { %v510_v18 = vpop.f32.mrf.mxu0  ;;  %745 = vst.msk [vmem:[%s1180_s27 + $0x188] sm:$0xff] %vm294_vm0, %v652_v17 }
  0xa0   : > { %v558_v19 = vpop.f32.mrf.mxu1  ;;  %v511_v20 = vadd.f32 %v1173_v1, %v510_v18 }
  0xa1   : > { %v559_v21 = vadd.f32 %v1173_v1, %v558_v19 }
  0xa2   : > { %698 = vst.msk [vmem:[%s1180_s27 + $0x10] sm:$0xff] %vm294_vm0, %v511_v20 }
  0xa3   : > { %714 = vst.msk [vmem:[%s1180_s27 + $0x90] sm:$0xff] %vm294_vm0, %v559_v21  ;;  %v606_v22 = vpop.f32.mrf.mxu2 }
  0xa4   : > { %v654_v23 = vpop.f32.mrf.mxu3  ;;  %v607_v24 = vadd.f32 %v1173_v1, %v606_v22 }
  0xa5   : > { %v655_v25 = vadd.f32 %v1173_v1, %v654_v23 }
  0xa6   : > { %730 = vst.msk [vmem:[%s1180_s27 + $0x110] sm:$0xff] %vm294_vm0, %v607_v24 }
  0xa7   : > { %v513_v26 = vpop.f32.mrf.mxu0  ;;  %746 = vst.msk [vmem:[%s1180_s27 + $0x190] sm:$0xff] %vm294_vm0, %v655_v25 }
  0xa8   : > { %v561_v27 = vpop.f32.mrf.mxu1  ;;  %v514_v28 = vadd.f32 %v1173_v1, %v513_v26 }
  0xa9   : > { %v562_v29 = vadd.f32 %v1173_v1, %v561_v27 }
  0xaa   : > { %699 = vst.msk [vmem:[%s1180_s27 + $0x18] sm:$0xff] %vm294_vm0, %v514_v28 }
  0xab   : > { %715 = vst.msk [vmem:[%s1180_s27 + $0x98] sm:$0xff] %vm294_vm0, %v562_v29  ;;  %v609_v30 = vpop.f32.mrf.mxu2 }
  0xac   : > { %v657_v31 = vpop.f32.mrf.mxu3  ;;  %v610_v32 = vadd.f32 %v1173_v1, %v609_v30 }
  0xad   : > { %v658_v33 = vadd.f32 %v1173_v1, %v657_v31 }
  0xae   : > { %731 = vst.msk [vmem:[%s1180_s27 + $0x118] sm:$0xff] %vm294_vm0, %v610_v32 }
  0xaf   : > { %v516_v34 = vpop.f32.mrf.mxu0  ;;  %747 = vst.msk [vmem:[%s1180_s27 + $0x198] sm:$0xff] %vm294_vm0, %v658_v33 }
  0xb0   : > { %v564_v35 = vpop.f32.mrf.mxu1  ;;  %v517_v36 = vadd.f32 %v1173_v1, %v516_v34 }
  0xb1   : > { %v565_v37 = vadd.f32 %v1173_v1, %v564_v35 }
  0xb2   : > { %700 = vst.msk [vmem:[%s1180_s27 + $0x20] sm:$0xff] %vm294_vm0, %v517_v36 }
  0xb3   : > { %716 = vst.msk [vmem:[%s1180_s27 + $0xa0] sm:$0xff] %vm294_vm0, %v565_v37  ;;  %v612_v38 = vpop.f32.mrf.mxu2 }
  0xb4   : > { %v660_v39 = vpop.f32.mrf.mxu3  ;;  %v613_v40 = vadd.f32 %v1173_v1, %v612_v38 }
  0xb5   : > { %v661_v41 = vadd.f32 %v1173_v1, %v660_v39 }
  0xb6   : > { %732 = vst.msk [vmem:[%s1180_s27 + $0x120] sm:$0xff] %vm294_vm0, %v613_v40 }
  0xb7   : > { %v519_v42 = vpop.f32.mrf.mxu0  ;;  %748 = vst.msk [vmem:[%s1180_s27 + $0x1a0] sm:$0xff] %vm294_vm0, %v661_v41 }
  0xb8   : > { %v567_v43 = vpop.f32.mrf.mxu1  ;;  %v520_v44 = vadd.f32 %v1173_v1, %v519_v42 }
  0xb9   : > { %v568_v45 = vadd.f32 %v1173_v1, %v567_v43 }
  0xba   : > { %701 = vst.msk [vmem:[%s1180_s27 + $0x28] sm:$0xff] %vm294_vm0, %v520_v44 }
  0xbb   : > { %717 = vst.msk [vmem:[%s1180_s27 + $0xa8] sm:$0xff] %vm294_vm0, %v568_v45  ;;  %v615_v46 = vpop.f32.mrf.mxu2 }
  0xbc   : > { %v663_v47 = vpop.f32.mrf.mxu3  ;;  %v616_v48 = vadd.f32 %v1173_v1, %v615_v46 }
  0xbd   : > { %v664_v49 = vadd.f32 %v1173_v1, %v663_v47 }
  0xbe   : > { %733 = vst.msk [vmem:[%s1180_s27 + $0x128] sm:$0xff] %vm294_vm0, %v616_v48 }
  0xbf   : > { %v522_v50 = vpop.f32.mrf.mxu0  ;;  %749 = vst.msk [vmem:[%s1180_s27 + $0x1a8] sm:$0xff] %vm294_vm0, %v664_v49 }
  0xc0   : > { %v570_v51 = vpop.f32.mrf.mxu1  ;;  %v523_v52 = vadd.f32 %v1173_v1, %v522_v50 }
  0xc1   : > { %v571_v53 = vadd.f32 %v1173_v1, %v570_v51 }
  0xc2   : > { %702 = vst.msk [vmem:[%s1180_s27 + $0x30] sm:$0xff] %vm294_vm0, %v523_v52 }
  0xc3   : > { %718 = vst.msk [vmem:[%s1180_s27 + $0xb0] sm:$0xff] %vm294_vm0, %v571_v53  ;;  %v618_v54 = vpop.f32.mrf.mxu2 }
  0xc4   : > { %v666_v55 = vpop.f32.mrf.mxu3  ;;  %v619_v56 = vadd.f32 %v1173_v1, %v618_v54 }
  0xc5   : > { %v667_v57 = vadd.f32 %v1173_v1, %v666_v55 }
  0xc6   : > { %734 = vst.msk [vmem:[%s1180_s27 + $0x130] sm:$0xff] %vm294_vm0, %v619_v56 }
  0xc7   : > { %v525_v58 = vpop.f32.mrf.mxu0  ;;  %750 = vst.msk [vmem:[%s1180_s27 + $0x1b0] sm:$0xff] %vm294_vm0, %v667_v57 }
  0xc8   : > { %v573_v59 = vpop.f32.mrf.mxu1  ;;  %v526_v60 = vadd.f32 %v1173_v1, %v525_v58 }
  0xc9   : > { %v574_v61 = vadd.f32 %v1173_v1, %v573_v59 }
  0xca   : > { %703 = vst.msk [vmem:[%s1180_s27 + $0x38] sm:$0xff] %vm294_vm0, %v526_v60 }
  0xcb   : > { %719 = vst.msk [vmem:[%s1180_s27 + $0xb8] sm:$0xff] %vm294_vm0, %v574_v61  ;;  %v621_v62 = vpop.f32.mrf.mxu2 }
  0xcc   : > { %v669_v63 = vpop.f32.mrf.mxu3  ;;  %v622_v0 = vadd.f32 %v1173_v1, %v621_v62 }
  0xcd   : > { %v670_v2 = vadd.f32 %v1173_v1, %v669_v63 }
  0xce   : > { %735 = vst.msk [vmem:[%s1180_s27 + $0x138] sm:$0xff] %vm294_vm0, %v622_v0 }
  0xcf   : > { %v528_v3 = vpop.f32.mrf.mxu0  ;;  %751 = vst.msk [vmem:[%s1180_s27 + $0x1b8] sm:$0xff] %vm294_vm0, %v670_v2 }
  0xd0   : > { %v576_v4 = vpop.f32.mrf.mxu1  ;;  %v529_v5 = vadd.f32 %v1173_v1, %v528_v3 }
  0xd1   : > { %v577_v6 = vadd.f32 %v1173_v1, %v576_v4 }
  0xd2   : > { %704 = vst.msk [vmem:[%s1180_s27 + $0x40] sm:$0xff] %vm294_vm0, %v529_v5 }
  0xd3   : > { %720 = vst.msk [vmem:[%s1180_s27 + $0xc0] sm:$0xff] %vm294_vm0, %v577_v6  ;;  %v624_v7 = vpop.f32.mrf.mxu2 }
  0xd4   : > { %v672_v8 = vpop.f32.mrf.mxu3  ;;  %v625_v9 = vadd.f32 %v1173_v1, %v624_v7 }
  0xd5   : > { %v673_v10 = vadd.f32 %v1173_v1, %v672_v8 }
  0xd6   : > { %736 = vst.msk [vmem:[%s1180_s27 + $0x140] sm:$0xff] %vm294_vm0, %v625_v9 }
  0xd7   : > { %v531_v11 = vpop.f32.mrf.mxu0  ;;  %752 = vst.msk [vmem:[%s1180_s27 + $0x1c0] sm:$0xff] %vm294_vm0, %v673_v10 }
  0xd8   : > { %v579_v12 = vpop.f32.mrf.mxu1  ;;  %v532_v13 = vadd.f32 %v1173_v1, %v531_v11 }
  0xd9   : > { %v580_v14 = vadd.f32 %v1173_v1, %v579_v12 }
  0xda   : > { %705 = vst.msk [vmem:[%s1180_s27 + $0x48] sm:$0xff] %vm294_vm0, %v532_v13 }
  0xdb   : > { %721 = vst.msk [vmem:[%s1180_s27 + $0xc8] sm:$0xff] %vm294_vm0, %v580_v14  ;;  %v627_v15 = vpop.f32.mrf.mxu2 }
  0xdc   : > { %v675_v16 = vpop.f32.mrf.mxu3  ;;  %v628_v17 = vadd.f32 %v1173_v1, %v627_v15 }
  0xdd   : > { %v676_v18 = vadd.f32 %v1173_v1, %v675_v16 }
  0xde   : > { %737 = vst.msk [vmem:[%s1180_s27 + $0x148] sm:$0xff] %vm294_vm0, %v628_v17 }
  0xdf   : > { %v534_v19 = vpop.f32.mrf.mxu0  ;;  %753 = vst.msk [vmem:[%s1180_s27 + $0x1c8] sm:$0xff] %vm294_vm0, %v676_v18 }
  0xe0   : > { %v582_v20 = vpop.f32.mrf.mxu1  ;;  %v535_v21 = vadd.f32 %v1173_v1, %v534_v19 }
  0xe1   : > { %v583_v22 = vadd.f32 %v1173_v1, %v582_v20 }
  0xe2   : > { %706 = vst.msk [vmem:[%s1180_s27 + $0x50] sm:$0xff] %vm294_vm0, %v535_v21 }
  0xe3   : > { %722 = vst.msk [vmem:[%s1180_s27 + $0xd0] sm:$0xff] %vm294_vm0, %v583_v22  ;;  %v630_v23 = vpop.f32.mrf.mxu2 }
  0xe4   : > { %v678_v24 = vpop.f32.mrf.mxu3  ;;  %v631_v25 = vadd.f32 %v1173_v1, %v630_v23 }
  0xe5   : > { %v679_v26 = vadd.f32 %v1173_v1, %v678_v24 }
  0xe6   : > { %738 = vst.msk [vmem:[%s1180_s27 + $0x150] sm:$0xff] %vm294_vm0, %v631_v25 }
  0xe7   : > { %v537_v27 = vpop.f32.mrf.mxu0  ;;  %754 = vst.msk [vmem:[%s1180_s27 + $0x1d0] sm:$0xff] %vm294_vm0, %v679_v26 }
  0xe8   : > { %v585_v28 = vpop.f32.mrf.mxu1  ;;  %v538_v29 = vadd.f32 %v1173_v1, %v537_v27 }
  0xe9   : > { %v586_v30 = vadd.f32 %v1173_v1, %v585_v28 }
  0xea   : > { %707 = vst.msk [vmem:[%s1180_s27 + $0x58] sm:$0xff] %vm294_vm0, %v538_v29 }
  0xeb   : > { %723 = vst.msk [vmem:[%s1180_s27 + $0xd8] sm:$0xff] %vm294_vm0, %v586_v30  ;;  %v633_v31 = vpop.f32.mrf.mxu2 }
  0xec   : > { %v681_v32 = vpop.f32.mrf.mxu3  ;;  %v634_v33 = vadd.f32 %v1173_v1, %v633_v31 }
  0xed   : > { %v682_v34 = vadd.f32 %v1173_v1, %v681_v32 }
  0xee   : > { %739 = vst.msk [vmem:[%s1180_s27 + $0x158] sm:$0xff] %vm294_vm0, %v634_v33 }
  0xef   : > { %v540_v35 = vpop.f32.mrf.mxu0  ;;  %755 = vst.msk [vmem:[%s1180_s27 + $0x1d8] sm:$0xff] %vm294_vm0, %v682_v34 }
  0xf0   : > { %v588_v36 = vpop.f32.mrf.mxu1  ;;  %v541_v37 = vadd.f32 %v1173_v1, %v540_v35 }
  0xf1   : > { %v589_v38 = vadd.f32 %v1173_v1, %v588_v36 }
  0xf2   : > { %708 = vst.msk [vmem:[%s1180_s27 + $0x60] sm:$0xff] %vm294_vm0, %v541_v37 }
  0xf3   : > { %724 = vst.msk [vmem:[%s1180_s27 + $0xe0] sm:$0xff] %vm294_vm0, %v589_v38  ;;  %v636_v39 = vpop.f32.mrf.mxu2 }
  0xf4   : > { %v684_v40 = vpop.f32.mrf.mxu3  ;;  %v637_v41 = vadd.f32 %v1173_v1, %v636_v39 }
  0xf5   : > { %v685_v42 = vadd.f32 %v1173_v1, %v684_v40 }
  0xf6   : > { %740 = vst.msk [vmem:[%s1180_s27 + $0x160] sm:$0xff] %vm294_vm0, %v637_v41 }
  0xf7   : > { %v543_v43 = vpop.f32.mrf.mxu0  ;;  %756 = vst.msk [vmem:[%s1180_s27 + $0x1e0] sm:$0xff] %vm294_vm0, %v685_v42 }
  0xf8   : > { %v591_v44 = vpop.f32.mrf.mxu1  ;;  %v544_v45 = vadd.f32 %v1173_v1, %v543_v43 }
  0xf9   : > { %v592_v46 = vadd.f32 %v1173_v1, %v591_v44 }
  0xfa   : > { %709 = vst.msk [vmem:[%s1180_s27 + $0x68] sm:$0xff] %vm294_vm0, %v544_v45 }
  0xfb   : > { %725 = vst.msk [vmem:[%s1180_s27 + $0xe8] sm:$0xff] %vm294_vm0, %v592_v46  ;;  %v639_v47 = vpop.f32.mrf.mxu2 }
  0xfc   : > { %v687_v48 = vpop.f32.mrf.mxu3  ;;  %v640_v49 = vadd.f32 %v1173_v1, %v639_v47 }
  0xfd   : > { %v688_v50 = vadd.f32 %v1173_v1, %v687_v48 }
  0xfe   : > { %741 = vst.msk [vmem:[%s1180_s27 + $0x168] sm:$0xff] %vm294_vm0, %v640_v49 }
  0xff   : > { %v546_v51 = vpop.f32.mrf.mxu0  ;;  %757 = vst.msk [vmem:[%s1180_s27 + $0x1e8] sm:$0xff] %vm294_vm0, %v688_v50 }
 0x100   : > { %v594_v52 = vpop.f32.mrf.mxu1  ;;  %v547_v53 = vadd.f32 %v1173_v1, %v546_v51 }
 0x101   : > { %v595_v54 = vadd.f32 %v1173_v1, %v594_v52 }
 0x102   : > { %710 = vst.msk [vmem:[%s1180_s27 + $0x70] sm:$0xff] %vm294_vm0, %v547_v53 }
 0x103   : > { %726 = vst.msk [vmem:[%s1180_s27 + $0xf0] sm:$0xff] %vm294_vm0, %v595_v54  ;;  %v642_v55 = vpop.f32.mrf.mxu2 }
 0x104   : > { %v690_v56 = vpop.f32.mrf.mxu3  ;;  %v643_v57 = vadd.f32 %v1173_v1, %v642_v55 }
 0x105   : > { %v691_v58 = vadd.f32 %v1173_v1, %v690_v56 }
 0x106   : > { %742 = vst.msk [vmem:[%s1180_s27 + $0x170] sm:$0xff] %vm294_vm0, %v643_v57 }
 0x107   : > { %v549_v59 = vpop.f32.mrf.mxu0  ;;  %758 = vst.msk [vmem:[%s1180_s27 + $0x1f0] sm:$0xff] %vm294_vm0, %v691_v58 }
 0x108   : > { %v597_v60 = vpop.f32.mrf.mxu1  ;;  %v550_v61 = vadd.f32 %v1173_v1, %v549_v59 }
 0x109   : > { %v598_v62 = vadd.f32 %v1173_v1, %v597_v60 }
 0x10a   : > { %711 = vst.msk [vmem:[%s1180_s27 + $0x78] sm:$0xff] %vm294_vm0, %v550_v61 }
 0x10b   : > { %727 = vst.msk [vmem:[%s1180_s27 + $0xf8] sm:$0xff] %vm294_vm0, %v598_v62  ;;  %v645_v63 = vpop.f32.mrf.mxu2 }
 0x10c   : > { %v693_v0 = vpop.f32.mrf.mxu3  ;;  %v646_v2 = vadd.f32 %v1173_v1, %v645_v63 }
 0x10d   : > { %v694_v3 = vadd.f32 %v1173_v1, %v693_v0 }
 0x10e   : > { %743 = vst.msk [vmem:[%s1180_s27 + $0x178] sm:$0xff] %vm294_vm0, %v646_v2 }
 0x10f   : > { %759 = vst.msk [vmem:[%s1180_s27 + $0x1f8] sm:$0xff] %vm294_vm0, %v694_v3 }
 0x110 PF: > { %s13_s14 = sadd.s32 1, %s989_s14   ;;  %s1387_s12 = smov %s985_s13 }
 0x111   : > { %p10_p5 = scmp.ge.s32.totalorder %s13_s14, 4   ;;  %s1388_s13 = smov %s1390_s15 }
 0x113   :  { %12 = sbr.rel (!%p10_p5) target bundleno = 2 (0x2), region = 68 }

// kernel: tile.33
= control target key start
LH: loop header
LB: loop body
LE: loop exit
PB: predicated region body
PF: predicated region fallthrough
CT: control target
= control target key end

     0   :  { %s22_s0 = inlined_call_operand.vmem [shape: f32[8], index: 0, kind: input, shape index: {}]   ;;  %s23_s1 = inlined_call_operand.vmem [shape: f32[2,8], index: 1, kind: output, shape index: {}]  }
   0x1   :  { %v4_v0 = vld [vmem:[%s22_s0] ss:$0 sm:$0xff] }
   0x2   :  { %5 = vst [vmem:[%s23_s1] sm:$0x3] %v4_v0 }

// kernel: tile.0
= control target key start
LH: loop header
LB: loop body
LE: loop exit
PB: predicated region body
PF: predicated region fallthrough
CT: control target
= control target key end

     0   :  { %s66_s8 = smov 125   ;;  %s67_s9 = smov 123   ;;  %vm7_vm0 = vcmask 7168   ;;  %s117_s0 = inlined_call_operand.vmem [shape: f32[2,8], index: 0, kind: input, shape index: {}]   ;;  %s118_s1 = inlined_call_operand.vmem [shape: f32[16,1], index: 1, kind: output, shape index: {}]  }
   0x1   :  { %v4_v0 = vld [vmem:[%s117_s0] sm:$0x3]  ;;  %s65_s0 = smov 127   ;;  %s68_s10 = smov 126  }
   0x2   :  { %5 = vst [vmem:[#allocation0] sm:$0x3] %v4_v0  ;;  %s69_s11 = smov 124   ;;  %s70_s12 = smov 122  }
   0x3   :  { %s71_s13 = smov 121  }
   0x9   :  { %v9_v1 = vld [vmem:[#allocation0] sm:$0x3]  }
   0xa   :  { %v21_v2 = vld [vmem:[#allocation0] sm:$0x3]   ;;  %10 = vrot.lane.b32.xlu0 %v9_v1, %s65_s0 }
   0xb   :  { %22 = vrot.lane.b32.xlu1 %v21_v2, %s66_s8  ;;  %v33_v3 = vld [vmem:[#allocation0] sm:$0x3]  }
   0xc   :  { %34 = vrot.lane.b32.xlu2 %v33_v3, %s67_s9  ;;  %v15_v4 = vld [vmem:[#allocation0] sm:$0x3]  }
   0xd   :  { %v27_v5 = vld [vmem:[#allocation0] sm:$0x3]  }
   0xe   :  { %v39_v6 = vld [vmem:[#allocation0] sm:$0x3]  }
   0xf   :  { %v45_v7 = vld [vmem:[#allocation0] sm:$0x3]  }
  0x10   :  { %v6_v8 = vld [vmem:[#allocation0] sm:$0x3]  }
  0x11   :  { %8 = vst.msk [vmem:[%s118_s1] ss:$8 sm:$0x3] %vm7_vm0, %v6_v8  }
  0x12   :  { %16 = vrot.lane.b32.xlu0 %v15_v4, %s68_s10 }
  0x13   :  { %28 = vrot.lane.b32.xlu1 %v27_v5, %s69_s11 }
  0x14   :  { %40 = vrot.lane.b32.xlu2 %v39_v6, %s70_s12 }
  0x1a   :  { %46 = vrot.lane.b32.xlu0 %v45_v7, %s71_s13 }
  0x66   :  { %v35_v9 = vpop.permute.xlu2 %34  }
  0x67   :  { %55 = vst.msk [vmem:[%s118_s1 + $0x5] ss:$8 sm:$0x3] %vm7_vm0, %v35_v9  }
  0x6e   :  { %v41_v10 = vpop.permute.xlu2 %40  }
  0x6f   :  { %56 = vst.msk [vmem:[%s118_s1 + $0x6] ss:$8 sm:$0x3] %vm7_vm0, %v41_v10  }
  0x7c   :  { %v11_v11 = vpop.permute.xlu0 %10  }
  0x7d   :  { %v23_v12 = vpop.permute.xlu1 %22   ;;  %51 = vst.msk [vmem:[%s118_s1 + $0x1] ss:$8 sm:$0x3] %vm7_vm0, %v11_v11  }
  0x7e   :  { %53 = vst.msk [vmem:[%s118_s1 + $0x3] ss:$8 sm:$0x3] %vm7_vm0, %v23_v12  }
  0x84   :  { %v17_v13 = vpop.permute.xlu0 %16  }
  0x85   :  { %v29_v14 = vpop.permute.xlu1 %28   ;;  %52 = vst.msk [vmem:[%s118_s1 + $0x2] ss:$8 sm:$0x3] %vm7_vm0, %v17_v13  }
  0x86   :  { %54 = vst.msk [vmem:[%s118_s1 + $0x4] ss:$8 sm:$0x3] %vm7_vm0, %v29_v14  }
  0x8c   :  { %v47_v15 = vpop.permute.xlu0 %46  }
  0x8d   :  { %57 = vst.msk [vmem:[%s118_s1 + $0x7] ss:$8 sm:$0x3] %vm7_vm0, %v47_v15  }

// kernel: basic_block_forward.13
= control target key start
LH: loop header
LB: loop body
LE: loop exit
PB: predicated region body
PF: predicated region fallthrough
CT: control target
= control target key end

     0   :  { %v186_v14 = vmov 512.0   ;;  %v187_v20 = vmov 0   ;;  %s289_s0 = inlined_call_operand.vmem [shape: f32[16,512], index: 0, kind: input, shape index: {}]   ;;  %s290_s2 = inlined_call_operand.vmem [shape: f32[16,1], index: 2, kind: input, shape index: {}]   ;;  %s291_s1 = inlined_call_operand.vmem [shape: f32[16,1], index: 1, kind: input, shape index: {}]   ;;  %s292_s3 = inlined_call_operand.vmem [shape: f32[16,512], index: 3, kind: output, shape index: {}]  }
   0x1   :  { %v14_v0 = vld [vmem:[%s289_s0] sm:$0xff]  ;;  %v15_v1 = vld [vmem:[%s289_s0 + $0x8] sm:$0xff]  ;;  %v16_v2 = vld [vmem:[%s289_s0 + $0x10] sm:$0xff]  ;;  %180 = vrcp.f32 %v186_v14  ;;  %178 = vset.pattern.permute.xlu0 %v187_v20  ;;  %179 = vset.pattern.permute.xlu1 %v187_v20 }
   0x2   :  { %v22_v3 = vadd.f32 %v15_v1, %v14_v0  ;;  %v18_v4 = vld [vmem:[%s289_s0 + $0x20] sm:$0xff]  ;;  %v19_v5 = vld [vmem:[%s289_s0 + $0x28] sm:$0xff]  ;;  %v17_v6 = vld [vmem:[%s289_s0 + $0x18] sm:$0xff]  ;;  %177 = vset.pattern.permute.xlu2 %v187_v20 }
   0x3   :  { %v27_v8 = vadd.f32 %v19_v5, %v18_v4  ;;  %v20_v9 = vld [vmem:[%s289_s0 + $0x30] sm:$0xff]  ;;  %v21_v12 = vld [vmem:[%s289_s0 + $0x38] sm:$0xff]  ;;  %v119_v18 = vld [vmem:[%s290_s2] sm:$0xff] }
   0x4   :  { %v23_v7 = vadd.f32 %v22_v3, %v16_v2  ;;  %v99_v44 = vld [vmem:[%s291_s1] sm:$0xff]  ;;  %v100_v50 = vld [vmem:[%s291_s1 + $0x8] sm:$0xff] }
   0x5   :  { %v28_v11 = vadd.f32 %v27_v8, %v20_v9  ;;  %103 = vperm.xlu2 %177, %v99_v44   ;;  %v120_v51 = vld [vmem:[%s290_s2 + $0x8] sm:$0xff] }
   0x6   :  { %v24_v10 = vadd.f32 %v23_v7, %v17_v6 }
   0x7   :  { %v29_v13 = vadd.f32 %v28_v11, %v21_v12  ;;  %v181_v15 = vpop.eup %180 }
   0x8   :  { %25 = vadd.xlane.f32.xlu0 %v24_v10  ;;  %v33_v16 = vmul.f32 512.0, %v181_v15  ;;  %vm37_vm0 = vweird.f32 %v181_v15 }
   0xa   :  { %v34_v17 = vsub.f32 1.0, %v33_v16 }
   0xc   :  { %v35_v19 = vmul.f32 %v181_v15, %v34_v17 }
   0xd   :  { %108 = vperm.xlu2 %177, %v100_v50  }
   0xe   :  { %v36_v21 = vadd.f32 %v181_v15, %v35_v19 }
  0x10   :  { %30 = vadd.xlane.f32.xlu0 %v29_v13  ;;  %v38_v22 = vsel %vm37_vm0, %v181_v15, %v36_v21 }
  0x24   :  { %123 = vperm.xlu0 %178, %v119_v18  }
  0x7b   :  { %v26_v23 = vpop.xlane.xlu0 %25 }
  0x7c   :  { %v39_v24 = vmul.f32 %v38_v22, %v26_v23 }
  0x7e   :  { %v41_v25 = vsub.f32 %v14_v0, %v39_v24  ;;  %v42_v26 = vsub.f32 %v15_v1, %v39_v24  ;;  %v43_v27 = vsub.f32 %v16_v2, %v39_v24  ;;  %v44_v28 = vsub.f32 %v17_v6, %v39_v24 }
  0x80   :  { %v49_v29 = vmul.f32 %v41_v25, %v41_v25  ;;  %v50_v30 = vmul.f32 %v42_v26, %v42_v26  ;;  %v51_v31 = vmul.f32 %v43_v27, %v43_v27  ;;  %v52_v35 = vmul.f32 %v44_v28, %v44_v28 }
  0x82   :  { %v57_v32 = vadd.f32 %v50_v30, %v49_v29 }
  0x83   :  { %v31_v33 = vpop.xlane.xlu0 %30 }
  0x84   :  { %v40_v34 = vmul.f32 %v38_v22, %v31_v33  ;;  %v58_v36 = vadd.f32 %v57_v32, %v51_v31 }
  0x86   :  { %v235_v37 = vsub.f32 %v18_v4, %v40_v34  ;;  %v237_v38 = vsub.f32 %v19_v5, %v40_v34  ;;  %v59_v39 = vadd.f32 %v58_v36, %v52_v35  ;;  %v239_v40 = vsub.f32 %v20_v9, %v40_v34  ;;  %v104_v4 = vpop.permute.xlu2 %103 }
  0x87   :  { %v241_v41 = vsub.f32 %v21_v12, %v40_v34 }
  0x88   :  { %60 = vadd.xlane.f32.xlu1 %v59_v39  ;;  %v53_v42 = vmul.f32 %v235_v37, %v235_v37  ;;  %v54_v43 = vmul.f32 %v237_v38, %v237_v38  ;;  %v55_v45 = vmul.f32 %v239_v40, %v239_v40 }
  0x89   :  { %v56_v47 = vmul.f32 %v241_v41, %v241_v41 }
  0x8a   :  { %v62_v46 = vadd.f32 %v54_v43, %v53_v42 }
  0x8c   :  { %v63_v48 = vadd.f32 %v62_v46, %v55_v45 }
  0x8e   :  { %v64_v49 = vadd.f32 %v63_v48, %v56_v47  ;;  %v109_v29 = vpop.permute.xlu2 %108 }
  0x90   :  { %65 = vadd.xlane.f32.xlu1 %v64_v49 }
  0x96   :  { %v124_v10 = vpop.permute.xlu0 %123 }
  0xa9   :  { %128 = vperm.xlu1 %179, %v120_v51  }
  0xfb   :  { %v61_v52 = vpop.xlane.xlu1 %60 }
  0xfc   :  { %v67_v53 = vmul.f32 %v61_v52, %v38_v22 }
  0xfe   :  { %v69_v54 = vadd.f32 1e-05, %v67_v53 }
 0x100   :  { %182 = vrsqrt.f32 %v69_v54  ;;  %vm77_vm2 = vweird.f32 %v69_v54 }
 0x103   :  { %v66_v55 = vpop.xlane.xlu1 %65 }
 0x104   :  { %v68_v56 = vmul.f32 %v66_v55, %v38_v22 }
 0x106   :  { %v183_v57 = vpop.eup %182  ;;  %v70_v58 = vadd.f32 1e-05, %v68_v56 }
 0x107   :  { %v72_v59 = vmul.f32 %v183_v57, %v69_v54  ;;  %vm78_vm1 = vweird.f32 %v183_v57 }
 0x108   :  { %184 = vrsqrt.f32 %v70_v58  ;;  %vm79_vm3 = vmor %vm77_vm2, %vm78_vm1  ;;  %vm87_vm5 = vweird.f32 %v70_v58 }
 0x109   :  { %v73_v60 = vmul.f32 %v183_v57, %v72_v59 }
 0x10b   :  { %v74_v61 = vmul.f32 0.5, %v73_v60 }
 0x10d   :  { %v75_v62 = vsub.f32 1.5, %v74_v61 }
 0x10e   :  { %v185_v63 = vpop.eup %184 }
 0x10f   :  { %v76_v0 = vmul.f32 %v183_v57, %v75_v62  ;;  %v82_v1 = vmul.f32 %v185_v63, %v70_v58  ;;  %vm88_vm4 = vweird.f32 %v185_v63 }
 0x110   :  { %vm89_vm6 = vmor %vm87_vm5, %vm88_vm4 }
 0x111   :  { %v80_v2 = vsel %vm79_vm3, %v183_v57, %v76_v0  ;;  %v83_v3 = vmul.f32 %v185_v63, %v82_v1 }
 0x112   :  { %v91_v5 = vmul.f32 %v80_v2, %v41_v25  ;;  %v92_v6 = vmul.f32 %v80_v2, %v42_v26  ;;  %v93_v7 = vmul.f32 %v80_v2, %v43_v27  ;;  %v94_v8 = vmul.f32 %v80_v2, %v44_v28 }
 0x113   :  { %v84_v9 = vmul.f32 0.5, %v83_v3 }
 0x114   :  { %v111_v11 = vmul.f32 %v104_v4, %v91_v5  ;;  %v112_v12 = vmul.f32 %v104_v4, %v92_v6  ;;  %v113_v13 = vmul.f32 %v104_v4, %v93_v7  ;;  %v114_v14 = vmul.f32 %v104_v4, %v94_v8 }
 0x115   :  { %v85_v15 = vsub.f32 1.5, %v84_v9 }
 0x116   :  { %v131_v16 = vadd.f32 %v124_v10, %v111_v11  ;;  %v132_v17 = vadd.f32 %v124_v10, %v112_v12  ;;  %v133_v18 = vadd.f32 %v124_v10, %v113_v13  ;;  %v134_v19 = vadd.f32 %v124_v10, %v114_v14 }
 0x117   :  { %v86_v20 = vmul.f32 %v185_v63, %v85_v15 }
 0x118   :  { %vm139_vm7 = vcmp.ge.f32.partialorder %v131_v16, 0.0  ;;  %vm140_vm8 = vcmp.ge.f32.partialorder %v132_v17, 0.0  ;;  %vm141_vm9 = vcmp.ge.f32.partialorder %v133_v18, 0.0  ;;  %vm142_vm10 = vcmp.ge.f32.partialorder %v134_v19, 0.0 }
 0x119   :  { %v90_v21 = vsel %vm89_vm6, %v185_v63, %v86_v20  ;;  %v147_v22 = vmul.f32 0.01, %v131_v16  ;;  %v148_v23 = vmul.f32 0.01, %v132_v17  ;;  %v149_v24 = vmul.f32 0.01, %v133_v18 }
 0x11a   :  { %v95_v25 = vmul.f32 %v90_v21, %v235_v37  ;;  %v96_v26 = vmul.f32 %v90_v21, %v237_v38  ;;  %v97_v27 = vmul.f32 %v90_v21, %v239_v40  ;;  %v98_v28 = vmul.f32 %v90_v21, %v241_v41 }
 0x11b   :  { %v150_v30 = vmul.f32 0.01, %v134_v19  ;;  %v155_v31 = vsel %vm139_vm7, %v131_v16, %v147_v22  ;;  %v156_v32 = vsel %vm140_vm8, %v132_v17, %v148_v23  ;;  %v157_v33 = vsel %vm141_vm9, %v133_v18, %v149_v24  ;;  %v129_v34 = vpop.permute.xlu1 %128 }
 0x11c   :  { %v115_v35 = vmul.f32 %v109_v29, %v95_v25  ;;  %v116_v36 = vmul.f32 %v109_v29, %v96_v26  ;;  %v117_v39 = vmul.f32 %v109_v29, %v97_v27  ;;  %v118_v42 = vmul.f32 %v109_v29, %v98_v28  ;;  %163 = vst [vmem:[%s292_s3] sm:$0xff] %v155_v31 }
 0x11d   :  { %v158_v37 = vsel %vm142_vm10, %v134_v19, %v150_v30  ;;  %164 = vst [vmem:[%s292_s3 + $0x8] sm:$0xff] %v156_v32 }
 0x11e   :  { %165 = vst [vmem:[%s292_s3 + $0x10] sm:$0xff] %v157_v33  ;;  %v135_v38 = vadd.f32 %v129_v34, %v115_v35  ;;  %v136_v40 = vadd.f32 %v129_v34, %v116_v36  ;;  %v137_v41 = vadd.f32 %v129_v34, %v117_v39  ;;  %v138_v43 = vadd.f32 %v129_v34, %v118_v42 }
 0x11f   :  { %166 = vst [vmem:[%s292_s3 + $0x18] sm:$0xff] %v158_v37 }
 0x120   :  { %vm143_vm11 = vcmp.ge.f32.partialorder %v135_v38, 0.0  ;;  %vm144_vm12 = vcmp.ge.f32.partialorder %v136_v40, 0.0  ;;  %vm145_vm13 = vcmp.ge.f32.partialorder %v137_v41, 0.0  ;;  %vm146_vm14 = vcmp.ge.f32.partialorder %v138_v43, 0.0 }
 0x121   :  { %v151_v44 = vmul.f32 0.01, %v135_v38  ;;  %v152_v45 = vmul.f32 0.01, %v136_v40  ;;  %v153_v46 = vmul.f32 0.01, %v137_v41 }
 0x122   :  { %v154_v47 = vmul.f32 0.01, %v138_v43 }
 0x123   :  { %v159_v48 = vsel %vm143_vm11, %v135_v38, %v151_v44  ;;  %v160_v49 = vsel %vm144_vm12, %v136_v40, %v152_v45  ;;  %v161_v50 = vsel %vm145_vm13, %v137_v41, %v153_v46 }
 0x124   :  { %v162_v51 = vsel %vm146_vm14, %v138_v43, %v154_v47  ;;  %167 = vst [vmem:[%s292_s3 + $0x20] sm:$0xff] %v159_v48 }
 0x125   :  { %168 = vst [vmem:[%s292_s3 + $0x28] sm:$0xff] %v160_v49 }
 0x126   :  { %169 = vst [vmem:[%s292_s3 + $0x30] sm:$0xff] %v161_v50 }
 0x127   :  { %170 = vst [vmem:[%s292_s3 + $0x38] sm:$0xff] %v162_v51 }

// kernel: basic_block_forward.14
= control target key start
LH: loop header
LB: loop body
LE: loop exit
PB: predicated region body
PF: predicated region fallthrough
CT: control target
= control target key end

     0   :  { %s1037_s12 = smov 0   ;;  %s1039_s13 = smov 0   ;;  %s1511_s0 = inlined_call_operand.vmem [shape: f32[2,10,10,10,8], index: 0, kind: input, shape index: {}]   ;;  %s1512_s1 = inlined_call_operand.vmem [shape: f32[3,72,4], index: 1, kind: input, shape index: {}]   ;;  %s1513_s2 = inlined_call_operand.vmem [shape: f32[1,4], index: 2, kind: input, shape index: {}]   ;;  %s1514_s3 = inlined_call_operand.vmem [shape: f32[2,8,8,8,4], index: 3, kind: output, shape index: {}]  }
   0x1   :  { %s1041_s14 = smov 0   ;;  %s1043_s15 = smov 0  }
   0x2   :  { %s1045_s16 = smov 0   ;;  %s1047_s17 = smov 0  }
   0x3   :  { %s1049_s18 = smov 0  }
   0x4 LB: > { %s25_s19 = sadd.s32 1, %s995_s15  ;;  %s28_s20 = sadd.s32 1, %s999_s16  ;;  %s1007_s18 = sphi %s1049_s18, %s13_s18   ;;  %s1003_s17 = sphi %s1047_s17, %s1520_s17   ;;  %s999_s16 = sphi %s1045_s16, %s1519_s16   ;;  %s995_s15 = sphi %s1043_s15, %s1518_s15   ;;  %s991_s14 = sphi %s1041_s14, %s1517_s14   ;;  %s987_s13 = sphi %s1039_s13, %s1516_s13   ;;  %s983_s12 = sphi %s1037_s12, %s1515_s12  }
   0x5   : > { %p26_p0 = scmp.ge.s32.totalorder %s25_s19, 3  ;;  %p841_p1 = scmp.ge.s32.totalorder %s1007_s18, 1 }
   0x6   : > { %p178_p2 = scmp.lt.s32.totalorder %s1007_s18, 49  ;;  %s32_s21 = sadd.s32 1, %s1003_s17 }
   0x7   : > { %s1522_s19 = smov (%p26_p0, %s25_s19), 0  ;;  %s1524_s20 = smov (!%p26_p0, %s28_s20), %s999_s16 }
   0x8   : > { %p179_p3 = pnand %p841_p1, %p178_p2  ;;  %p30_p4 = scmp.ge.s32.totalorder %s1524_s20, 8 }
   0x9   : > { %s216_s22 = sadd.s32 (!%p179_p3), %s983_s12, %s987_s13  ;;  %p217_p6 = scmp.lt.s32.totalorder (!%p179_p3), %s991_s14, 1 }
   0xa   : > { %s1526_s20 = smov (%p30_p4, %s1524_s20), 0  ;;  %s1528_s21 = smov (!%p30_p4, %s32_s21), %s1003_s17 }
   0xb   : > { %p34_p5 = scmp.ge.s32.totalorder %s1528_s21, 2  ;;  %182 = sbr.rel (%p179_p3) target bundleno = 459 (0x1cb), region = 32 }
   0xc   : > { %p219_p7 = scmp.lt.s32.totalorder (!%p179_p3), %s216_s22, 9  ;;  %p234_p8 = scmp.lt.s32.totalorder (!%p179_p3), %s987_s13, 7 }
   0xd   : > { %s1530_s21 = smov (%p34_p5, %s1528_s21), 0  ;;  %s1009_s10 = smov (!%p179_p3), 16  }
   0xe   : > { %s1010_s11 = smov (!%p179_p3), 8   ;;  %p227_p9 = scmp.lt.s32.totalorder (!%p179_p3), %s983_s12, 2 }
   0xf   : > { %p855_p10 = scmp.ne.s32.totalorder (!%p179_p3), %s983_s12, 0 }
  0x10   : > { %s1532_s14 = smov (!%p217_p6, %s991_s14), 1  ;;  %s1534_s22 = smov (!%p219_p7, %s216_s22), 9  ;;  %vm302_vm0 = vcmask 1045504   ;;  %vm277_vm1 = vcmask 1046528   ;;  %vm535_vm2 = vcmask 64512   ;;  %vm544_vm3 = vcmask 130048  }
  0x11   : > { %s886_s23 = smul.u32 200, %s1532_s14  ;;  %s845_s25 = sshll.u32 %s1532_s14, 6  ;;  %vm553_vm4 = vcmask 195584   ;;  %vm562_vm5 = vcmask 261120   ;;  %vm571_vm6 = vcmask 326656   ;;  %vm580_vm7 = vcmask 392192  }
  0x12   : > { %s885_s24 = smul.u32 20, %s1534_s22  ;;  %s1536_s13 = smov (!%p234_p8, %s987_s13), 7  ;;  %vm589_vm8 = vcmask 457728   ;;  %vm598_vm9 = vcmask 523264   ;;  %vm616_vm10 = vcmask 588800  }
  0x13   : > { %s844_s28 = sshll.u32 %s1536_s13, 3  ;;  %s1011_s13 = smov 32  }
  0x14   : > { %s223_s26 = sadd.s32 %s886_s23, %s885_s24  ;;  %s238_s5 = sadd.s32 %s845_s25, %s844_s28 }
  0x15   : > { %s842_s27 = sshll.u32 %s223_s26, 3  ;;  %s846_s6 = sshll.u32 %s238_s5, 3 }
  0x16   : > { %s1090_s4 = scalar_lea.vmem %s1511_s0, %s842_s27  ;;  %s1102_s9 = scalar_lea.vmem %s1514_s3, %s846_s6 }
  0x17   : > { %v1093_v0 = vld [vmem:[%s1090_s4 + $0x40] sm:$0xff]  ;;  %v250_v1 = vld [vmem:[%s1090_s4 + $0x48] sm:$0x3]  ;;  %v1122_v14 = vld [vmem:[%s1090_s4 + $0x10] sm:$0xff]  ;;  %s1012_s14 = smov 24   ;;  %s1013_s22 = smov 40  }
  0x18   : > { %v1097_v2 = vld [vmem:[%s1090_s4] sm:$0xff]  ;;  %v315_v3 = vrot.slane %v1093_v0, 2  ;;  %v316_v4 = vrot.slane %v250_v1, 2  ;;  %v290_v5 = vrot.slane %v1093_v0, 1  ;;  %v291_v6 = vrot.slane %v250_v1, 1  ;;  %v1147_v26 = vld [vmem:[%s1090_s4 + $0x50] sm:$0xff] }
  0x19   : > { %v1107_v7 = vld [vmem:[%s1090_s4 + $0x8] sm:$0x3]  ;;  %v278_v8 = vrot.slane %v1097_v2, 1  ;;  %v1112_v10 = vld [vmem:[%s1090_s4 + $0x60] sm:$0xff]  ;;  %v1125_v15 = vld [vmem:[%s1090_s4 + $0x18] sm:$0x3] }
  0x1a   : > { %v279_v9 = vrot.slane %v1107_v7, 1  ;;  %v254_v11 = vld [vmem:[%s1090_s4 + $0x68] sm:$0x3]  ;;  %v1116_v12 = vsel %vm302_vm0, %v315_v3, %v316_v4  ;;  %v1119_v13 = vsel %vm277_vm1, %v290_v5, %v291_v6  ;;  %v321_v17 = vrot.slane %v1112_v10, 2  ;;  %v252_v27 = vld [vmem:[%s1090_s4 + $0x58] sm:$0x3] }
  0x1b   : > { %375 = vrot.lane.b32.xlu2 %v1116_v12, %s1009_s10  ;;  %351 = vrot.lane.b32.xlu1 %v1119_v13, %s1010_s11  ;;  %v322_v18 = vrot.slane %v254_v11, 2  ;;  %v296_v19 = vrot.slane %v1112_v10, 1  ;;  %v297_v20 = vrot.slane %v254_v11, 1  ;;  %v281_v21 = vrot.slane %v1122_v14, 1  ;;  %v1161_v31 = vld [vmem:[%s1090_s4 + $0x70] sm:$0xff]  ;;  %v1183_v42 = vld [vmem:[%s1090_s4 + $0x20] sm:$0xff] }
  0x1c   : > { %v280_v16 = vsel %vm277_vm1, %v278_v8, %v279_v9  ;;  %v282_v22 = vrot.slane %v1125_v15, 1  ;;  %v293_v28 = vrot.slane %v1147_v26, 1  ;;  %v294_v29 = vrot.slane %v252_v27, 1  ;;  %v256_v32 = vld [vmem:[%s1090_s4 + $0x78] sm:$0x3]  ;;  %v257_v46 = vld [vmem:[%s1090_s4 + $0x80] sm:$0xff] }
  0x1d   : > { %343 = vrot.lane.b32.xlu0 %v280_v16, %s1010_s11  ;;  %v1138_v23 = vsel %vm302_vm0, %v321_v17, %v322_v18  ;;  %v1141_v24 = vsel %vm277_vm1, %v296_v19, %v297_v20  ;;  %v324_v33 = vrot.slane %v1161_v31, 2  ;;  %v325_v34 = vrot.slane %v256_v32, 2  ;;  %v246_v43 = vld [vmem:[%s1090_s4 + $0x28] sm:$0x3]  ;;  %s1014_s23 = smov 48   ;;  %s1015_s24 = smov 56  }
  0x1e   : > { %v1144_v25 = vsel %vm277_vm1, %v281_v21, %v282_v22  ;;  %v1158_v30 = vsel %vm277_vm1, %v293_v28, %v294_v29  ;;  %v318_v35 = vrot.slane %v1147_v26, 2  ;;  %v319_v36 = vrot.slane %v252_v27, 2  ;;  %v258_v48 = vld [vmem:[%s1090_s4 + $0x88] sm:$0x3]  ;;  %s1016_s25 = smov 64   ;;  %v1228_v61 = vld [vmem:[%s1090_s4 + $0x30] sm:$0xff] }
  0x1f   : > { %v299_v37 = vrot.slane %v1161_v31, 1  ;;  %v300_v38 = vrot.slane %v256_v32, 1  ;;  %v1174_v39 = vsel %vm302_vm0, %v324_v33, %v325_v34  ;;  %v284_v44 = vrot.slane %v1183_v42, 1  ;;  %v248_v62 = vld [vmem:[%s1090_s4 + $0x38] sm:$0x3]  ;;  %s228_s26 = scalar_select %p227_p9, %s983_s12, 2 }
  0x20   : > { %v1177_v40 = vsel %vm302_vm0, %v318_v35, %v319_v36  ;;  %v285_v45 = vrot.slane %v246_v43, 1  ;;  %v329_v49 = vrot.slane %v257_v46, 1  ;;  %v330_v50 = vrot.slane %v258_v48, 1  ;;  %v1293_v19 = vld [vmem:[%s1090_s4 + $0x90] sm:$0xff]  ;;  %v1296_v20 = vld [vmem:[%s1090_s4 + $0x98] sm:$0x3] }
  0x21   : > { %v1180_v41 = vsel %vm277_vm1, %v299_v37, %v300_v38  ;;  %v303_v51 = vrot.slane %v1097_v2, 2  ;;  %v304_v52 = vrot.slane %v1107_v7, 2  ;;  %v332_v55 = vrot.slane %v257_v46, 2  ;;  %s887_s27 = smul.u32 72, %s228_s26 }
  0x22   : > { %v1195_v47 = vsel %vm277_vm1, %v284_v44, %v285_v45  ;;  %v331_v53 = vsel %vm277_vm1, %v329_v49, %v330_v50  ;;  %v333_v56 = vrot.slane %v258_v48, 2  ;;  %v309_v57 = vrot.slane %v1183_v42, 2 }
  0x23   : > { %379 = vrot.lane.b32.xlu2 %v1138_v23, %s1009_s10  ;;  %355 = vrot.lane.b32.xlu1 %v1141_v24, %s1010_s11  ;;  %v305_v54 = vsel %vm302_vm0, %v303_v51, %v304_v52  ;;  %v310_v58 = vrot.slane %v246_v43, 2  ;;  %v287_v63 = vrot.slane %v1228_v61, 1  ;;  %v288_v1 = vrot.slane %v248_v62, 1  ;;  %s1286_s30 = scalar_lea.vmem %s1512_s1, %s887_s27 }
  0x24   : > { %v334_v59 = vsel %vm302_vm0, %v332_v55, %v333_v56  ;;  %v306_v4 = vrot.slane %v1122_v14, 2  ;;  %v307_v5 = vrot.slane %v1125_v15, 2  ;;  %v312_v6 = vrot.slane %v1228_v61, 2  ;;  %v615_v17 = vld [vmem:[%s1286_s30 + $0x40] sm:$0xff]  ;;  %v614_v18 = vld [vmem:[%s1286_s30 + $0x38] sm:$0xff]  ;;  %v613_v21 = vld [vmem:[%s1286_s30 + $0x30] sm:$0xff] }
  0x25   : > { %345 = vrot.lane.b32.xlu0 %v1144_v25, %s1010_s11  ;;  %v1214_v60 = vsel %vm302_vm0, %v309_v57, %v310_v58  ;;  %v1239_v3 = vsel %vm277_vm1, %v287_v63, %v288_v1  ;;  %v313_v7 = vrot.slane %v248_v62, 2  ;;  %860 = vmatpush.msra.mxu3 %v615_v17  ;;  %v337_v22 = vrot.slane %v1293_v19, 1  ;;  %v611_v29 = vld [vmem:[%s1286_s30 + $0x20] sm:$0xff]  ;;  %v610_v32 = vld [vmem:[%s1286_s30 + $0x18] sm:$0xff]  ;;  %v609_v34 = vld [vmem:[%s1286_s30 + $0x10] sm:$0xff] }
  0x26   : > { %v1251_v8 = vsel %vm302_vm0, %v306_v4, %v307_v5  ;;  %859 = vmatpush.msra.mxu2 %v615_v17  ;;  %858 = vmatpush.msra.mxu1 %v615_v17  ;;  %v608_v35 = vld [vmem:[%s1286_s30 + $0x8] sm:$0xff]  ;;  %v607_v43 = vld [vmem:[%s1286_s30] sm:$0xff]  ;;  %v341_v48 = vrot.slane %v1296_v20, 2 }
  0x27   : > { %v1254_v9 = vsel %vm302_vm0, %v312_v6, %v313_v7  ;;  %648 = vmatpush.msra.mxu0 %v615_v17  ;;  %863 = vmatpush.msra.mxu3 %v614_v18 }
  0x28   : > { %862 = vmatpush.msra.mxu2 %v614_v18  ;;  %861 = vmatpush.msra.mxu1 %v614_v18 }
  0x29   : > { %866 = vmatpush.msra.mxu3 %v613_v21  ;;  %649 = vmatpush.msra.mxu0 %v614_v18 }
  0x2a   : > { %865 = vmatpush.msra.mxu2 %v613_v21  ;;  %864 = vmatpush.msra.mxu1 %v613_v21 }
  0x2b   : > { %423 = vrot.lane.b32.xlu2 %v1158_v30, %s1011_s13  ;;  %403 = vrot.lane.b32.xlu1 %v1161_v31, %s1012_s14 }
  0x2c   : > { %650 = vmatpush.msra.mxu0 %v613_v21 }
  0x2d   : > { %399 = vrot.lane.b32.xlu0 %v1147_v26, %s1012_s14 }
  0x33   : > { %451 = vrot.lane.b32.xlu2 %v1174_v39, %s1013_s22  ;;  %447 = vrot.lane.b32.xlu1 %v1177_v40, %s1013_s22 }
  0x35   : > { %427 = vrot.lane.b32.xlu0 %v1180_v41, %s1011_s13 }
  0x3b   : > { %475 = vrot.lane.b32.xlu1 %v257_v46, %s1014_s23  ;;  %347 = vrot.lane.b32.xlu2 %v1195_v47, %s1010_s11 }
  0x3d   : > { %471 = vrot.lane.b32.xlu0 %v1112_v10, %s1014_s23 }
  0x43   : > { %499 = vrot.lane.b32.xlu1 %v331_v53, %s1015_s24  ;;  %367 = vrot.lane.b32.xlu2 %v305_v54, %s1009_s10 }
  0x45   : > { %495 = vrot.lane.b32.xlu0 %v1141_v24, %s1015_s24 }
  0x4b   : > { %519 = vrot.lane.b32.xlu1 %v1138_v23, %s1016_s25  ;;  %523 = vrot.lane.b32.xlu2 %v334_v59, %s1016_s25 }
  0x4d   : > { %371 = vrot.lane.b32.xlu0 %v1214_v60, %s1009_s10 }
  0x53   : > { %357 = vrot.lane.b32.xlu1 %v1180_v41, %s1010_s11  ;;  %391 = vrot.lane.b32.xlu2 %v1122_v14, %s1012_s14 }
  0x55   : > { %353 = vrot.lane.b32.xlu0 %v1158_v30, %s1010_s11 }
  0x5b   : > { %377 = vrot.lane.b32.xlu1 %v1177_v40, %s1009_s10  ;;  %381 = vrot.lane.b32.xlu2 %v1174_v39, %s1009_s10 }
  0x5d   : > { %395 = vrot.lane.b32.xlu0 %v1228_v61, %s1012_s14 }
  0x63   : > { %419 = vrot.lane.b32.xlu1 %v1239_v3, %s1011_s13  ;;  %401 = vrot.lane.b32.xlu2 %v1112_v10, %s1012_s14 }
  0x65   : > { %415 = vrot.lane.b32.xlu0 %v1144_v25, %s1011_s13 }
  0x6b   : > { %439 = vrot.lane.b32.xlu1 %v1251_v8, %s1013_s22  ;;  %443 = vrot.lane.b32.xlu2 %v1254_v9, %s1013_s22 }
  0x6d   : > { %405 = vrot.lane.b32.xlu0 %v257_v46, %s1012_s14 }
  0x73   : > { %429 = vrot.lane.b32.xlu1 %v331_v53, %s1011_s13  ;;  %463 = vrot.lane.b32.xlu2 %v1183_v42, %s1014_s23 }
  0x75   : > { %425 = vrot.lane.b32.xlu0 %v1141_v24, %s1011_s13  ;;  %v1266_v11 = vpop.permute.xlu2 %375  ;;  %v612_v24 = vld [vmem:[%s1286_s30 + $0x28] sm:$0xff] }
  0x76   : > { %869 = vmatpush.msra.mxu3 %v612_v24  ;;  %868 = vmatpush.msra.mxu2 %v612_v24 }
  0x77   : > { %867 = vmatpush.msra.mxu1 %v612_v24  ;;  %651 = vmatpush.msra.mxu0 %v612_v24 }
  0x78   : > { %872 = vmatpush.msra.mxu3 %v611_v29  ;;  %871 = vmatpush.msra.mxu2 %v611_v29 }
  0x79   : > { %870 = vmatpush.msra.mxu1 %v611_v29  ;;  %652 = vmatpush.msra.mxu0 %v611_v29 }
  0x7a   : > { %875 = vmatpush.msra.mxu3 %v610_v32  ;;  %874 = vmatpush.msra.mxu2 %v610_v32 }
  0x7b   : > { %449 = vrot.lane.b32.xlu1 %v1138_v23, %s1013_s22  ;;  %453 = vrot.lane.b32.xlu2 %v334_v59, %s1013_s22  ;;  %v338_v23 = vrot.slane %v1296_v20, 1 }
  0x7c   : > { %878 = vmatpush.msra.mxu3 %v609_v34  ;;  %877 = vmatpush.msra.mxu2 %v609_v34 }
  0x7d   : > { %467 = vrot.lane.b32.xlu0 %v1093_v0, %s1014_s23  ;;  %v1275_v15 = vpop.permute.xlu2 %379  ;;  %v339_v33 = vsel %vm277_vm1, %v337_v22, %v338_v23  ;;  %873 = vmatpush.msra.mxu1 %v610_v32 }
  0x7e   : > { %881 = vmatpush.msra.mxu3 %v608_v35  ;;  %653 = vmatpush.msra.mxu0 %v610_v32 }
  0x7f   : > { %880 = vmatpush.msra.mxu2 %v608_v35  ;;  %876 = vmatpush.msra.mxu1 %v609_v34 }
  0x80   : > { %884 = vmatpush.msra.mxu3 %v607_v43  ;;  %654 = vmatpush.msra.mxu0 %v609_v34 }
  0x81   : > { %883 = vmatpush.msra.mxu2 %v607_v43  ;;  %879 = vmatpush.msra.mxu1 %v608_v35 }
  0x82   : > { %655 = vmatpush.msra.mxu0 %v608_v35 }
  0x83   : > { %491 = vrot.lane.b32.xlu1 %v1119_v13, %s1015_s24  ;;  %473 = vrot.lane.b32.xlu2 %v1161_v31, %s1014_s23 }
  0x84   : > { %882 = vmatpush.msra.mxu1 %v607_v43  ;;  %656 = vmatpush.msra.mxu0 %v607_v43 }
  0x85   : > { %487 = vrot.lane.b32.xlu0 %v1195_v47, %s1015_s24  ;;  %v1288_v16 = vpop.permute.xlu2 %423 }
  0x8b   : > { %511 = vrot.lane.b32.xlu1 %v1214_v60, %s1016_s25  ;;  %515 = vrot.lane.b32.xlu2 %v1116_v12, %s1016_s25 }
  0x8d   : > { %477 = vrot.lane.b32.xlu0 %v1293_v19, %s1014_s23  ;;  %v1308_v25 = vpop.permute.xlu2 %451  ;;  %v1310_v27 = vpop.permute.xlu1 %351 }
  0x8f   : > { %v344_v28 = vpop.permute.xlu0 %343 }
  0x90   : > { %v536_v44 = vsel %vm535_vm2, %v1097_v2, %v344_v28 }
  0x93   : > { %497 = vrot.lane.b32.xlu1 %v1180_v41, %s1015_s24  ;;  %501 = vrot.lane.b32.xlu2 %v339_v33, %s1015_s24  ;;  %v340_v41 = vrot.slane %v1293_v19, 2 }
  0x95   : > { %349 = vrot.lane.b32.xlu0 %v1239_v3, %s1010_s11  ;;  %v356_v36 = vpop.permute.xlu1 %355  ;;  %v1322_v37 = vpop.permute.xlu2 %347  ;;  %v342_v50 = vsel %vm302_vm0, %v340_v41, %v341_v48 }
  0x96   : > { %v542_v53 = vsel %vm535_vm2, %v1112_v10, %v356_v36 }
  0x97   : > { %v1324_v38 = vpop.permute.xlu0 %345  ;;  %v551_v54 = vsel %vm544_vm3, %v542_v53, %v1275_v15 }
  0x9b   : > { %373 = vrot.lane.b32.xlu1 %v1254_v9, %s1009_s10  ;;  %521 = vrot.lane.b32.xlu2 %v1174_v39, %s1016_s25 }
  0x9d   : > { %369 = vrot.lane.b32.xlu0 %v1251_v8, %s1009_s10  ;;  %v404_v45 = vpop.permute.xlu1 %403  ;;  %v368_v46 = vpop.permute.xlu2 %367 }
  0x9e   : > { %v1338_v49 = vsel %vm544_vm3, %v536_v44, %v368_v46  ;;  %v560_v58 = vsel %vm553_vm4, %v551_v54, %v404_v45 }
  0x9f   : > { %v400_v39 = vpop.permute.xlu0 %399 }
  0xa3   : > { %393 = vrot.lane.b32.xlu1 %v1183_v42, %s1012_s14  ;;  %397 = vrot.lane.b32.xlu2 %v1093_v0, %s1012_s14 }
  0xa5   : > { %525 = vrot.lane.b32.xlu0 %v342_v50, %s1016_s25  ;;  %v448_v2 = vpop.permute.xlu1 %447  ;;  %v524_v51 = vpop.permute.xlu2 %523 }
  0xa7   : > { %v428_v52 = vpop.permute.xlu0 %427 }
  0xa8   : > { %v569_v10 = vsel %vm562_vm5, %v560_v58, %v428_v52 }
  0xab   : > { %421 = vrot.lane.b32.xlu1 %v1119_v13, %s1011_s13  ;;  %441 = vrot.lane.b32.xlu2 %v1214_v60, %s1013_s22  ;;  %v540_v13 = vsel %vm535_vm2, %v1093_v0, %v1310_v27 }
  0xac   : > { %v549_v0 = vsel %vm544_vm3, %v540_v13, %v1266_v11 }
  0xad   : > { %417 = vrot.lane.b32.xlu0 %v1195_v47, %s1011_s13  ;;  %v476_v55 = vpop.permute.xlu1 %475  ;;  %v1356_v56 = vpop.permute.xlu2 %391  ;;  %v578_v47 = vsel %vm571_vm6, %v569_v10, %v1308_v25  ;;  %v558_v4 = vsel %vm553_vm4, %v549_v0, %v400_v39 }
  0xae   : > { %v587_v59 = vsel %vm580_vm7, %v578_v47, %v476_v55 }
  0xaf   : > { %v472_v57 = vpop.permute.xlu0 %471 }
  0xb3   : > { %465 = vrot.lane.b32.xlu1 %v1228_v61, %s1014_s23  ;;  %469 = vrot.lane.b32.xlu2 %v1147_v26, %s1014_s23 }
  0xb5   : > { %445 = vrot.lane.b32.xlu0 %v1116_v12, %s1013_s22  ;;  %v500_v60 = vpop.permute.xlu1 %499  ;;  %v382_v62 = vpop.permute.xlu2 %381  ;;  %v567_v12 = vsel %vm562_vm5, %v558_v4, %v1288_v16 }
  0xb6   : > { %v596_v63 = vsel %vm589_vm8, %v587_v59, %v500_v60  ;;  %v576_v6 = vsel %vm571_vm6, %v567_v12, %v448_v2 }
  0xb7   : > { %v496_v1 = vpop.permute.xlu0 %495  ;;  %v605_v5 = vsel %vm598_vm9, %v596_v63, %v524_v51  ;;  %v585_v7 = vsel %vm580_vm7, %v576_v6, %v472_v57 }
  0xb8   : > { %853 = vmatmul.msk.f32.vlgmr.msra.gmra.mxu3 %vm616_vm10, %v605_v5  ;;  %v594_v8 = vsel %vm589_vm8, %v585_v7, %v496_v1 }
  0xbb   : > { %493 = vrot.lane.b32.xlu1 %v1158_v30, %s1015_s24  ;;  %513 = vrot.lane.b32.xlu2 %v1254_v9, %s1016_s25 }
  0xbd   : > { %489 = vrot.lane.b32.xlu0 %v1239_v3, %s1015_s24  ;;  %v520_v11 = vpop.permute.xlu1 %519  ;;  %v402_v16 = vpop.permute.xlu2 %401 }
  0xbe   : > { %v603_v17 = vsel %vm598_vm9, %v594_v8, %v520_v11 }
  0xbf   : > { %v372_v15 = vpop.permute.xlu0 %371  ;;  %851 = vmatmul.msk.f32.vlgmr.msra.gmra.mxu2 %vm616_vm10, %v603_v17 }
  0xc5   : > { %517 = vrot.lane.b32.xlu0 %v1177_v40, %s1016_s25  ;;  %v358_v30 = vpop.permute.xlu1 %357  ;;  %v444_v3 = vpop.permute.xlu2 %443 }
  0xc6   : > { %v543_v9 = vsel %vm535_vm2, %v1161_v31, %v358_v30  ;;  %v538_v31 = vsel %vm535_vm2, %v1183_v42, %v1322_v37  ;;  %v554_v42 = vsel %vm553_vm4, %v1338_v49, %v1356_v56 }
  0xc7   : > { %v354_v18 = vpop.permute.xlu0 %353  ;;  %v552_v19 = vsel %vm544_vm3, %v543_v9, %v382_v62  ;;  %v547_v35 = vsel %vm544_vm3, %v538_v31, %v372_v15 }
  0xc8   : > { %v541_v52 = vsel %vm535_vm2, %v1147_v26, %v354_v18 }
  0xcd   : > { %v378_v20 = vpop.permute.xlu1 %377  ;;  %v464_v22 = vpop.permute.xlu2 %463 }
  0xce   : > { %v550_v54 = vsel %vm544_vm3, %v541_v52, %v378_v20 }
  0xcf   : > { %v396_v21 = vpop.permute.xlu0 %395  ;;  %v559_v58 = vsel %vm553_vm4, %v550_v54, %v402_v16 }
  0xd0   : > { %v556_v36 = vsel %vm553_vm4, %v547_v35, %v396_v21 }
  0xd5   : > { %v420_v23 = vpop.permute.xlu1 %419  ;;  %v454_v25 = vpop.permute.xlu2 %453 }
  0xd6   : > { %v565_v41 = vsel %vm562_vm5, %v556_v36, %v420_v23 }
  0xd7   : > { %v416_v24 = vpop.permute.xlu0 %415  ;;  %v574_v44 = vsel %vm571_vm6, %v565_v41, %v444_v3  ;;  %v537_v3 = vsel %vm535_vm2, %v1122_v14, %v1324_v38 }
  0xd8   : > { %v563_v50 = vsel %vm562_vm5, %v554_v42, %v416_v24 }
  0xdd   : > { %v440_v27 = vpop.permute.xlu1 %439  ;;  %v474_v33 = vpop.permute.xlu2 %473 }
  0xde   : > { %v572_v2 = vsel %vm571_vm6, %v563_v50, %v440_v27 }
  0xdf   : > { %v406_v28 = vpop.permute.xlu0 %405  ;;  %v581_v53 = vsel %vm580_vm7, %v572_v2, %v464_v22 }
  0xe0   : > { %v561_v1 = vsel %vm553_vm4, %v552_v19, %v406_v28 }
  0xe5   : > { %v430_v29 = vpop.permute.xlu1 %429  ;;  %v516_v43 = vpop.permute.xlu2 %515 }
  0xe6   : > { %v570_v5 = vsel %vm562_vm5, %v561_v1, %v430_v29 }
  0xe7   : > { %v426_v32 = vpop.permute.xlu0 %425  ;;  %v579_v6 = vsel %vm571_vm6, %v570_v5, %v454_v25 }
  0xe8   : > { %v568_v10 = vsel %vm562_vm5, %v559_v58, %v426_v32 }
  0xed   : > { %v450_v40 = vpop.permute.xlu1 %449  ;;  %v502_v51 = vpop.permute.xlu2 %501 }
  0xee   : > { %v577_v13 = vsel %vm571_vm6, %v568_v10, %v450_v40 }
  0xef   : > { %v468_v34 = vpop.permute.xlu0 %467  ;;  %v586_v26 = vsel %vm580_vm7, %v577_v13, %v474_v33 }
  0xf0   : > { %v583_v45 = vsel %vm580_vm7, %v574_v44, %v468_v34 }
  0xf5   : > { %v492_v46 = vpop.permute.xlu1 %491  ;;  %v522_v47 = vpop.permute.xlu2 %521 }
  0xf6   : > { %v592_v48 = vsel %vm589_vm8, %v583_v45, %v492_v46 }
  0xf7   : > { %v488_v39 = vpop.permute.xlu0 %487  ;;  %v601_v37 = vsel %vm598_vm9, %v592_v48, %v516_v43 }
  0xf8   : > { %849 = vmatmul.msk.f32.vlgmr.msra.gmra.mxu1 %vm616_vm10, %v601_v37  ;;  %v590_v55 = vsel %vm589_vm8, %v581_v53, %v488_v39 }
  0xfd   : > { %v512_v57 = vpop.permute.xlu1 %511  ;;  %v398_v12 = vpop.permute.xlu2 %397 }
  0xfe   : > { %v599_v56 = vsel %vm598_vm9, %v590_v55, %v512_v57 }
  0xff   : > { %v478_v49 = vpop.permute.xlu0 %477  ;;  %847 = vmatmul.msk.f32.vlgmr.msra.gmra.mxu0 %vm616_vm10, %v599_v56 }
 0x100   : > { %v588_v7 = vsel %vm580_vm7, %v579_v6, %v478_v49 }
 0x101   : > { %v597_v11 = vsel %vm589_vm8, %v588_v7, %v502_v51 }
 0x105   : > { %v498_v59 = vpop.permute.xlu1 %497  ;;  %v442_v16 = vpop.permute.xlu2 %441 }
 0x106   : > { %v595_v60 = vsel %vm589_vm8, %v586_v26, %v498_v59 }
 0x107   : > { %v350_v62 = vpop.permute.xlu0 %349  ;;  %v604_v0 = vsel %vm598_vm9, %v595_v60, %v522_v47 }
 0x108   : > { %852 = vmatmul.msk.f32.gmra.mxu2 %vm616_vm10, %v604_v0  ;;  %v539_v24 = vsel %vm535_vm2, %v1228_v61, %v350_v62 }
 0x10d   : > { %v374_v63 = vpop.permute.xlu1 %373  ;;  %v470_v18 = vpop.permute.xlu2 %469 }
 0x10e   : > { %v548_v25 = vsel %vm544_vm3, %v539_v24, %v374_v63 }
 0x10f   : > { %v370_v4 = vpop.permute.xlu0 %369  ;;  %v557_v38 = vsel %vm553_vm4, %v548_v25, %v398_v12 }
 0x110   : > { %v546_v20 = vsel %vm544_vm3, %v537_v3, %v370_v4 }
 0x115   : > { %v394_v8 = vpop.permute.xlu1 %393  ;;  %v514_v28 = vpop.permute.xlu2 %513 }
 0x116   : > { %v555_v21 = vsel %vm553_vm4, %v546_v20, %v394_v8 }
 0x117   : > { %v526_v15 = vpop.permute.xlu0 %525 }
 0x118   : > { %v606_v17 = vsel %vm598_vm9, %v597_v11, %v526_v15 }
 0x119   : > { %854 = vmatmul.msk.f32.gmra.mxu3 %vm616_vm10, %v606_v17 }
 0x11d   : > { %v422_v9 = vpop.permute.xlu1 %421 }
 0x11e   : > { %v566_v40 = vsel %vm562_vm5, %v557_v38, %v422_v9 }
 0x11f   : > { %v418_v30 = vpop.permute.xlu0 %417 }
 0x120   : > { %v564_v23 = vsel %vm562_vm5, %v555_v21, %v418_v30 }
 0x121   : > { %v573_v27 = vsel %vm571_vm6, %v564_v23, %v442_v16 }
 0x125   : > { %v466_v22 = vpop.permute.xlu1 %465 }
 0x126   : > { %v582_v29 = vsel %vm580_vm7, %v573_v27, %v466_v22 }
 0x127   : > { %v446_v19 = vpop.permute.xlu0 %445 }
 0x128   : > { %v575_v61 = vsel %vm571_vm6, %v566_v40, %v446_v19 }
 0x129   : > { %v584_v34 = vsel %vm580_vm7, %v575_v61, %v470_v18 }
 0x12d   : > { %v494_v31 = vpop.permute.xlu1 %493 }
 0x12e   : > { %v593_v35 = vsel %vm589_vm8, %v584_v34, %v494_v31 }
 0x12f   : > { %v490_v32 = vpop.permute.xlu0 %489 }
 0x130   : > { %v591_v14 = vsel %vm589_vm8, %v582_v29, %v490_v32 }
 0x131   : > { %v600_v33 = vsel %vm598_vm9, %v591_v14, %v514_v28 }
 0x132   : > { %848 = vmatmul.msk.f32.gmra.mxu0 %vm616_vm10, %v600_v33 }
 0x137   : > { %v518_v36 = vpop.permute.xlu0 %517 }
 0x138   : > { %v602_v43 = vsel %vm598_vm9, %v593_v35, %v518_v36 }
 0x139   : > { %850 = vmatmul.msk.f32.gmra.mxu1 %vm616_vm10, %v602_v43 }
 0x13b   : > { %v676_v41 = vpop.f32.mrf.mxu3 }
 0x142   : > { %v670_v44 = vpop.f32.mrf.mxu2 }
 0x175   : > { %v664_v45 = vpop.f32.mrf.mxu1 }
 0x17c   : > { %v658_v46 = vpop.f32.mrf.mxu0 }
 0x18b   : > { %v673_v48 = vpop.f32.mrf.mxu2 }
 0x19c   : > { %v679_v39 = vpop.f32.mrf.mxu3 }
 0x1af   : > { %v661_v42 = vpop.f32.mrf.mxu0 }
 0x1b2   : > { %685 = sbr.rel (%p855_p10) target bundleno = 448 (0x1c0), region = 36 }
 0x1b6   : > { %v667_v37 = vpop.f32.mrf.mxu1 }
 0x1b7   : > { %v952_v50 = vld [vmem:[%s1513_s2] ss:$0 sm:$0xff]  ;;  %vm690_vm11 = vcmask 31744  }
 0x1b8   : > { %691 = vst.msk [vmem:[%s1102_s9] sm:$0xff] %vm690_vm11, %v952_v50 }
 0x1b9   : > { %692 = vst.msk [vmem:[%s1102_s9 + $0x8] sm:$0xff] %vm690_vm11, %v952_v50 }
 0x1ba   : > { %693 = vst.msk [vmem:[%s1102_s9 + $0x10] sm:$0xff] %vm690_vm11, %v952_v50 }
 0x1bb   : > { %694 = vst.msk [vmem:[%s1102_s9 + $0x18] sm:$0xff] %vm690_vm11, %v952_v50 }
 0x1bc   : > { %695 = vst.msk [vmem:[%s1102_s9 + $0x20] sm:$0xff] %vm690_vm11, %v952_v50 }
 0x1bd   : > { %696 = vst.msk [vmem:[%s1102_s9 + $0x28] sm:$0xff] %vm690_vm11, %v952_v50 }
 0x1be   : > { %697 = vst.msk [vmem:[%s1102_s9 + $0x30] sm:$0xff] %vm690_vm11, %v952_v50 }
 0x1bf   : > { %698 = vst.msk [vmem:[%s1102_s9 + $0x38] sm:$0xff] %vm690_vm11, %v952_v50 }
 0x1c0 PF: > { %v699_v2 = vld [vmem:[%s1102_s9] sm:$0xff]  ;;  %vm715_vm12 = vcmask 31744   ;;  %v700_v51 = vld [vmem:[%s1102_s9 + $0x8] sm:$0xff] }
 0x1c1   : > { %v701_v52 = vld [vmem:[%s1102_s9 + $0x10] sm:$0xff]  ;;  %v707_v53 = vadd.f32 %v699_v2, %v658_v46  ;;  %v708_v54 = vadd.f32 %v700_v51, %v661_v42 }
 0x1c2   : > { %v709_v55 = vadd.f32 %v701_v52, %v664_v45  ;;  %v702_v57 = vld [vmem:[%s1102_s9 + $0x18] sm:$0xff] }
 0x1c3   : > { %v703_v49 = vld [vmem:[%s1102_s9 + $0x20] sm:$0xff]  ;;  %v710_v58 = vadd.f32 %v702_v57, %v667_v37  ;;  %716 = vst.msk [vmem:[%s1102_s9] sm:$0xff] %vm715_vm12, %v707_v53 }
 0x1c4   : > { %v704_v56 = vld [vmem:[%s1102_s9 + $0x28] sm:$0xff]  ;;  %v711_v13 = vadd.f32 %v703_v49, %v670_v44  ;;  %717 = vst.msk [vmem:[%s1102_s9 + $0x8] sm:$0xff] %vm715_vm12, %v708_v54 }
 0x1c5   : > { %v705_v10 = vld [vmem:[%s1102_s9 + $0x30] sm:$0xff]  ;;  %v712_v26 = vadd.f32 %v704_v56, %v673_v48  ;;  %718 = vst.msk [vmem:[%s1102_s9 + $0x10] sm:$0xff] %vm715_vm12, %v709_v55 }
 0x1c6   : > { %v706_v47 = vld [vmem:[%s1102_s9 + $0x38] sm:$0xff]  ;;  %v713_v59 = vadd.f32 %v705_v10, %v676_v41  ;;  %719 = vst.msk [vmem:[%s1102_s9 + $0x18] sm:$0xff] %vm715_vm12, %v710_v58 }
 0x1c7   : > { %v714_v60 = vadd.f32 %v706_v47, %v679_v39  ;;  %720 = vst.msk [vmem:[%s1102_s9 + $0x20] sm:$0xff] %vm715_vm12, %v711_v13 }
 0x1c8   : > { %721 = vst.msk [vmem:[%s1102_s9 + $0x28] sm:$0xff] %vm715_vm12, %v712_v26 }
 0x1c9   : > { %722 = vst.msk [vmem:[%s1102_s9 + $0x30] sm:$0xff] %vm715_vm12, %v713_v59 }
 0x1ca   : > { %723 = vst.msk [vmem:[%s1102_s9 + $0x38] sm:$0xff] %vm715_vm12, %v714_v60 }
 0x1cb PF: > { %s13_s18 = sadd.s32 1, %s1007_s18   ;;  %s1515_s12 = smov %s995_s15 }
 0x1cc   : > { %p10_p11 = scmp.ge.s32.totalorder %s13_s18, 50   ;;  %s1516_s13 = smov %s999_s16 }
 0x1cd   : > { %s1517_s14 = smov %s1003_s17  ;;  %s1518_s15 = smov %s1522_s19 }
 0x1ce   : > { %s1519_s16 = smov %s1526_s20  ;;  %s1520_s17 = smov %s1530_s21 }
 0x1cf   :  { %12 = sbr.rel (!%p10_p11) target bundleno = 4 (0x4), region = 69 }

// kernel: tile.43
= control target key start
LH: loop header
LB: loop body
LE: loop exit
PB: predicated region body
PF: predicated region fallthrough
CT: control target
= control target key end

     0   :  { %s22_s0 = inlined_call_operand.vmem [shape: f32[4], index: 0, kind: input, shape index: {}]   ;;  %s23_s1 = inlined_call_operand.vmem [shape: f32[2,4], index: 1, kind: output, shape index: {}]  }
   0x1   :  { %v4_v0 = vld [vmem:[%s22_s0] ss:$0 sm:$0xff] }
   0x2   :  { %5 = vst [vmem:[%s23_s1] sm:$0x3] %v4_v0 }

// kernel: tile.2
= control target key start
LH: loop header
LB: loop body
LE: loop exit
PB: predicated region body
PF: predicated region fallthrough
CT: control target
= control target key end

     0   :  { %s34_s8 = smov 125   ;;  %s35_s9 = smov 126   ;;  %vm7_vm0 = vcmask 7168   ;;  %s61_s0 = inlined_call_operand.vmem [shape: f32[2,4], index: 0, kind: input, shape index: {}]   ;;  %s62_s1 = inlined_call_operand.vmem [shape: f32[8,1], index: 1, kind: output, shape index: {}]  }
   0x1   :  { %v4_v0 = vld [vmem:[%s61_s0] sm:$0x3]  ;;  %s33_s0 = smov 127  }
   0x2   :  { %5 = vst [vmem:[#allocation0] sm:$0x3] %v4_v0 }
   0x9   :  { %v9_v1 = vld [vmem:[#allocation0] sm:$0x3]  }
   0xa   :  { %v21_v2 = vld [vmem:[#allocation0] sm:$0x3]   ;;  %10 = vrot.lane.b32.xlu0 %v9_v1, %s33_s0 }
   0xb   :  { %22 = vrot.lane.b32.xlu1 %v21_v2, %s34_s8  ;;  %v15_v3 = vld [vmem:[#allocation0] sm:$0x3]  }
   0xc   :  { %v6_v4 = vld [vmem:[#allocation0] sm:$0x3]  }
   0xd   :  { %8 = vst.msk [vmem:[%s62_s1] ss:$4 sm:$0x3] %vm7_vm0, %v6_v4  }
  0x12   :  { %16 = vrot.lane.b32.xlu0 %v15_v3, %s35_s9 }
  0x7c   :  { %v11_v5 = vpop.permute.xlu0 %10  }
  0x7d   :  { %v23_v6 = vpop.permute.xlu1 %22   ;;  %27 = vst.msk [vmem:[%s62_s1 + $0x1] ss:$4 sm:$0x3] %vm7_vm0, %v11_v5  }
  0x7e   :  { %29 = vst.msk [vmem:[%s62_s1 + $0x3] ss:$4 sm:$0x3] %vm7_vm0, %v23_v6  }
  0x84   :  { %v17_v7 = vpop.permute.xlu0 %16  }
  0x85   :  { %28 = vst.msk [vmem:[%s62_s1 + $0x2] ss:$4 sm:$0x3] %vm7_vm0, %v17_v7  }

// kernel: basic_block_forward.15
= control target key start
LH: loop header
LB: loop body
LE: loop exit
PB: predicated region body
PF: predicated region fallthrough
CT: control target
= control target key end

     0   :  { %v108_v7 = vmov 512.0   ;;  %v109_v11 = vmov 0   ;;  %s160_s0 = inlined_call_operand.vmem [shape: f32[8,512], index: 0, kind: input, shape index: {}]   ;;  %s161_s1 = inlined_call_operand.vmem [shape: f32[8,1], index: 1, kind: input, shape index: {}]   ;;  %s162_s2 = inlined_call_operand.vmem [shape: f32[8,1], index: 2, kind: input, shape index: {}]   ;;  %s163_s3 = inlined_call_operand.vmem [shape: f32[8,512], index: 3, kind: output, shape index: {}]  }
   0x1   :  { %v14_v0 = vld [vmem:[%s160_s0] sm:$0xff]  ;;  %v15_v1 = vld [vmem:[%s160_s0 + $0x8] sm:$0xff]  ;;  %v16_v2 = vld [vmem:[%s160_s0 + $0x10] sm:$0xff]  ;;  %104 = vrcp.f32 %v108_v7  ;;  %102 = vset.pattern.permute.xlu1 %v109_v11  ;;  %103 = vset.pattern.permute.xlu0 %v109_v11 }
   0x2   :  { %v18_v3 = vadd.f32 %v15_v1, %v14_v0  ;;  %v17_v4 = vld [vmem:[%s160_s0 + $0x18] sm:$0xff]  ;;  %v60_v9 = vld [vmem:[%s161_s1] sm:$0xff] }
   0x3   :  { %63 = vperm.xlu1 %102, %v60_v9   ;;  %v70_v13 = vld [vmem:[%s162_s2] sm:$0xff] }
   0x4   :  { %v19_v5 = vadd.f32 %v18_v3, %v16_v2 }
   0x6   :  { %v20_v6 = vadd.f32 %v19_v5, %v17_v4 }
   0x7   :  { %v105_v8 = vpop.eup %104 }
   0x8   :  { %21 = vadd.xlane.f32.xlu0 %v20_v6  ;;  %v24_v10 = vmul.f32 512.0, %v105_v8  ;;  %vm28_vm0 = vweird.f32 %v105_v8 }
   0xa   :  { %v25_v12 = vsub.f32 1.0, %v24_v10 }
   0xb   :  { %73 = vperm.xlu1 %102, %v70_v13  }
   0xc   :  { %v26_v14 = vmul.f32 %v105_v8, %v25_v12 }
   0xe   :  { %v27_v15 = vadd.f32 %v105_v8, %v26_v14 }
  0x10   :  { %v29_v16 = vsel %vm28_vm0, %v105_v8, %v27_v15 }
  0x75   :  { %v64_v37 = vpop.permute.xlu1 %63 }
  0x7b   :  { %v22_v17 = vpop.xlane.xlu0 %21 }
  0x7c   :  { %v30_v18 = vmul.f32 %v29_v16, %v22_v17 }
  0x7d   :  { %v74_v49 = vpop.permute.xlu1 %73 }
  0x7e   :  { %v31_v19 = vsub.f32 %v14_v0, %v30_v18  ;;  %v32_v20 = vsub.f32 %v15_v1, %v30_v18  ;;  %v33_v21 = vsub.f32 %v16_v2, %v30_v18  ;;  %v34_v22 = vsub.f32 %v17_v4, %v30_v18 }
  0x80   :  { %v35_v23 = vmul.f32 %v31_v19, %v31_v19  ;;  %v36_v24 = vmul.f32 %v32_v20, %v32_v20  ;;  %v37_v25 = vmul.f32 %v33_v21, %v33_v21  ;;  %v38_v27 = vmul.f32 %v34_v22, %v34_v22 }
  0x82   :  { %v39_v26 = vadd.f32 %v36_v24, %v35_v23 }
  0x84   :  { %v40_v28 = vadd.f32 %v39_v26, %v37_v25 }
  0x86   :  { %v41_v29 = vadd.f32 %v40_v28, %v38_v27 }
  0x88   :  { %42 = vadd.xlane.f32.xlu0 %v41_v29 }
  0xfb   :  { %v43_v30 = vpop.xlane.xlu0 %42 }
  0xfc   :  { %v44_v31 = vmul.f32 %v43_v30, %v29_v16 }
  0xfe   :  { %v45_v32 = vadd.f32 1e-05, %v44_v31 }
 0x100   :  { %106 = vrsqrt.f32 %v45_v32  ;;  %vm52_vm2 = vweird.f32 %v45_v32 }
 0x106   :  { %v107_v33 = vpop.eup %106 }
 0x107   :  { %v47_v34 = vmul.f32 %v107_v33, %v45_v32  ;;  %vm53_vm1 = vweird.f32 %v107_v33 }
 0x108   :  { %vm54_vm3 = vmor %vm52_vm2, %vm53_vm1 }
 0x109   :  { %v48_v35 = vmul.f32 %v107_v33, %v47_v34 }
 0x10b   :  { %v49_v36 = vmul.f32 0.5, %v48_v35 }
 0x10d   :  { %v50_v38 = vsub.f32 1.5, %v49_v36 }
 0x10f   :  { %v51_v39 = vmul.f32 %v107_v33, %v50_v38 }
 0x111   :  { %v55_v40 = vsel %vm54_vm3, %v107_v33, %v51_v39 }
 0x112   :  { %v56_v41 = vmul.f32 %v55_v40, %v31_v19  ;;  %v57_v42 = vmul.f32 %v55_v40, %v32_v20  ;;  %v58_v43 = vmul.f32 %v55_v40, %v33_v21  ;;  %v59_v44 = vmul.f32 %v55_v40, %v34_v22 }
 0x114   :  { %v66_v45 = vmul.f32 %v64_v37, %v56_v41  ;;  %v67_v46 = vmul.f32 %v64_v37, %v57_v42  ;;  %v68_v47 = vmul.f32 %v64_v37, %v58_v43  ;;  %v69_v48 = vmul.f32 %v64_v37, %v59_v44 }
 0x116   :  { %v76_v50 = vadd.f32 %v74_v49, %v66_v45  ;;  %v77_v51 = vadd.f32 %v74_v49, %v67_v46  ;;  %v78_v52 = vadd.f32 %v74_v49, %v68_v47  ;;  %v79_v53 = vadd.f32 %v74_v49, %v69_v48 }
 0x118   :  { %vm80_vm4 = vcmp.ge.f32.partialorder %v76_v50, 0.0  ;;  %vm81_vm5 = vcmp.ge.f32.partialorder %v77_v51, 0.0  ;;  %vm82_vm6 = vcmp.ge.f32.partialorder %v78_v52, 0.0  ;;  %vm83_vm7 = vcmp.ge.f32.partialorder %v79_v53, 0.0 }
 0x119   :  { %v84_v54 = vmul.f32 0.01, %v76_v50  ;;  %v85_v55 = vmul.f32 0.01, %v77_v51  ;;  %v86_v56 = vmul.f32 0.01, %v78_v52 }
 0x11a   :  { %v87_v57 = vmul.f32 0.01, %v79_v53 }
 0x11b   :  { %v88_v58 = vsel %vm80_vm4, %v76_v50, %v84_v54  ;;  %v89_v59 = vsel %vm81_vm5, %v77_v51, %v85_v55  ;;  %v90_v60 = vsel %vm82_vm6, %v78_v52, %v86_v56 }
 0x11c   :  { %v91_v61 = vsel %vm83_vm7, %v79_v53, %v87_v57  ;;  %92 = vst [vmem:[%s163_s3] sm:$0xff] %v88_v58 }
 0x11d   :  { %93 = vst [vmem:[%s163_s3 + $0x8] sm:$0xff] %v89_v59 }
 0x11e   :  { %94 = vst [vmem:[%s163_s3 + $0x10] sm:$0xff] %v90_v60 }
 0x11f   :  { %95 = vst [vmem:[%s163_s3 + $0x18] sm:$0xff] %v91_v61 }

</bundles_post_ra>
